<compile_context>
chip_gen: v5e
topology: v5e:2x2
jax: 0.10.0
libtpu: 0.0.40
codegen_flags: <defaults>
</compile_context>

<pallas_src>
import functools
import math

import jax
import jax.numpy as jnp
from jax.experimental import pallas as pl
from jax.experimental.pallas import tpu as pltpu

_FALLBACK_VMEM_LIMIT = 32 * 1024 * 1024   # safe everywhere (v5e/v6e/v7x)


@functools.lru_cache(maxsize=None)
def _vmem_limit():
    """Scoped-VMEM cap: ~3/4 of physical VMEM, conservative fallback."""
    try:
        cap = getattr(pltpu.get_tpu_info(), "vmem_capacity_bytes", None)
    except Exception:
        cap = None
    if not cap:
        return _FALLBACK_VMEM_LIMIT
    return int(min(cap * 3 // 4, 100 * 1024 * 1024))


def _choose_token_tile(n, cap=256):
    """Token-axis tile: full axis for tiny problems; otherwise >=2 tiles
    (v7x megacore) with a multiple-of-8 sublane count, capped for VMEM."""
    if n <= 8:
        return n
    half = -(-n // 2)                      # ceil(n/2)
    t = max(8, (half // 8) * 8)
    return min(t, cap)


# ----------------------------- Pallas kernels -----------------------------

def _patch_embed_kernel(p_ref, w_ref, b_ref, pos_ref, o_ref):
    # p_ref: (1, TP, K) f32, w: (K, E) bf16, b: (1, E) f32, pos: (TP, E) f32
    acc = jnp.dot(p_ref[0].astype(jnp.bfloat16), w_ref[...],
                  preferred_element_type=jnp.float32)
    o_ref[0] = (acc + b_ref[...] + pos_ref[...]).astype(o_ref.dtype)


def patch_embed(patches, w, b, pos):
    """patches: (B, Np, K) @ w: (K, E) + b + pos[Np, E] -> (B, Np, E)."""
    B, Np, K = patches.shape
    E = w.shape[1]
    TP = _choose_token_tile(Np)
    grid = (B, pl.cdiv(Np, TP))
    return pl.pallas_call(
        _patch_embed_kernel,
        out_shape=jax.ShapeDtypeStruct((B, Np, E), jnp.float32),
        grid=grid,
        in_specs=[
            pl.BlockSpec((1, TP, K), lambda b_, j: (b_, j, 0)),
            pl.BlockSpec((K, E), lambda b_, j: (0, 0)),
            pl.BlockSpec((1, E), lambda b_, j: (0, 0)),
            pl.BlockSpec((TP, E), lambda b_, j: (j, 0)),
        ],
        out_specs=pl.BlockSpec((1, TP, E), lambda b_, j: (b_, j, 0)),
        compiler_params=pltpu.CompilerParams(
            dimension_semantics=("parallel", "parallel"),
            vmem_limit_bytes=_vmem_limit()),
    )(patches, w.astype(jnp.bfloat16), b.reshape(1, E), pos)


def _encoder_layer_kernel(x_ref, w_in_ref, b_in_ref, wo_ref, bo_ref,
                          hsum_ref, hbc_ref, ln1_g_ref, ln1_b_ref,
                          w1_ref, fb1_ref, w2_ref, fb2_ref,
                          ln2_g_ref, ln2_b_ref, o_ref,
                          q_scr, k_scr, v_scr, *, eps):
    """One fused TransformerEncoderLayer step on a (L, TN, E) token tile.

    Attention is over L (the image-batch axis, batch_first=False quirk) for
    each of the TN token rows and each head; per-head reduce/broadcast use
    tiny indicator matmuls (hsum: (E,H), hbc: (H,E)) so intermediates stay
    full-E lanes wide.
    """
    L, TN, E = x_ref.shape
    H = hsum_ref.shape[1]
    scale = 1.0 / math.sqrt(E // H)

    # Hoisted loop-invariant reads (one vld each; no per-iteration reloads).
    w_in = w_in_ref[...]            # (E, 3E) bf16
    b_in = b_in_ref[...]            # (1, 3E) f32
    wo = wo_ref[...]                # (E, E)  bf16
    bo = bo_ref[...]                # (1, E)  f32
    hsum = hsum_ref[...]            # (E, H)  bf16
    hbc = hbc_ref[...]              # (H, E)  bf16
    g1 = ln1_g_ref[...]
    beta1 = ln1_b_ref[...]
    w1 = w1_ref[...]                # (E, F)  bf16
    fb1 = fb1_ref[...]              # (1, F)  f32
    w2 = w2_ref[...]                # (F, E)  bf16
    fb2 = fb2_ref[...]              # (1, E)  f32
    g2 = ln2_g_ref[...]
    beta2 = ln2_b_ref[...]

    # ---- 1) QKV projection for every attended position -> VMEM scratch.
    def qkv_body(l, carry):
        xl = x_ref[l].astype(jnp.bfloat16)                          # (TN, E)
        qkv = jnp.dot(xl, w_in, preferred_element_type=jnp.float32) + b_in
        q_scr[l] = qkv[:, 0:E] * scale           # fold 1/sqrt(Dh) into q
        k_scr[l] = qkv[:, E:2 * E]
        v_scr[l] = qkv[:, 2 * E:3 * E]
        return carry

    jax.lax.fori_loop(0, L, qkv_body, 0, unroll=True)

    # ---- 2) per query position: attention (flash-style over sources) +
    #         out-proj + residual + LN1 + FFN + residual + LN2.
    def token_body(l, carry):
        q = q_scr[l]                                                # (TN, E) f32

        def src_body(m, st):
            m_i, l_i, acc = st
            k = k_scr[m]
            v = v_scr[m]
            s = jnp.dot((q * k).astype(jnp.bfloat16), hsum,
                        preferred_element_type=jnp.float32)         # (TN, H)
            m_new = jnp.maximum(m_i, s)
            alpha = jnp.exp(m_i - m_new)
            p = jnp.exp(s - m_new)
            l_i = alpha * l_i + p
            alpha_e = jnp.dot(alpha.astype(jnp.bfloat16), hbc,
                              preferred_element_type=jnp.float32)   # (TN, E)
            p_e = jnp.dot(p.astype(jnp.bfloat16), hbc,
                          preferred_element_type=jnp.float32)       # (TN, E)
            acc = alpha_e * acc + p_e * v
            return m_new, l_i, acc

        m0 = jnp.full((TN, H), -jnp.inf, dtype=jnp.float32)
        l0 = jnp.zeros((TN, H), dtype=jnp.float32)
        a0 = jnp.zeros((TN, E), dtype=jnp.float32)
        m_i, l_i, acc = jax.lax.fori_loop(0, L, src_body, (m0, l0, a0),
                                          unroll=True)

        inv = pl.reciprocal(l_i, approx=True)                       # EUP slot
        attn = acc * jnp.dot(inv.astype(jnp.bfloat16), hbc,
                             preferred_element_type=jnp.float32)

        # out-projection + residual + LayerNorm1
        y = (jnp.dot(attn.astype(jnp.bfloat16), wo,
                     preferred_element_type=jnp.float32) + bo) + x_ref[l]
        mu = jnp.mean(y, axis=-1, keepdims=True)
        var = jnp.mean(jnp.square(y - mu), axis=-1, keepdims=True)
        x1 = (y - mu) * jax.lax.rsqrt(var + eps) * g1 + beta1

        # FFN + residual + LayerNorm2 ((TN, F) intermediate never leaves VMEM)
        h = jnp.dot(x1.astype(jnp.bfloat16), w1,
                    preferred_element_type=jnp.float32) + fb1
        h = jnp.maximum(h, 0.0)
        y2 = jnp.dot(h.astype(jnp.bfloat16), w2,
                     preferred_element_type=jnp.float32) + fb2 + x1
        mu2 = jnp.mean(y2, axis=-1, keepdims=True)
        var2 = jnp.mean(jnp.square(y2 - mu2), axis=-1, keepdims=True)
        o_ref[l] = ((y2 - mu2) * jax.lax.rsqrt(var2 + eps) * g2 + beta2
                    ).astype(o_ref.dtype)
        return carry

    jax.lax.fori_loop(0, L, token_body, 0, unroll=True)


def encoder_layer_block(x, p, num_heads, eps=1e-5):
    """x: (L, Np, E) -> LN2(x1 + FFN(x1)), x1 = LN1(x + MHA(x)); one kernel."""
    L, Np, E = x.shape
    H = num_heads
    Dh = E // H
    F = p["w1"].shape[1]
    TN = _choose_token_tile(Np)
    grid = (pl.cdiv(Np, TN),)

    # Head indicator matrices: hsum sums lanes per head, hbc broadcasts back.
    lane_head = jnp.arange(E) // Dh
    hsum = (lane_head[:, None] == jnp.arange(H)[None, :]).astype(jnp.bfloat16)
    hbc = hsum.T

    bf = jnp.bfloat16
    const = lambda j: (0, 0)
    kern = functools.partial(_encoder_layer_kernel, eps=eps)
    return pl.pallas_call(
        kern,
        out_shape=jax.ShapeDtypeStruct((L, Np, E), jnp.float32),
        grid=grid,
        in_specs=[
            pl.BlockSpec((L, TN, E), lambda j: (0, j, 0)),
            pl.BlockSpec((E, 3 * E), const), pl.BlockSpec((1, 3 * E), const),
            pl.BlockSpec((E, E), const), pl.BlockSpec((1, E), const),
            pl.BlockSpec((E, H), const), pl.BlockSpec((H, E), const),
            pl.BlockSpec((1, E), const), pl.BlockSpec((1, E), const),
            pl.BlockSpec((E, F), const), pl.BlockSpec((1, F), const),
            pl.BlockSpec((F, E), const), pl.BlockSpec((1, E), const),
            pl.BlockSpec((1, E), const), pl.BlockSpec((1, E), const),
        ],
        out_specs=pl.BlockSpec((L, TN, E), lambda j: (0, j, 0)),
        scratch_shapes=[
            pltpu.VMEM((L, TN, E), jnp.float32),   # q
            pltpu.VMEM((L, TN, E), jnp.float32),   # k
            pltpu.VMEM((L, TN, E), jnp.float32),   # v
        ],
        compiler_params=pltpu.CompilerParams(
            dimension_semantics=("parallel",),
            vmem_limit_bytes=_vmem_limit()),
    )(x,
      p["w_in"].astype(bf), p["b_in"].reshape(1, 3 * E),
      p["w_out"].astype(bf), p["b_out"].reshape(1, E),
      hsum, hbc,
      p["ln1_g"].reshape(1, E), p["ln1_b"].reshape(1, E),
      p["w1"].astype(bf), p["b1"].reshape(1, F),
      p["w2"].astype(bf), p["b2"].reshape(1, E),
      p["ln2_g"].reshape(1, E), p["ln2_b"].reshape(1, E))


# ----------------------------- Model (glue) -----------------------------

def vision_transformer_forward(x, params, *, patch_size, num_heads):
    B, C, Himg, Wimg = x.shape
    P = patch_size
    Hg, Wg = Himg // P, Wimg // P
    num_patches = Hg * Wg
    E = params["pos"].shape[-1]

    # Conv2d(kernel=stride=P) == per-patch matmul with weight flattened (c,ph,pw).
    patches = x.reshape(B, C, Hg, P, Wg, P).transpose(0, 2, 4, 1, 3, 5)
    patches = patches.reshape(B, num_patches, C * P * P)

    x_seq = patch_embed(patches, params["w_patch"], params["b_patch"],
                        params["pos"].reshape(num_patches, E))
    # Encoder input is (L=B, N=num_patches, E); attention runs over L.
    for lp in params["layers"]:
        x_seq = encoder_layer_block(x_seq, lp, num_heads)
    return x_seq


# ----------------------------- Reference (pure JAX) -----------------------------

def _ref_ln(x, g, b, eps=1e-5):
    mu = x.mean(-1, keepdims=True)
    var = ((x - mu) ** 2).mean(-1, keepdims=True)
    return (x - mu) / jnp.sqrt(var + eps) * g + b


def _ref_mha(x, p, num_heads):
    L, N, E = x.shape
    Dh = E // num_heads
    qkv = x.reshape(L * N, E) @ p["w_in"] + p["b_in"]
    q, k, v = jnp.split(qkv.reshape(L, N, 3 * E), 3, axis=-1)

    def heads(t):
        return t.reshape(L, N * num_heads, Dh).transpose(1, 0, 2)

    qh, kh, vh = heads(q), heads(k), heads(v)
    s = jnp.einsum("bld,bmd->blm", qh, kh) / math.sqrt(Dh)
    pr = jax.nn.softmax(s, axis=-1)
    o = jnp.einsum("blm,bmd->bld", pr, vh)
    o = o.transpose(1, 0, 2).reshape(L * N, E) @ p["w_out"] + p["b_out"]
    return o.reshape(L, N, E)


def ref_forward(x, params, *, patch_size, num_heads):
    B, C, Himg, Wimg = x.shape
    P = patch_size
    Hg, Wg = Himg // P, Wimg // P
    E = params["pos"].shape[-1]
    patches = x.reshape(B, C, Hg, P, Wg, P).transpose(0, 2, 4, 1, 3, 5)
    patches = patches.reshape(B * Hg * Wg, C * P * P)
    tok = patches @ params["w_patch"] + params["b_patch"]
    xx = tok.reshape(B, Hg * Wg, E) + params["pos"]
    for lp in params["layers"]:
        a = _ref_mha(xx, lp, num_heads)
        x1 = _ref_ln(xx + a, lp["ln1_g"], lp["ln1_b"])
        ff = jnp.maximum(x1.reshape(-1, E) @ lp["w1"] + lp["b1"], 0.0) @ lp["w2"] + lp["b2"]
        xx = _ref_ln(x1 + ff.reshape(x1.shape), lp["ln2_g"], lp["ln2_b"])
    return xx


# ----------------------------- Parameter init -----------------------------

def init_params(key, *, num_channels, patch_size, num_patches, embed_dim,
                num_layers, d_ff):
    E = embed_dim
    ks = list(jax.random.split(key, 3 + num_layers))
    params = {
        "w_patch": 0.05 * jax.random.normal(
            ks[0], (num_channels * patch_size * patch_size, E), jnp.float32),
        "b_patch": 0.05 * jax.random.normal(ks[1], (E,), jnp.float32),
        "pos": jax.random.normal(ks[2], (1, num_patches, E), jnp.float32),
        "layers": [],
    }
    for li in range(num_layers):
        lk = list(jax.random.split(ks[3 + li], 12))
        params["layers"].append({
            "w_in": 0.05 * jax.random.normal(lk[0], (E, 3 * E), jnp.float32),
            "b_in": 0.05 * jax.random.normal(lk[1], (3 * E,), jnp.float32),
            "w_out": 0.05 * jax.random.normal(lk[2], (E, E), jnp.float32),
            "b_out": 0.05 * jax.random.normal(lk[3], (E,), jnp.float32),
            "ln1_g": 1.0 + 0.01 * jax.random.normal(lk[4], (E,), jnp.float32),
            "ln1_b": 0.01 * jax.random.normal(lk[5], (E,), jnp.float32),
            "w1": 0.05 * jax.random.normal(lk[6], (E, d_ff), jnp.float32),
            "b1": 0.05 * jax.random.normal(lk[7], (d_ff,), jnp.float32),
            "w2": 0.05 * jax.random.normal(lk[8], (d_ff, E), jnp.float32),
            "b2": 0.05 * jax.random.normal(lk[9], (E,), jnp.float32),
            "ln2_g": 1.0 + 0.01 * jax.random.normal(lk[10], (E,), jnp.float32),
            "ln2_b": 0.01 * jax.random.normal(lk[11], (E,), jnp.float32),
        })
    return params


# ----------------------------- Main -----------------------------

if __name__ == "__main__":
    # Small shapes consistent with the module (defaults scaled down).
    batch = 2
    image_size = 16
    patch_size = 8
    num_channels = 3
    embed_dim = 32
    num_layers = 2
    num_heads = 4
    d_ff = 64          # scaled-down dim_feedforward (torch default is 2048)
    num_patches = (image_size // patch_size) ** 2

    key = jax.random.PRNGKey(0)
    k_x, k_p = jax.random.split(key)
    x = jax.random.normal(k_x, (batch, num_channels, image_size, image_size),
                          jnp.float32)
    params = init_params(k_p, num_channels=num_channels, patch_size=patch_size,
                         num_patches=num_patches, embed_dim=embed_dim,
                         num_layers=num_layers, d_ff=d_ff)

    fwd = jax.jit(functools.partial(vision_transformer_forward,
                                    patch_size=patch_size, num_heads=num_heads))
    out = jax.block_until_ready(fwd(x, params))

    assert out.shape == (batch, num_patches, embed_dim), out.shape
    assert bool(jnp.isfinite(out).all())

    # f32 pure-JAX reference; tolerance accounts for bf16 MXU matmuls.
    ref = ref_forward(x, params, patch_size=patch_size, num_heads=num_heads)
    max_err = float(jnp.max(jnp.abs(out - ref)))
    assert max_err < 3e-2, f"mismatch vs reference: {max_err}"

    print("KERNEL_OK")
</pallas_src>

<mosaic_0001>
module attributes {stable_mosaic.version = 11 : i64} {
  func.func @_patch_embed_kernel(%arg0: i32, %arg1: i32, %arg2: memref<1x4x192xf32, #tpu.memory_space<vmem>>, %arg3: memref<192x32xbf16, #tpu.memory_space<vmem>>, %arg4: memref<1x32xf32, #tpu.memory_space<vmem>>, %arg5: memref<4x32xf32, #tpu.memory_space<vmem>>, %arg6: memref<1x4x32xf32, #tpu.memory_space<vmem>>) attributes {dimension_semantics = [#tpu.dimension_semantics<parallel>, #tpu.dimension_semantics<parallel>], iteration_bounds = array<i64: 2, 1>, scalar_prefetch = 0 : i64, scratch_operands = 0 : i64, tpu.core_type = #tpu.core_type<tc>, window_params = [{transform_indices = @transform_0, window_bounds = array<i64: 1, 4, 192>}, {pipeline_mode = #tpu.pipeline_mode<synchronous>, transform_indices = @transform_1, window_bounds = array<i64: 192, 32>}, {pipeline_mode = #tpu.pipeline_mode<synchronous>, transform_indices = @transform_2, window_bounds = array<i64: 1, 32>}, {transform_indices = @transform_3, window_bounds = array<i64: 4, 32>}, {transform_indices = @transform_4, window_bounds = array<i64: 1, 4, 32>}]} {
    %c0 = arith.constant 0 : index
    %c0_0 = arith.constant 0 : index
    %c0_1 = arith.constant 0 : index
    %0 = vector.load %arg2[%c0, %c0_0, %c0_1] : memref<1x4x192xf32, #tpu.memory_space<vmem>>, vector<1x4x192xf32>
    %1 = vector.shape_cast %0 : vector<1x4x192xf32> to vector<4x192xf32>
    %2 = arith.truncf %1 : vector<4x192xf32> to vector<4x192xbf16>
    %c0_2 = arith.constant 0 : index
    %c0_3 = arith.constant 0 : index
    %3 = vector.load %arg3[%c0_2, %c0_3] : memref<192x32xbf16, #tpu.memory_space<vmem>>, vector<192x32xbf16>
    %cst = arith.constant dense<0.000000e+00> : vector<4x32xf32>
    %4 = tpu.matmul %2, %3, %cst {dimension_numbers = #tpu.dot_dimension_numbers<[1], [0], [0], [1], [0, 0, 1, 1], [], []>} : vector<4x192xbf16>, vector<192x32xbf16>, vector<4x32xf32> -> vector<4x32xf32>
    %c0_4 = arith.constant 0 : index
    %c0_5 = arith.constant 0 : index
    %5 = vector.load %arg4[%c0_4, %c0_5] : memref<1x32xf32, #tpu.memory_space<vmem>>, vector<1x32xf32>
    %6 = vector.broadcast %5 : vector<1x32xf32> to vector<4x32xf32>
    %7 = arith.addf %4, %6 : vector<4x32xf32>
    %c0_6 = arith.constant 0 : index
    %c0_7 = arith.constant 0 : index
    %8 = vector.load %arg5[%c0_6, %c0_7] : memref<4x32xf32, #tpu.memory_space<vmem>>, vector<4x32xf32>
    %9 = arith.addf %7, %8 : vector<4x32xf32>
    %c0_8 = arith.constant 0 : index
    %c0_9 = arith.constant 0 : index
    %c0_10 = arith.constant 0 : index
    %10 = vector.load %arg6[%c0_8, %c0_9, %c0_10] : memref<1x4x32xf32, #tpu.memory_space<vmem>>, vector<1x4x32xf32>
    %11 = vector.shape_cast %10 : vector<1x4x32xf32> to vector<4x32xf32>
    %12 = vector.shape_cast %9 : vector<4x32xf32> to vector<1x4x32xf32>
    tpu.vector_store %arg6[%c0_8, %c0_9, %c0_10], %12 {strides = array<i32>} : memref<1x4x32xf32, #tpu.memory_space<vmem>>, vector<1x4x32xf32>,
    return
  }
  func.func @transform_0(%arg0: i32, %arg1: i32) -> (i32, i32, i32) {
    %c0_i32 = arith.constant 0 : i32
    %c0_i32_0 = arith.constant 0 : i32
    return %arg0, %arg1, %c0_i32 : i32, i32, i32
  }
  func.func @transform_1(%arg0: i32, %arg1: i32) -> (i32, i32) {
    %c0_i32 = arith.constant 0 : i32
    %c0_i32_0 = arith.constant 0 : i32
    %c0_i32_1 = arith.constant 0 : i32
    return %c0_i32, %c0_i32_0 : i32, i32
  }
  func.func @transform_2(%arg0: i32, %arg1: i32) -> (i32, i32) {
    %c0_i32 = arith.constant 0 : i32
    %c0_i32_0 = arith.constant 0 : i32
    %c0_i32_1 = arith.constant 0 : i32
    return %c0_i32, %c0_i32_0 : i32, i32
  }
  func.func @transform_3(%arg0: i32, %arg1: i32) -> (i32, i32) {
    %c0_i32 = arith.constant 0 : i32
    %c0_i32_0 = arith.constant 0 : i32
    return %arg1, %c0_i32 : i32, i32
  }
  func.func @transform_4(%arg0: i32, %arg1: i32) -> (i32, i32, i32) {
    %c0_i32 = arith.constant 0 : i32
    %c0_i32_0 = arith.constant 0 : i32
    return %arg0, %arg1, %c0_i32 : i32, i32, i32
  }
}

module attributes {stable_mosaic.version = 11 : i64} {
  func.func @_encoder_layer_kernel(%arg0: i32, %arg1: memref<2x4x32xf32, #tpu.memory_space<vmem>>, %arg2: memref<32x96xbf16, #tpu.memory_space<vmem>>, %arg3: memref<1x96xf32, #tpu.memory_space<vmem>>, %arg4: memref<32x32xbf16, #tpu.memory_space<vmem>>, %arg5: memref<1x32xf32, #tpu.memory_space<vmem>>, %arg6: memref<32x4xbf16, #tpu.memory_space<vmem>>, %arg7: memref<4x32xbf16, #tpu.memory_space<vmem>>, %arg8: memref<1x32xf32, #tpu.memory_space<vmem>>, %arg9: memref<1x32xf32, #tpu.memory_space<vmem>>, %arg10: memref<32x64xbf16, #tpu.memory_space<vmem>>, %arg11: memref<1x64xf32, #tpu.memory_space<vmem>>, %arg12: memref<64x32xbf16, #tpu.memory_space<vmem>>, %arg13: memref<1x32xf32, #tpu.memory_space<vmem>>, %arg14: memref<1x32xf32, #tpu.memory_space<vmem>>, %arg15: memref<1x32xf32, #tpu.memory_space<vmem>>, %arg16: memref<2x4x32xf32, #tpu.memory_space<vmem>>, %arg17: memref<2x4x32xf32, #tpu.memory_space<vmem>>, %arg18: memref<2x4x32xf32, #tpu.memory_space<vmem>>, %arg19: memref<2x4x32xf32, #tpu.memory_space<vmem>>) attributes {dimension_semantics = [#tpu.dimension_semantics<parallel>], iteration_bounds = array<i64: 1>, scalar_prefetch = 0 : i64, scratch_operands = 3 : i64, tpu.core_type = #tpu.core_type<tc>, window_params = [{transform_indices = @transform_0, window_bounds = array<i64: 2, 4, 32>}, {pipeline_mode = #tpu.pipeline_mode<synchronous>, transform_indices = @transform_1, window_bounds = array<i64: 32, 96>}, {pipeline_mode = #tpu.pipeline_mode<synchronous>, transform_indices = @transform_2, window_bounds = array<i64: 1, 96>}, {pipeline_mode = #tpu.pipeline_mode<synchronous>, transform_indices = @transform_3, window_bounds = array<i64: 32, 32>}, {pipeline_mode = #tpu.pipeline_mode<synchronous>, transform_indices = @transform_4, window_bounds = array<i64: 1, 32>}, {pipeline_mode = #tpu.pipeline_mode<synchronous>, transform_indices = @transform_5, window_bounds = array<i64: 32, 4>}, {pipeline_mode = #tpu.pipeline_mode<synchronous>, transform_indices = @transform_6, window_bounds = array<i64: 4, 32>}, {pipeline_mode = #tpu.pipeline_mode<synchronous>, transform_indices = @transform_7, window_bounds = array<i64: 1, 32>}, {pipeline_mode = #tpu.pipeline_mode<synchronous>, transform_indices = @transform_8, window_bounds = array<i64: 1, 32>}, {pipeline_mode = #tpu.pipeline_mode<synchronous>, transform_indices = @transform_9, window_bounds = array<i64: 32, 64>}, {pipeline_mode = #tpu.pipeline_mode<synchronous>, transform_indices = @transform_10, window_bounds = array<i64: 1, 64>}, {pipeline_mode = #tpu.pipeline_mode<synchronous>, transform_indices = @transform_11, window_bounds = array<i64: 64, 32>}, {pipeline_mode = #tpu.pipeline_mode<synchronous>, transform_indices = @transform_12, window_bounds = array<i64: 1, 32>}, {pipeline_mode = #tpu.pipeline_mode<synchronous>, transform_indices = @transform_13, window_bounds = array<i64: 1, 32>}, {pipeline_mode = #tpu.pipeline_mode<synchronous>, transform_indices = @transform_14, window_bounds = array<i64: 1, 32>}, {transform_indices = @transform_15, window_bounds = array<i64: 2, 4, 32>}]} {
    %c0 = arith.constant 0 : index
    %c0_0 = arith.constant 0 : index
    %0 = vector.load %arg2[%c0, %c0_0] : memref<32x96xbf16, #tpu.memory_space<vmem>>, vector<32x96xbf16>
    %c0_1 = arith.constant 0 : index
    %c0_2 = arith.constant 0 : index
    %1 = vector.load %arg3[%c0_1, %c0_2] : memref<1x96xf32, #tpu.memory_space<vmem>>, vector<1x96xf32>
    %c0_3 = arith.constant 0 : index
    %c0_4 = arith.constant 0 : index
    %2 = vector.load %arg4[%c0_3, %c0_4] : memref<32x32xbf16, #tpu.memory_space<vmem>>, vector<32x32xbf16>
    %c0_5 = arith.constant 0 : index
    %c0_6 = arith.constant 0 : index
    %3 = vector.load %arg5[%c0_5, %c0_6] : memref<1x32xf32, #tpu.memory_space<vmem>>, vector<1x32xf32>
    %c0_7 = arith.constant 0 : index
    %c0_8 = arith.constant 0 : index
    %4 = vector.load %arg6[%c0_7, %c0_8] : memref<32x4xbf16, #tpu.memory_space<vmem>>, vector<32x4xbf16>
    %c0_9 = arith.constant 0 : index
    %c0_10 = arith.constant 0 : index
    %5 = vector.load %arg7[%c0_9, %c0_10] : memref<4x32xbf16, #tpu.memory_space<vmem>>, vector<4x32xbf16>
    %c0_11 = arith.constant 0 : index
    %c0_12 = arith.constant 0 : index
    %6 = vector.load %arg8[%c0_11, %c0_12] : memref<1x32xf32, #tpu.memory_space<vmem>>, vector<1x32xf32>
    %c0_13 = arith.constant 0 : index
    %c0_14 = arith.constant 0 : index
    %7 = vector.load %arg9[%c0_13, %c0_14] : memref<1x32xf32, #tpu.memory_space<vmem>>, vector<1x32xf32>
    %c0_15 = arith.constant 0 : index
    %c0_16 = arith.constant 0 : index
    %8 = vector.load %arg10[%c0_15, %c0_16] : memref<32x64xbf16, #tpu.memory_space<vmem>>, vector<32x64xbf16>
    %c0_17 = arith.constant 0 : index
    %c0_18 = arith.constant 0 : index
    %9 = vector.load %arg11[%c0_17, %c0_18] : memref<1x64xf32, #tpu.memory_space<vmem>>, vector<1x64xf32>
    %c0_19 = arith.constant 0 : index
    %c0_20 = arith.constant 0 : index
    %10 = vector.load %arg12[%c0_19, %c0_20] : memref<64x32xbf16, #tpu.memory_space<vmem>>, vector<64x32xbf16>
    %c0_21 = arith.constant 0 : index
    %c0_22 = arith.constant 0 : index
    %11 = vector.load %arg13[%c0_21, %c0_22] : memref<1x32xf32, #tpu.memory_space<vmem>>, vector<1x32xf32>
    %c0_23 = arith.constant 0 : index
    %c0_24 = arith.constant 0 : index
    %12 = vector.load %arg14[%c0_23, %c0_24] : memref<1x32xf32, #tpu.memory_space<vmem>>, vector<1x32xf32>
    %c0_25 = arith.constant 0 : index
    %c0_26 = arith.constant 0 : index
    %13 = vector.load %arg15[%c0_25, %c0_26] : memref<1x32xf32, #tpu.memory_space<vmem>>, vector<1x32xf32>
    %c0_i32 = arith.constant 0 : i32
    %14 = arith.index_cast %c0_i32 : i32 to index
    %c0_27 = arith.constant 0 : index
    %c0_28 = arith.constant 0 : index
    %15 = vector.load %arg1[%14, %c0_27, %c0_28] : memref<2x4x32xf32, #tpu.memory_space<vmem>>, vector<1x4x32xf32>
    %16 = vector.shape_cast %15 : vector<1x4x32xf32> to vector<4x32xf32>
    %17 = arith.truncf %16 : vector<4x32xf32> to vector<4x32xbf16>
    %cst = arith.constant dense<0.000000e+00> : vector<4x96xf32>
    %18 = tpu.matmul %17, %0, %cst {dimension_numbers = #tpu.dot_dimension_numbers<[1], [0], [0], [1], [0, 0, 1, 1], [], []>} : vector<4x32xbf16>, vector<32x96xbf16>, vector<4x96xf32> -> vector<4x96xf32>
    %19 = vector.broadcast %1 : vector<1x96xf32> to vector<4x96xf32>
    %20 = arith.addf %18, %19 : vector<4x96xf32>
    %21 = vector.extract_strided_slice %20 {offsets = [0, 0], sizes = [4, 32], strides = [1, 1]} : vector<4x96xf32> to vector<4x32xf32>
    %cst_29 = arith.constant 0.353553385 : f32
    %22 = vector.broadcast %cst_29 : f32 to vector<4x32xf32>
    %23 = arith.mulf %21, %22 : vector<4x32xf32>
    %24 = arith.index_cast %c0_i32 : i32 to index
    %c0_30 = arith.constant 0 : index
    %c0_31 = arith.constant 0 : index
    %25 = vector.load %arg17[%24, %c0_30, %c0_31] : memref<2x4x32xf32, #tpu.memory_space<vmem>>, vector<1x4x32xf32>
    %26 = vector.shape_cast %25 : vector<1x4x32xf32> to vector<4x32xf32>
    %27 = vector.shape_cast %23 : vector<4x32xf32> to vector<1x4x32xf32>
    tpu.vector_store %arg17[%24, %c0_30, %c0_31], %27 {strides = array<i32>} : memref<2x4x32xf32, #tpu.memory_space<vmem>>, vector<1x4x32xf32>,
    %28 = vector.extract_strided_slice %20 {offsets = [0, 32], sizes = [4, 32], strides = [1, 1]} : vector<4x96xf32> to vector<4x32xf32>
    %29 = arith.index_cast %c0_i32 : i32 to index
    %c0_32 = arith.constant 0 : index
    %c0_33 = arith.constant 0 : index
    %30 = vector.load %arg18[%29, %c0_32, %c0_33] : memref<2x4x32xf32, #tpu.memory_space<vmem>>, vector<1x4x32xf32>
    %31 = vector.shape_cast %30 : vector<1x4x32xf32> to vector<4x32xf32>
    %32 = vector.shape_cast %28 : vector<4x32xf32> to vector<1x4x32xf32>
    tpu.vector_store %arg18[%29, %c0_32, %c0_33], %32 {strides = array<i32>} : memref<2x4x32xf32, #tpu.memory_space<vmem>>, vector<1x4x32xf32>,
    %33 = vector.extract_strided_slice %20 {offsets = [0, 64], sizes = [4, 32], strides = [1, 1]} : vector<4x96xf32> to vector<4x32xf32>
    %34 = arith.index_cast %c0_i32 : i32 to index
    %c0_34 = arith.constant 0 : index
    %c0_35 = arith.constant 0 : index
    %35 = vector.load %arg19[%34, %c0_34, %c0_35] : memref<2x4x32xf32, #tpu.memory_space<vmem>>, vector<1x4x32xf32>
    %36 = vector.shape_cast %35 : vector<1x4x32xf32> to vector<4x32xf32>
    %37 = vector.shape_cast %33 : vector<4x32xf32> to vector<1x4x32xf32>
    tpu.vector_store %arg19[%34, %c0_34, %c0_35], %37 {strides = array<i32>} : memref<2x4x32xf32, #tpu.memory_space<vmem>>, vector<1x4x32xf32>,
    %c1_i32 = arith.constant 1 : i32
    %38 = arith.index_cast %c1_i32 : i32 to index
    %c0_36 = arith.constant 0 : index
    %c0_37 = arith.constant 0 : index
    %39 = vector.load %arg1[%38, %c0_36, %c0_37] : memref<2x4x32xf32, #tpu.memory_space<vmem>>, vector<1x4x32xf32>
    %40 = vector.shape_cast %39 : vector<1x4x32xf32> to vector<4x32xf32>
    %41 = arith.truncf %40 : vector<4x32xf32> to vector<4x32xbf16>
    %cst_38 = arith.constant dense<0.000000e+00> : vector<4x96xf32>
    %42 = tpu.matmul %41, %0, %cst_38 {dimension_numbers = #tpu.dot_dimension_numbers<[1], [0], [0], [1], [0, 0, 1, 1], [], []>} : vector<4x32xbf16>, vector<32x96xbf16>, vector<4x96xf32> -> vector<4x96xf32>
    %43 = vector.broadcast %1 : vector<1x96xf32> to vector<4x96xf32>
    %44 = arith.addf %42, %43 : vector<4x96xf32>
    %45 = vector.extract_strided_slice %44 {offsets = [0, 0], sizes = [4, 32], strides = [1, 1]} : vector<4x96xf32> to vector<4x32xf32>
    %cst_39 = arith.constant 0.353553385 : f32
    %46 = vector.broadcast %cst_39 : f32 to vector<4x32xf32>
    %47 = arith.mulf %45, %46 : vector<4x32xf32>
    %48 = arith.index_cast %c1_i32 : i32 to index
    %c0_40 = arith.constant 0 : index
    %c0_41 = arith.constant 0 : index
    %49 = vector.load %arg17[%48, %c0_40, %c0_41] : memref<2x4x32xf32, #tpu.memory_space<vmem>>, vector<1x4x32xf32>
    %50 = vector.shape_cast %49 : vector<1x4x32xf32> to vector<4x32xf32>
    %51 = vector.shape_cast %47 : vector<4x32xf32> to vector<1x4x32xf32>
    tpu.vector_store %arg17[%48, %c0_40, %c0_41], %51 {strides = array<i32>} : memref<2x4x32xf32, #tpu.memory_space<vmem>>, vector<1x4x32xf32>,
    %52 = vector.extract_strided_slice %44 {offsets = [0, 32], sizes = [4, 32], strides = [1, 1]} : vector<4x96xf32> to vector<4x32xf32>
    %53 = arith.index_cast %c1_i32 : i32 to index
    %c0_42 = arith.constant 0 : index
    %c0_43 = arith.constant 0 : index
    %54 = vector.load %arg18[%53, %c0_42, %c0_43] : memref<2x4x32xf32, #tpu.memory_space<vmem>>, vector<1x4x32xf32>
    %55 = vector.shape_cast %54 : vector<1x4x32xf32> to vector<4x32xf32>
    %56 = vector.shape_cast %52 : vector<4x32xf32> to vector<1x4x32xf32>
    tpu.vector_store %arg18[%53, %c0_42, %c0_43], %56 {strides = array<i32>} : memref<2x4x32xf32, #tpu.memory_space<vmem>>, vector<1x4x32xf32>,
    %57 = vector.extract_strided_slice %44 {offsets = [0, 64], sizes = [4, 32], strides = [1, 1]} : vector<4x96xf32> to vector<4x32xf32>
    %58 = arith.index_cast %c1_i32 : i32 to index
    %c0_44 = arith.constant 0 : index
    %c0_45 = arith.constant 0 : index
    %59 = vector.load %arg19[%58, %c0_44, %c0_45] : memref<2x4x32xf32, #tpu.memory_space<vmem>>, vector<1x4x32xf32>
    %60 = vector.shape_cast %59 : vector<1x4x32xf32> to vector<4x32xf32>
    %61 = vector.shape_cast %57 : vector<4x32xf32> to vector<1x4x32xf32>
    tpu.vector_store %arg19[%58, %c0_44, %c0_45], %61 {strides = array<i32>} : memref<2x4x32xf32, #tpu.memory_space<vmem>>, vector<1x4x32xf32>,
    %c2_i32 = arith.constant 2 : i32
    %c0_i32_46 = arith.constant 0 : i32
    %62 = arith.index_cast %c0_i32_46 : i32 to index
    %c0_47 = arith.constant 0 : index
    %c0_48 = arith.constant 0 : index
    %63 = vector.load %arg17[%62, %c0_47, %c0_48] : memref<2x4x32xf32, #tpu.memory_space<vmem>>, vector<1x4x32xf32>
    %64 = vector.shape_cast %63 : vector<1x4x32xf32> to vector<4x32xf32>
    %cst_49 = arith.constant 0xFF800000 : f32
    %65 = vector.broadcast %cst_49 : f32 to vector<4x4xf32>
    %cst_50 = arith.constant 0.000000e+00 : f32
    %66 = vector.broadcast %cst_50 : f32 to vector<4x4xf32>
    %cst_51 = arith.constant 0.000000e+00 : f32
    %67 = vector.broadcast %cst_51 : f32 to vector<4x32xf32>
    %c0_i32_52 = arith.constant 0 : i32
    %68 = arith.index_cast %c0_i32_52 : i32 to index
    %c0_53 = arith.constant 0 : index
    %c0_54 = arith.constant 0 : index
    %69 = vector.load %arg18[%68, %c0_53, %c0_54] : memref<2x4x32xf32, #tpu.memory_space<vmem>>, vector<1x4x32xf32>
    %70 = vector.shape_cast %69 : vector<1x4x32xf32> to vector<4x32xf32>
    %71 = arith.index_cast %c0_i32_52 : i32 to index
    %c0_55 = arith.constant 0 : index
    %c0_56 = arith.constant 0 : index
    %72 = vector.load %arg19[%71, %c0_55, %c0_56] : memref<2x4x32xf32, #tpu.memory_space<vmem>>, vector<1x4x32xf32>
    %73 = vector.shape_cast %72 : vector<1x4x32xf32> to vector<4x32xf32>
    %74 = arith.mulf %64, %70 : vector<4x32xf32>
    %75 = arith.truncf %74 : vector<4x32xf32> to vector<4x32xbf16>
    %cst_57 = arith.constant dense<0.000000e+00> : vector<4x4xf32>
    %76 = tpu.matmul %75, %4, %cst_57 {dimension_numbers = #tpu.dot_dimension_numbers<[1], [0], [0], [1], [0, 0, 1, 1], [], []>} : vector<4x32xbf16>, vector<32x4xbf16>, vector<4x4xf32> -> vector<4x4xf32>
    %77 = arith.maximumf %65, %76 : vector<4x4xf32>
    %78 = arith.subf %65, %77 : vector<4x4xf32>
    %79 = math.exp %78 : vector<4x4xf32>
    %80 = arith.subf %76, %77 : vector<4x4xf32>
    %81 = math.exp %80 : vector<4x4xf32>
    %82 = arith.mulf %79, %66 : vector<4x4xf32>
    %83 = arith.addf %82, %81 : vector<4x4xf32>
    %84 = arith.truncf %79 : vector<4x4xf32> to vector<4x4xbf16>
    %cst_58 = arith.constant dense<0.000000e+00> : vector<4x32xf32>
    %85 = tpu.matmul %84, %5, %cst_58 {dimension_numbers = #tpu.dot_dimension_numbers<[1], [0], [0], [1], [0, 0, 1, 1], [], []>} : vector<4x4xbf16>, vector<4x32xbf16>, vector<4x32xf32> -> vector<4x32xf32>
    %86 = arith.truncf %81 : vector<4x4xf32> to vector<4x4xbf16>
    %cst_59 = arith.constant dense<0.000000e+00> : vector<4x32xf32>
    %87 = tpu.matmul %86, %5, %cst_59 {dimension_numbers = #tpu.dot_dimension_numbers<[1], [0], [0], [1], [0, 0, 1, 1], [], []>} : vector<4x4xbf16>, vector<4x32xbf16>, vector<4x32xf32> -> vector<4x32xf32>
    %88 = arith.mulf %85, %67 : vector<4x32xf32>
    %89 = arith.mulf %87, %73 : vector<4x32xf32>
    %90 = arith.addf %88, %89 : vector<4x32xf32>
    %c1_i32_60 = arith.constant 1 : i32
    %91 = arith.index_cast %c1_i32_60 : i32 to index
    %c0_61 = arith.constant 0 : index
    %c0_62 = arith.constant 0 : index
    %92 = vector.load %arg18[%91, %c0_61, %c0_62] : memref<2x4x32xf32, #tpu.memory_space<vmem>>, vector<1x4x32xf32>
    %93 = vector.shape_cast %92 : vector<1x4x32xf32> to vector<4x32xf32>
    %94 = arith.index_cast %c1_i32_60 : i32 to index
    %c0_63 = arith.constant 0 : index
    %c0_64 = arith.constant 0 : index
    %95 = vector.load %arg19[%94, %c0_63, %c0_64] : memref<2x4x32xf32, #tpu.memory_space<vmem>>, vector<1x4x32xf32>
    %96 = vector.shape_cast %95 : vector<1x4x32xf32> to vector<4x32xf32>
    %97 = arith.mulf %64, %93 : vector<4x32xf32>
    %98 = arith.truncf %97 : vector<4x32xf32> to vector<4x32xbf16>
    %cst_65 = arith.constant dense<0.000000e+00> : vector<4x4xf32>
    %99 = tpu.matmul %98, %4, %cst_65 {dimension_numbers = #tpu.dot_dimension_numbers<[1], [0], [0], [1], [0, 0, 1, 1], [], []>} : vector<4x32xbf16>, vector<32x4xbf16>, vector<4x4xf32> -> vector<4x4xf32>
    %100 = arith.maximumf %77, %99 : vector<4x4xf32>
    %101 = arith.subf %77, %100 : vector<4x4xf32>
    %102 = math.exp %101 : vector<4x4xf32>
    %103 = arith.subf %99, %100 : vector<4x4xf32>
    %104 = math.exp %103 : vector<4x4xf32>
    %105 = arith.mulf %102, %83 : vector<4x4xf32>
    %106 = arith.addf %105, %104 : vector<4x4xf32>
    %107 = arith.truncf %102 : vector<4x4xf32> to vector<4x4xbf16>
    %cst_66 = arith.constant dense<0.000000e+00> : vector<4x32xf32>
    %108 = tpu.matmul %107, %5, %cst_66 {dimension_numbers = #tpu.dot_dimension_numbers<[1], [0], [0], [1], [0, 0, 1, 1], [], []>} : vector<4x4xbf16>, vector<4x32xbf16>, vector<4x32xf32> -> vector<4x32xf32>
    %109 = arith.truncf %104 : vector<4x4xf32> to vector<4x4xbf16>
    %cst_67 = arith.constant dense<0.000000e+00> : vector<4x32xf32>
    %110 = tpu.matmul %109, %5, %cst_67 {dimension_numbers = #tpu.dot_dimension_numbers<[1], [0], [0], [1], [0, 0, 1, 1], [], []>} : vector<4x4xbf16>, vector<4x32xbf16>, vector<4x32xf32> -> vector<4x32xf32>
    %111 = arith.mulf %108, %90 : vector<4x32xf32>
    %112 = arith.mulf %110, %96 : vector<4x32xf32>
    %113 = arith.addf %111, %112 : vector<4x32xf32>
    %c2_i32_68 = arith.constant 2 : i32
    %114 = tpu.reciprocal %106 {approx = true} : vector<4x4xf32> -> vector<4x4xf32>
    %115 = arith.truncf %114 : vector<4x4xf32> to vector<4x4xbf16>
    %cst_69 = arith.constant dense<0.000000e+00> : vector<4x32xf32>
    %116 = tpu.matmul %115, %5, %cst_69 {dimension_numbers = #tpu.dot_dimension_numbers<[1], [0], [0], [1], [0, 0, 1, 1], [], []>} : vector<4x4xbf16>, vector<4x32xbf16>, vector<4x32xf32> -> vector<4x32xf32>
    %117 = arith.mulf %113, %116 : vector<4x32xf32>
    %118 = arith.truncf %117 : vector<4x32xf32> to vector<4x32xbf16>
    %cst_70 = arith.constant dense<0.000000e+00> : vector<4x32xf32>
    %119 = tpu.matmul %118, %2, %cst_70 {dimension_numbers = #tpu.dot_dimension_numbers<[1], [0], [0], [1], [0, 0, 1, 1], [], []>} : vector<4x32xbf16>, vector<32x32xbf16>, vector<4x32xf32> -> vector<4x32xf32>
    %120 = vector.broadcast %3 : vector<1x32xf32> to vector<4x32xf32>
    %121 = arith.addf %119, %120 : vector<4x32xf32>
    %122 = arith.index_cast %c0_i32_46 : i32 to index
    %c0_71 = arith.constant 0 : index
    %c0_72 = arith.constant 0 : index
    %123 = vector.load %arg1[%122, %c0_71, %c0_72] : memref<2x4x32xf32, #tpu.memory_space<vmem>>, vector<1x4x32xf32>
    %124 = vector.shape_cast %123 : vector<1x4x32xf32> to vector<4x32xf32>
    %125 = arith.addf %121, %124 : vector<4x32xf32>
    %cst_73 = arith.constant dense<0.000000e+00> : vector<4xf32>
    %126 = vector.multi_reduction <add>, %125, %cst_73 [1] : vector<4x32xf32> to vector<4xf32>
    %127 = vector.shape_cast %126 : vector<4xf32> to vector<4x1xf32>
    %cst_74 = arith.constant 3.200000e+01 : f32
    %128 = vector.broadcast %cst_74 : f32 to vector<4x1xf32>
    %129 = arith.divf %127, %128 : vector<4x1xf32>
    %130 = vector.broadcast %129 : vector<4x1xf32> to vector<4x32xf32>
    %131 = arith.subf %125, %130 : vector<4x32xf32>
    %132 = arith.mulf %131, %131 : vector<4x32xf32>
    %cst_75 = arith.constant dense<0.000000e+00> : vector<4xf32>
    %133 = vector.multi_reduction <add>, %132, %cst_75 [1] : vector<4x32xf32> to vector<4xf32>
    %134 = vector.shape_cast %133 : vector<4xf32> to vector<4x1xf32>
    %cst_76 = arith.constant 3.200000e+01 : f32
    %135 = vector.broadcast %cst_76 : f32 to vector<4x1xf32>
    %136 = arith.divf %134, %135 : vector<4x1xf32>
    %137 = vector.broadcast %129 : vector<4x1xf32> to vector<4x32xf32>
    %138 = arith.subf %125, %137 : vector<4x32xf32>
    %cst_77 = arith.constant 9.99999974E-6 : f32
    %139 = vector.broadcast %cst_77 : f32 to vector<4x1xf32>
    %140 = arith.addf %136, %139 : vector<4x1xf32>
    %141 = math.rsqrt %140 : vector<4x1xf32>
    %142 = vector.broadcast %141 : vector<4x1xf32> to vector<4x32xf32>
    %143 = arith.mulf %138, %142 : vector<4x32xf32>
    %144 = vector.broadcast %6 : vector<1x32xf32> to vector<4x32xf32>
    %145 = arith.mulf %143, %144 : vector<4x32xf32>
    %146 = vector.broadcast %7 : vector<1x32xf32> to vector<4x32xf32>
    %147 = arith.addf %145, %146 : vector<4x32xf32>
    %148 = arith.truncf %147 : vector<4x32xf32> to vector<4x32xbf16>
    %cst_78 = arith.constant dense<0.000000e+00> : vector<4x64xf32>
    %149 = tpu.matmul %148, %8, %cst_78 {dimension_numbers = #tpu.dot_dimension_numbers<[1], [0], [0], [1], [0, 0, 1, 1], [], []>} : vector<4x32xbf16>, vector<32x64xbf16>, vector<4x64xf32> -> vector<4x64xf32>
    %150 = vector.broadcast %9 : vector<1x64xf32> to vector<4x64xf32>
    %151 = arith.addf %149, %150 : vector<4x64xf32>
    %cst_79 = arith.constant 0.000000e+00 : f32
    %152 = vector.broadcast %cst_79 : f32 to vector<4x64xf32>
    %153 = arith.maximumf %151, %152 : vector<4x64xf32>
    %154 = arith.truncf %153 : vector<4x64xf32> to vector<4x64xbf16>
    %cst_80 = arith.constant dense<0.000000e+00> : vector<4x32xf32>
    %155 = tpu.matmul %154, %10, %cst_80 {dimension_numbers = #tpu.dot_dimension_numbers<[1], [0], [0], [1], [0, 0, 1, 1], [], []>} : vector<4x64xbf16>, vector<64x32xbf16>, vector<4x32xf32> -> vector<4x32xf32>
    %156 = vector.broadcast %11 : vector<1x32xf32> to vector<4x32xf32>
    %157 = arith.addf %155, %156 : vector<4x32xf32>
    %158 = arith.addf %157, %147 : vector<4x32xf32>
    %cst_81 = arith.constant dense<0.000000e+00> : vector<4xf32>
    %159 = vector.multi_reduction <add>, %158, %cst_81 [1] : vector<4x32xf32> to vector<4xf32>
    %160 = vector.shape_cast %159 : vector<4xf32> to vector<4x1xf32>
    %cst_82 = arith.constant 3.200000e+01 : f32
    %161 = vector.broadcast %cst_82 : f32 to vector<4x1xf32>
    %162 = arith.divf %160, %161 : vector<4x1xf32>
    %163 = vector.broadcast %162 : vector<4x1xf32> to vector<4x32xf32>
    %164 = arith.subf %158, %163 : vector<4x32xf32>
    %165 = arith.mulf %164, %164 : vector<4x32xf32>
    %cst_83 = arith.constant dense<0.000000e+00> : vector<4xf32>
    %166 = vector.multi_reduction <add>, %165, %cst_83 [1] : vector<4x32xf32> to vector<4xf32>
    %167 = vector.shape_cast %166 : vector<4xf32> to vector<4x1xf32>
    %cst_84 = arith.constant 3.200000e+01 : f32
    %168 = vector.broadcast %cst_84 : f32 to vector<4x1xf32>
    %169 = arith.divf %167, %168 : vector<4x1xf32>
    %170 = vector.broadcast %162 : vector<4x1xf32> to vector<4x32xf32>
    %171 = arith.subf %158, %170 : vector<4x32xf32>
    %cst_85 = arith.constant 9.99999974E-6 : f32
    %172 = vector.broadcast %cst_85 : f32 to vector<4x1xf32>
    %173 = arith.addf %169, %172 : vector<4x1xf32>
    %174 = math.rsqrt %173 : vector<4x1xf32>
    %175 = vector.broadcast %174 : vector<4x1xf32> to vector<4x32xf32>
    %176 = arith.mulf %171, %175 : vector<4x32xf32>
    %177 = vector.broadcast %12 : vector<1x32xf32> to vector<4x32xf32>
    %178 = arith.mulf %176, %177 : vector<4x32xf32>
    %179 = vector.broadcast %13 : vector<1x32xf32> to vector<4x32xf32>
    %180 = arith.addf %178, %179 : vector<4x32xf32>
    %181 = arith.index_cast %c0_i32_46 : i32 to index
    %c0_86 = arith.constant 0 : index
    %c0_87 = arith.constant 0 : index
    %182 = vector.load %arg16[%181, %c0_86, %c0_87] : memref<2x4x32xf32, #tpu.memory_space<vmem>>, vector<1x4x32xf32>
    %183 = vector.shape_cast %182 : vector<1x4x32xf32> to vector<4x32xf32>
    %184 = vector.shape_cast %180 : vector<4x32xf32> to vector<1x4x32xf32>
    tpu.vector_store %arg16[%181, %c0_86, %c0_87], %184 {strides = array<i32>} : memref<2x4x32xf32, #tpu.memory_space<vmem>>, vector<1x4x32xf32>,
    %c1_i32_88 = arith.constant 1 : i32
    %185 = arith.index_cast %c1_i32_88 : i32 to index
    %c0_89 = arith.constant 0 : index
    %c0_90 = arith.constant 0 : index
    %186 = vector.load %arg17[%185, %c0_89, %c0_90] : memref<2x4x32xf32, #tpu.memory_space<vmem>>, vector<1x4x32xf32>
    %187 = vector.shape_cast %186 : vector<1x4x32xf32> to vector<4x32xf32>
    %cst_91 = arith.constant 0xFF800000 : f32
    %188 = vector.broadcast %cst_91 : f32 to vector<4x4xf32>
    %cst_92 = arith.constant 0.000000e+00 : f32
    %189 = vector.broadcast %cst_92 : f32 to vector<4x4xf32>
    %cst_93 = arith.constant 0.000000e+00 : f32
    %190 = vector.broadcast %cst_93 : f32 to vector<4x32xf32>
    %c0_i32_94 = arith.constant 0 : i32
    %191 = arith.index_cast %c0_i32_94 : i32 to index
    %c0_95 = arith.constant 0 : index
    %c0_96 = arith.constant 0 : index
    %192 = vector.load %arg18[%191, %c0_95, %c0_96] : memref<2x4x32xf32, #tpu.memory_space<vmem>>, vector<1x4x32xf32>
    %193 = vector.shape_cast %192 : vector<1x4x32xf32> to vector<4x32xf32>
    %194 = arith.index_cast %c0_i32_94 : i32 to index
    %c0_97 = arith.constant 0 : index
    %c0_98 = arith.constant 0 : index
    %195 = vector.load %arg19[%194, %c0_97, %c0_98] : memref<2x4x32xf32, #tpu.memory_space<vmem>>, vector<1x4x32xf32>
    %196 = vector.shape_cast %195 : vector<1x4x32xf32> to vector<4x32xf32>
    %197 = arith.mulf %187, %193 : vector<4x32xf32>
    %198 = arith.truncf %197 : vector<4x32xf32> to vector<4x32xbf16>
    %cst_99 = arith.constant dense<0.000000e+00> : vector<4x4xf32>
    %199 = tpu.matmul %198, %4, %cst_99 {dimension_numbers = #tpu.dot_dimension_numbers<[1], [0], [0], [1], [0, 0, 1, 1], [], []>} : vector<4x32xbf16>, vector<32x4xbf16>, vector<4x4xf32> -> vector<4x4xf32>
    %200 = arith.maximumf %188, %199 : vector<4x4xf32>
    %201 = arith.subf %188, %200 : vector<4x4xf32>
    %202 = math.exp %201 : vector<4x4xf32>
    %203 = arith.subf %199, %200 : vector<4x4xf32>
    %204 = math.exp %203 : vector<4x4xf32>
    %205 = arith.mulf %202, %189 : vector<4x4xf32>
    %206 = arith.addf %205, %204 : vector<4x4xf32>
    %207 = arith.truncf %202 : vector<4x4xf32> to vector<4x4xbf16>
    %cst_100 = arith.constant dense<0.000000e+00> : vector<4x32xf32>
    %208 = tpu.matmul %207, %5, %cst_100 {dimension_numbers = #tpu.dot_dimension_numbers<[1], [0], [0], [1], [0, 0, 1, 1], [], []>} : vector<4x4xbf16>, vector<4x32xbf16>, vector<4x32xf32> -> vector<4x32xf32>
    %209 = arith.truncf %204 : vector<4x4xf32> to vector<4x4xbf16>
    %cst_101 = arith.constant dense<0.000000e+00> : vector<4x32xf32>
    %210 = tpu.matmul %209, %5, %cst_101 {dimension_numbers = #tpu.dot_dimension_numbers<[1], [0], [0], [1], [0, 0, 1, 1], [], []>} : vector<4x4xbf16>, vector<4x32xbf16>, vector<4x32xf32> -> vector<4x32xf32>
    %211 = arith.mulf %208, %190 : vector<4x32xf32>
    %212 = arith.mulf %210, %196 : vector<4x32xf32>
    %213 = arith.addf %211, %212 : vector<4x32xf32>
    %c1_i32_102 = arith.constant 1 : i32
    %214 = arith.index_cast %c1_i32_102 : i32 to index
    %c0_103 = arith.constant 0 : index
    %c0_104 = arith.constant 0 : index
    %215 = vector.load %arg18[%214, %c0_103, %c0_104] : memref<2x4x32xf32, #tpu.memory_space<vmem>>, vector<1x4x32xf32>
    %216 = vector.shape_cast %215 : vector<1x4x32xf32> to vector<4x32xf32>
    %217 = arith.index_cast %c1_i32_102 : i32 to index
    %c0_105 = arith.constant 0 : index
    %c0_106 = arith.constant 0 : index
    %218 = vector.load %arg19[%217, %c0_105, %c0_106] : memref<2x4x32xf32, #tpu.memory_space<vmem>>, vector<1x4x32xf32>
    %219 = vector.shape_cast %218 : vector<1x4x32xf32> to vector<4x32xf32>
    %220 = arith.mulf %187, %216 : vector<4x32xf32>
    %221 = arith.truncf %220 : vector<4x32xf32> to vector<4x32xbf16>
    %cst_107 = arith.constant dense<0.000000e+00> : vector<4x4xf32>
    %222 = tpu.matmul %221, %4, %cst_107 {dimension_numbers = #tpu.dot_dimension_numbers<[1], [0], [0], [1], [0, 0, 1, 1], [], []>} : vector<4x32xbf16>, vector<32x4xbf16>, vector<4x4xf32> -> vector<4x4xf32>
    %223 = arith.maximumf %200, %222 : vector<4x4xf32>
    %224 = arith.subf %200, %223 : vector<4x4xf32>
    %225 = math.exp %224 : vector<4x4xf32>
    %226 = arith.subf %222, %223 : vector<4x4xf32>
    %227 = math.exp %226 : vector<4x4xf32>
    %228 = arith.mulf %225, %206 : vector<4x4xf32>
    %229 = arith.addf %228, %227 : vector<4x4xf32>
    %230 = arith.truncf %225 : vector<4x4xf32> to vector<4x4xbf16>
    %cst_108 = arith.constant dense<0.000000e+00> : vector<4x32xf32>
    %231 = tpu.matmul %230, %5, %cst_108 {dimension_numbers = #tpu.dot_dimension_numbers<[1], [0], [0], [1], [0, 0, 1, 1], [], []>} : vector<4x4xbf16>, vector<4x32xbf16>, vector<4x32xf32> -> vector<4x32xf32>
    %232 = arith.truncf %227 : vector<4x4xf32> to vector<4x4xbf16>
    %cst_109 = arith.constant dense<0.000000e+00> : vector<4x32xf32>
    %233 = tpu.matmul %232, %5, %cst_109 {dimension_numbers = #tpu.dot_dimension_numbers<[1], [0], [0], [1], [0, 0, 1, 1], [], []>} : vector<4x4xbf16>, vector<4x32xbf16>, vector<4x32xf32> -> vector<4x32xf32>
    %234 = arith.mulf %231, %213 : vector<4x32xf32>
    %235 = arith.mulf %233, %219 : vector<4x32xf32>
    %236 = arith.addf %234, %235 : vector<4x32xf32>
    %c2_i32_110 = arith.constant 2 : i32
    %237 = tpu.reciprocal %229 {approx = true} : vector<4x4xf32> -> vector<4x4xf32>
    %238 = arith.truncf %237 : vector<4x4xf32> to vector<4x4xbf16>
    %cst_111 = arith.constant dense<0.000000e+00> : vector<4x32xf32>
    %239 = tpu.matmul %238, %5, %cst_111 {dimension_numbers = #tpu.dot_dimension_numbers<[1], [0], [0], [1], [0, 0, 1, 1], [], []>} : vector<4x4xbf16>, vector<4x32xbf16>, vector<4x32xf32> -> vector<4x32xf32>
    %240 = arith.mulf %236, %239 : vector<4x32xf32>
    %241 = arith.truncf %240 : vector<4x32xf32> to vector<4x32xbf16>
    %cst_112 = arith.constant dense<0.000000e+00> : vector<4x32xf32>
    %242 = tpu.matmul %241, %2, %cst_112 {dimension_numbers = #tpu.dot_dimension_numbers<[1], [0], [0], [1], [0, 0, 1, 1], [], []>} : vector<4x32xbf16>, vector<32x32xbf16>, vector<4x32xf32> -> vector<4x32xf32>
    %243 = vector.broadcast %3 : vector<1x32xf32> to vector<4x32xf32>
    %244 = arith.addf %242, %243 : vector<4x32xf32>
    %245 = arith.index_cast %c1_i32_88 : i32 to index
    %c0_113 = arith.constant 0 : index
    %c0_114 = arith.constant 0 : index
    %246 = vector.load %arg1[%245, %c0_113, %c0_114] : memref<2x4x32xf32, #tpu.memory_space<vmem>>, vector<1x4x32xf32>
    %247 = vector.shape_cast %246 : vector<1x4x32xf32> to vector<4x32xf32>
    %248 = arith.addf %244, %247 : vector<4x32xf32>
    %cst_115 = arith.constant dense<0.000000e+00> : vector<4xf32>
    %249 = vector.multi_reduction <add>, %248, %cst_115 [1] : vector<4x32xf32> to vector<4xf32>
    %250 = vector.shape_cast %249 : vector<4xf32> to vector<4x1xf32>
    %cst_116 = arith.constant 3.200000e+01 : f32
    %251 = vector.broadcast %cst_116 : f32 to vector<4x1xf32>
    %252 = arith.divf %250, %251 : vector<4x1xf32>
    %253 = vector.broadcast %252 : vector<4x1xf32> to vector<4x32xf32>
    %254 = arith.subf %248, %253 : vector<4x32xf32>
    %255 = arith.mulf %254, %254 : vector<4x32xf32>
    %cst_117 = arith.constant dense<0.000000e+00> : vector<4xf32>
    %256 = vector.multi_reduction <add>, %255, %cst_117 [1] : vector<4x32xf32> to vector<4xf32>
    %257 = vector.shape_cast %256 : vector<4xf32> to vector<4x1xf32>
    %cst_118 = arith.constant 3.200000e+01 : f32
    %258 = vector.broadcast %cst_118 : f32 to vector<4x1xf32>
    %259 = arith.divf %257, %258 : vector<4x1xf32>
    %260 = vector.broadcast %252 : vector<4x1xf32> to vector<4x32xf32>
    %261 = arith.subf %248, %260 : vector<4x32xf32>
    %cst_119 = arith.constant 9.99999974E-6 : f32
    %262 = vector.broadcast %cst_119 : f32 to vector<4x1xf32>
    %263 = arith.addf %259, %262 : vector<4x1xf32>
    %264 = math.rsqrt %263 : vector<4x1xf32>
    %265 = vector.broadcast %264 : vector<4x1xf32> to vector<4x32xf32>
    %266 = arith.mulf %261, %265 : vector<4x32xf32>
    %267 = vector.broadcast %6 : vector<1x32xf32> to vector<4x32xf32>
    %268 = arith.mulf %266, %267 : vector<4x32xf32>
    %269 = vector.broadcast %7 : vector<1x32xf32> to vector<4x32xf32>
    %270 = arith.addf %268, %269 : vector<4x32xf32>
    %271 = arith.truncf %270 : vector<4x32xf32> to vector<4x32xbf16>
    %cst_120 = arith.constant dense<0.000000e+00> : vector<4x64xf32>
    %272 = tpu.matmul %271, %8, %cst_120 {dimension_numbers = #tpu.dot_dimension_numbers<[1], [0], [0], [1], [0, 0, 1, 1], [], []>} : vector<4x32xbf16>, vector<32x64xbf16>, vector<4x64xf32> -> vector<4x64xf32>
    %273 = vector.broadcast %9 : vector<1x64xf32> to vector<4x64xf32>
    %274 = arith.addf %272, %273 : vector<4x64xf32>
    %cst_121 = arith.constant 0.000000e+00 : f32
    %275 = vector.broadcast %cst_121 : f32 to vector<4x64xf32>
    %276 = arith.maximumf %274, %275 : vector<4x64xf32>
    %277 = arith.truncf %276 : vector<4x64xf32> to vector<4x64xbf16>
    %cst_122 = arith.constant dense<0.000000e+00> : vector<4x32xf32>
    %278 = tpu.matmul %277, %10, %cst_122 {dimension_numbers = #tpu.dot_dimension_numbers<[1], [0], [0], [1], [0, 0, 1, 1], [], []>} : vector<4x64xbf16>, vector<64x32xbf16>, vector<4x32xf32> -> vector<4x32xf32>
    %279 = vector.broadcast %11 : vector<1x32xf32> to vector<4x32xf32>
    %280 = arith.addf %278, %279 : vector<4x32xf32>
    %281 = arith.addf %280, %270 : vector<4x32xf32>
    %cst_123 = arith.constant dense<0.000000e+00> : vector<4xf32>
    %282 = vector.multi_reduction <add>, %281, %cst_123 [1] : vector<4x32xf32> to vector<4xf32>
    %283 = vector.shape_cast %282 : vector<4xf32> to vector<4x1xf32>
    %cst_124 = arith.constant 3.200000e+01 : f32
    %284 = vector.broadcast %cst_124 : f32 to vector<4x1xf32>
    %285 = arith.divf %283, %284 : vector<4x1xf32>
    %286 = vector.broadcast %285 : vector<4x1xf32> to vector<4x32xf32>
    %287 = arith.subf %281, %286 : vector<4x32xf32>
    %288 = arith.mulf %287, %287 : vector<4x32xf32>
    %cst_125 = arith.constant dense<0.000000e+00> : vector<4xf32>
    %289 = vector.multi_reduction <add>, %288, %cst_125 [1] : vector<4x32xf32> to vector<4xf32>
    %290 = vector.shape_cast %289 : vector<4xf32> to vector<4x1xf32>
    %cst_126 = arith.constant 3.200000e+01 : f32
    %291 = vector.broadcast %cst_126 : f32 to vector<4x1xf32>
    %292 = arith.divf %290, %291 : vector<4x1xf32>
    %293 = vector.broadcast %285 : vector<4x1xf32> to vector<4x32xf32>
    %294 = arith.subf %281, %293 : vector<4x32xf32>
    %cst_127 = arith.constant 9.99999974E-6 : f32
    %295 = vector.broadcast %cst_127 : f32 to vector<4x1xf32>
    %296 = arith.addf %292, %295 : vector<4x1xf32>
    %297 = math.rsqrt %296 : vector<4x1xf32>
    %298 = vector.broadcast %297 : vector<4x1xf32> to vector<4x32xf32>
    %299 = arith.mulf %294, %298 : vector<4x32xf32>
    %300 = vector.broadcast %12 : vector<1x32xf32> to vector<4x32xf32>
    %301 = arith.mulf %299, %300 : vector<4x32xf32>
    %302 = vector.broadcast %13 : vector<1x32xf32> to vector<4x32xf32>
    %303 = arith.addf %301, %302 : vector<4x32xf32>
    %304 = arith.index_cast %c1_i32_88 : i32 to index
    %c0_128 = arith.constant 0 : index
    %c0_129 = arith.constant 0 : index
    %305 = vector.load %arg16[%304, %c0_128, %c0_129] : memref<2x4x32xf32, #tpu.memory_space<vmem>>, vector<1x4x32xf32>
    %306 = vector.shape_cast %305 : vector<1x4x32xf32> to vector<4x32xf32>
    %307 = vector.shape_cast %303 : vector<4x32xf32> to vector<1x4x32xf32>
    tpu.vector_store %arg16[%304, %c0_128, %c0_129], %307 {strides = array<i32>} : memref<2x4x32xf32, #tpu.memory_space<vmem>>, vector<1x4x32xf32>,
    %c2_i32_130 = arith.constant 2 : i32
    return
  }
  func.func @transform_0(%arg0: i32) -> (i32, i32, i32) {
    %c0_i32 = arith.constant 0 : i32
    %c0_i32_0 = arith.constant 0 : i32
    %c0_i32_1 = arith.constant 0 : i32
    return %c0_i32, %arg0, %c0_i32_0 : i32, i32, i32
  }
  func.func @transform_1(%arg0: i32) -> (i32, i32) {
    %c0_i32 = arith.constant 0 : i32
    %c0_i32_0 = arith.constant 0 : i32
    %c0_i32_1 = arith.constant 0 : i32
    return %c0_i32, %c0_i32_0 : i32, i32
  }
  func.func @transform_2(%arg0: i32) -> (i32, i32) {
    %c0_i32 = arith.constant 0 : i32
    %c0_i32_0 = arith.constant 0 : i32
    %c0_i32_1 = arith.constant 0 : i32
    return %c0_i32, %c0_i32_0 : i32, i32
  }
  func.func @transform_3(%arg0: i32) -> (i32, i32) {
    %c0_i32 = arith.constant 0 : i32
    %c0_i32_0 = arith.constant 0 : i32
    %c0_i32_1 = arith.constant 0 : i32
    return %c0_i32, %c0_i32_0 : i32, i32
  }
  func.func @transform_4(%arg0: i32) -> (i32, i32) {
    %c0_i32 = arith.constant 0 : i32
    %c0_i32_0 = arith.constant 0 : i32
    %c0_i32_1 = arith.constant 0 : i32
    return %c0_i32, %c0_i32_0 : i32, i32
  }
  func.func @transform_5(%arg0: i32) -> (i32, i32) {
    %c0_i32 = arith.constant 0 : i32
    %c0_i32_0 = arith.constant 0 : i32
    %c0_i32_1 = arith.constant 0 : i32
    return %c0_i32, %c0_i32_0 : i32, i32
  }
  func.func @transform_6(%arg0: i32) -> (i32, i32) {
    %c0_i32 = arith.constant 0 : i32
    %c0_i32_0 = arith.constant 0 : i32
    %c0_i32_1 = arith.constant 0 : i32
    return %c0_i32, %c0_i32_0 : i32, i32
  }
  func.func @transform_7(%arg0: i32) -> (i32, i32) {
    %c0_i32 = arith.constant 0 : i32
    %c0_i32_0 = arith.constant 0 : i32
    %c0_i32_1 = arith.constant 0 : i32
    return %c0_i32, %c0_i32_0 : i32, i32
  }
  func.func @transform_8(%arg0: i32) -> (i32, i32) {
    %c0_i32 = arith.constant 0 : i32
    %c0_i32_0 = arith.constant 0 : i32
    %c0_i32_1 = arith.constant 0 : i32
    return %c0_i32, %c0_i32_0 : i32, i32
  }
  func.func @transform_9(%arg0: i32) -> (i32, i32) {
    %c0_i32 = arith.constant 0 : i32
    %c0_i32_0 = arith.constant 0 : i32
    %c0_i32_1 = arith.constant 0 : i32
    return %c0_i32, %c0_i32_0 : i32, i32
  }
  func.func @transform_10(%arg0: i32) -> (i32, i32) {
    %c0_i32 = arith.constant 0 : i32
    %c0_i32_0 = arith.constant 0 : i32
    %c0_i32_1 = arith.constant 0 : i32
    return %c0_i32, %c0_i32_0 : i32, i32
  }
  func.func @transform_11(%arg0: i32) -> (i32, i32) {
    %c0_i32 = arith.constant 0 : i32
    %c0_i32_0 = arith.constant 0 : i32
    %c0_i32_1 = arith.constant 0 : i32
    return %c0_i32, %c0_i32_0 : i32, i32
  }
  func.func @transform_12(%arg0: i32) -> (i32, i32) {
    %c0_i32 = arith.constant 0 : i32
    %c0_i32_0 = arith.constant 0 : i32
    %c0_i32_1 = arith.constant 0 : i32
    return %c0_i32, %c0_i32_0 : i32, i32
  }
  func.func @transform_13(%arg0: i32) -> (i32, i32) {
    %c0_i32 = arith.constant 0 : i32
    %c0_i32_0 = arith.constant 0 : i32
    %c0_i32_1 = arith.constant 0 : i32
    return %c0_i32, %c0_i32_0 : i32, i32
  }
  func.func @transform_14(%arg0: i32) -> (i32, i32) {
    %c0_i32 = arith.constant 0 : i32
    %c0_i32_0 = arith.constant 0 : i32
    %c0_i32_1 = arith.constant 0 : i32
    return %c0_i32, %c0_i32_0 : i32, i32
  }
  func.func @transform_15(%arg0: i32) -> (i32, i32, i32) {
    %c0_i32 = arith.constant 0 : i32
    %c0_i32_0 = arith.constant 0 : i32
    %c0_i32_1 = arith.constant 0 : i32
    return %c0_i32, %arg0, %c0_i32_0 : i32, i32, i32
  }
}

module attributes {stable_mosaic.version = 11 : i64} {
  func.func @_encoder_layer_kernel(%arg0: i32, %arg1: memref<2x4x32xf32, #tpu.memory_space<vmem>>, %arg2: memref<32x96xbf16, #tpu.memory_space<vmem>>, %arg3: memref<1x96xf32, #tpu.memory_space<vmem>>, %arg4: memref<32x32xbf16, #tpu.memory_space<vmem>>, %arg5: memref<1x32xf32, #tpu.memory_space<vmem>>, %arg6: memref<32x4xbf16, #tpu.memory_space<vmem>>, %arg7: memref<4x32xbf16, #tpu.memory_space<vmem>>, %arg8: memref<1x32xf32, #tpu.memory_space<vmem>>, %arg9: memref<1x32xf32, #tpu.memory_space<vmem>>, %arg10: memref<32x64xbf16, #tpu.memory_space<vmem>>, %arg11: memref<1x64xf32, #tpu.memory_space<vmem>>, %arg12: memref<64x32xbf16, #tpu.memory_space<vmem>>, %arg13: memref<1x32xf32, #tpu.memory_space<vmem>>, %arg14: memref<1x32xf32, #tpu.memory_space<vmem>>, %arg15: memref<1x32xf32, #tpu.memory_space<vmem>>, %arg16: memref<2x4x32xf32, #tpu.memory_space<vmem>>, %arg17: memref<2x4x32xf32, #tpu.memory_space<vmem>>, %arg18: memref<2x4x32xf32, #tpu.memory_space<vmem>>, %arg19: memref<2x4x32xf32, #tpu.memory_space<vmem>>) attributes {dimension_semantics = [#tpu.dimension_semantics<parallel>], iteration_bounds = array<i64: 1>, scalar_prefetch = 0 : i64, scratch_operands = 3 : i64, tpu.core_type = #tpu.core_type<tc>, window_params = [{transform_indices = @transform_0, window_bounds = array<i64: 2, 4, 32>}, {pipeline_mode = #tpu.pipeline_mode<synchronous>, transform_indices = @transform_1, window_bounds = array<i64: 32, 96>}, {pipeline_mode = #tpu.pipeline_mode<synchronous>, transform_indices = @transform_2, window_bounds = array<i64: 1, 96>}, {pipeline_mode = #tpu.pipeline_mode<synchronous>, transform_indices = @transform_3, window_bounds = array<i64: 32, 32>}, {pipeline_mode = #tpu.pipeline_mode<synchronous>, transform_indices = @transform_4, window_bounds = array<i64: 1, 32>}, {pipeline_mode = #tpu.pipeline_mode<synchronous>, transform_indices = @transform_5, window_bounds = array<i64: 32, 4>}, {pipeline_mode = #tpu.pipeline_mode<synchronous>, transform_indices = @transform_6, window_bounds = array<i64: 4, 32>}, {pipeline_mode = #tpu.pipeline_mode<synchronous>, transform_indices = @transform_7, window_bounds = array<i64: 1, 32>}, {pipeline_mode = #tpu.pipeline_mode<synchronous>, transform_indices = @transform_8, window_bounds = array<i64: 1, 32>}, {pipeline_mode = #tpu.pipeline_mode<synchronous>, transform_indices = @transform_9, window_bounds = array<i64: 32, 64>}, {pipeline_mode = #tpu.pipeline_mode<synchronous>, transform_indices = @transform_10, window_bounds = array<i64: 1, 64>}, {pipeline_mode = #tpu.pipeline_mode<synchronous>, transform_indices = @transform_11, window_bounds = array<i64: 64, 32>}, {pipeline_mode = #tpu.pipeline_mode<synchronous>, transform_indices = @transform_12, window_bounds = array<i64: 1, 32>}, {pipeline_mode = #tpu.pipeline_mode<synchronous>, transform_indices = @transform_13, window_bounds = array<i64: 1, 32>}, {pipeline_mode = #tpu.pipeline_mode<synchronous>, transform_indices = @transform_14, window_bounds = array<i64: 1, 32>}, {transform_indices = @transform_15, window_bounds = array<i64: 2, 4, 32>}]} {
    %c0 = arith.constant 0 : index
    %c0_0 = arith.constant 0 : index
    %0 = vector.load %arg2[%c0, %c0_0] : memref<32x96xbf16, #tpu.memory_space<vmem>>, vector<32x96xbf16>
    %c0_1 = arith.constant 0 : index
    %c0_2 = arith.constant 0 : index
    %1 = vector.load %arg3[%c0_1, %c0_2] : memref<1x96xf32, #tpu.memory_space<vmem>>, vector<1x96xf32>
    %c0_3 = arith.constant 0 : index
    %c0_4 = arith.constant 0 : index
    %2 = vector.load %arg4[%c0_3, %c0_4] : memref<32x32xbf16, #tpu.memory_space<vmem>>, vector<32x32xbf16>
    %c0_5 = arith.constant 0 : index
    %c0_6 = arith.constant 0 : index
    %3 = vector.load %arg5[%c0_5, %c0_6] : memref<1x32xf32, #tpu.memory_space<vmem>>, vector<1x32xf32>
    %c0_7 = arith.constant 0 : index
    %c0_8 = arith.constant 0 : index
    %4 = vector.load %arg6[%c0_7, %c0_8] : memref<32x4xbf16, #tpu.memory_space<vmem>>, vector<32x4xbf16>
    %c0_9 = arith.constant 0 : index
    %c0_10 = arith.constant 0 : index
    %5 = vector.load %arg7[%c0_9, %c0_10] : memref<4x32xbf16, #tpu.memory_space<vmem>>, vector<4x32xbf16>
    %c0_11 = arith.constant 0 : index
    %c0_12 = arith.constant 0 : index
    %6 = vector.load %arg8[%c0_11, %c0_12] : memref<1x32xf32, #tpu.memory_space<vmem>>, vector<1x32xf32>
    %c0_13 = arith.constant 0 : index
    %c0_14 = arith.constant 0 : index
    %7 = vector.load %arg9[%c0_13, %c0_14] : memref<1x32xf32, #tpu.memory_space<vmem>>, vector<1x32xf32>
    %c0_15 = arith.constant 0 : index
    %c0_16 = arith.constant 0 : index
    %8 = vector.load %arg10[%c0_15, %c0_16] : memref<32x64xbf16, #tpu.memory_space<vmem>>, vector<32x64xbf16>
    %c0_17 = arith.constant 0 : index
    %c0_18 = arith.constant 0 : index
    %9 = vector.load %arg11[%c0_17, %c0_18] : memref<1x64xf32, #tpu.memory_space<vmem>>, vector<1x64xf32>
    %c0_19 = arith.constant 0 : index
    %c0_20 = arith.constant 0 : index
    %10 = vector.load %arg12[%c0_19, %c0_20] : memref<64x32xbf16, #tpu.memory_space<vmem>>, vector<64x32xbf16>
    %c0_21 = arith.constant 0 : index
    %c0_22 = arith.constant 0 : index
    %11 = vector.load %arg13[%c0_21, %c0_22] : memref<1x32xf32, #tpu.memory_space<vmem>>, vector<1x32xf32>
    %c0_23 = arith.constant 0 : index
    %c0_24 = arith.constant 0 : index
    %12 = vector.load %arg14[%c0_23, %c0_24] : memref<1x32xf32, #tpu.memory_space<vmem>>, vector<1x32xf32>
    %c0_25 = arith.constant 0 : index
    %c0_26 = arith.constant 0 : index
    %13 = vector.load %arg15[%c0_25, %c0_26] : memref<1x32xf32, #tpu.memory_space<vmem>>, vector<1x32xf32>
    %c0_i32 = arith.constant 0 : i32
    %14 = arith.index_cast %c0_i32 : i32 to index
    %c0_27 = arith.constant 0 : index
    %c0_28 = arith.constant 0 : index
    %15 = vector.load %arg1[%14, %c0_27, %c0_28] : memref<2x4x32xf32, #tpu.memory_space<vmem>>, vector<1x4x32xf32>
    %16 = vector.shape_cast %15 : vector<1x4x32xf32> to vector<4x32xf32>
    %17 = arith.truncf %16 : vector<4x32xf32> to vector<4x32xbf16>
    %cst = arith.constant dense<0.000000e+00> : vector<4x96xf32>
    %18 = tpu.matmul %17, %0, %cst {dimension_numbers = #tpu.dot_dimension_numbers<[1], [0], [0], [1], [0, 0, 1, 1], [], []>} : vector<4x32xbf16>, vector<32x96xbf16>, vector<4x96xf32> -> vector<4x96xf32>
    %19 = vector.broadcast %1 : vector<1x96xf32> to vector<4x96xf32>
    %20 = arith.addf %18, %19 : vector<4x96xf32>
    %21 = vector.extract_strided_slice %20 {offsets = [0, 0], sizes = [4, 32], strides = [1, 1]} : vector<4x96xf32> to vector<4x32xf32>
    %cst_29 = arith.constant 0.353553385 : f32
    %22 = vector.broadcast %cst_29 : f32 to vector<4x32xf32>
    %23 = arith.mulf %21, %22 : vector<4x32xf32>
    %24 = arith.index_cast %c0_i32 : i32 to index
    %c0_30 = arith.constant 0 : index
    %c0_31 = arith.constant 0 : index
    %25 = vector.load %arg17[%24, %c0_30, %c0_31] : memref<2x4x32xf32, #tpu.memory_space<vmem>>, vector<1x4x32xf32>
    %26 = vector.shape_cast %25 : vector<1x4x32xf32> to vector<4x32xf32>
    %27 = vector.shape_cast %23 : vector<4x32xf32> to vector<1x4x32xf32>
    tpu.vector_store %arg17[%24, %c0_30, %c0_31], %27 {strides = array<i32>} : memref<2x4x32xf32, #tpu.memory_space<vmem>>, vector<1x4x32xf32>,
    %28 = vector.extract_strided_slice %20 {offsets = [0, 32], sizes = [4, 32], strides = [1, 1]} : vector<4x96xf32> to vector<4x32xf32>
    %29 = arith.index_cast %c0_i32 : i32 to index
    %c0_32 = arith.constant 0 : index
    %c0_33 = arith.constant 0 : index
    %30 = vector.load %arg18[%29, %c0_32, %c0_33] : memref<2x4x32xf32, #tpu.memory_space<vmem>>, vector<1x4x32xf32>
    %31 = vector.shape_cast %30 : vector<1x4x32xf32> to vector<4x32xf32>
    %32 = vector.shape_cast %28 : vector<4x32xf32> to vector<1x4x32xf32>
    tpu.vector_store %arg18[%29, %c0_32, %c0_33], %32 {strides = array<i32>} : memref<2x4x32xf32, #tpu.memory_space<vmem>>, vector<1x4x32xf32>,
    %33 = vector.extract_strided_slice %20 {offsets = [0, 64], sizes = [4, 32], strides = [1, 1]} : vector<4x96xf32> to vector<4x32xf32>
    %34 = arith.index_cast %c0_i32 : i32 to index
    %c0_34 = arith.constant 0 : index
    %c0_35 = arith.constant 0 : index
    %35 = vector.load %arg19[%34, %c0_34, %c0_35] : memref<2x4x32xf32, #tpu.memory_space<vmem>>, vector<1x4x32xf32>
    %36 = vector.shape_cast %35 : vector<1x4x32xf32> to vector<4x32xf32>
    %37 = vector.shape_cast %33 : vector<4x32xf32> to vector<1x4x32xf32>
    tpu.vector_store %arg19[%34, %c0_34, %c0_35], %37 {strides = array<i32>} : memref<2x4x32xf32, #tpu.memory_space<vmem>>, vector<1x4x32xf32>,
    %c1_i32 = arith.constant 1 : i32
    %38 = arith.index_cast %c1_i32 : i32 to index
    %c0_36 = arith.constant 0 : index
    %c0_37 = arith.constant 0 : index
    %39 = vector.load %arg1[%38, %c0_36, %c0_37] : memref<2x4x32xf32, #tpu.memory_space<vmem>>, vector<1x4x32xf32>
    %40 = vector.shape_cast %39 : vector<1x4x32xf32> to vector<4x32xf32>
    %41 = arith.truncf %40 : vector<4x32xf32> to vector<4x32xbf16>
    %cst_38 = arith.constant dense<0.000000e+00> : vector<4x96xf32>
    %42 = tpu.matmul %41, %0, %cst_38 {dimension_numbers = #tpu.dot_dimension_numbers<[1], [0], [0], [1], [0, 0, 1, 1], [], []>} : vector<4x32xbf16>, vector<32x96xbf16>, vector<4x96xf32> -> vector<4x96xf32>
    %43 = vector.broadcast %1 : vector<1x96xf32> to vector<4x96xf32>
    %44 = arith.addf %42, %43 : vector<4x96xf32>
    %45 = vector.extract_strided_slice %44 {offsets = [0, 0], sizes = [4, 32], strides = [1, 1]} : vector<4x96xf32> to vector<4x32xf32>
    %cst_39 = arith.constant 0.353553385 : f32
    %46 = vector.broadcast %cst_39 : f32 to vector<4x32xf32>
    %47 = arith.mulf %45, %46 : vector<4x32xf32>
    %48 = arith.index_cast %c1_i32 : i32 to index
    %c0_40 = arith.constant 0 : index
    %c0_41 = arith.constant 0 : index
    %49 = vector.load %arg17[%48, %c0_40, %c0_41] : memref<2x4x32xf32, #tpu.memory_space<vmem>>, vector<1x4x32xf32>
    %50 = vector.shape_cast %49 : vector<1x4x32xf32> to vector<4x32xf32>
    %51 = vector.shape_cast %47 : vector<4x32xf32> to vector<1x4x32xf32>
    tpu.vector_store %arg17[%48, %c0_40, %c0_41], %51 {strides = array<i32>} : memref<2x4x32xf32, #tpu.memory_space<vmem>>, vector<1x4x32xf32>,
    %52 = vector.extract_strided_slice %44 {offsets = [0, 32], sizes = [4, 32], strides = [1, 1]} : vector<4x96xf32> to vector<4x32xf32>
    %53 = arith.index_cast %c1_i32 : i32 to index
    %c0_42 = arith.constant 0 : index
    %c0_43 = arith.constant 0 : index
    %54 = vector.load %arg18[%53, %c0_42, %c0_43] : memref<2x4x32xf32, #tpu.memory_space<vmem>>, vector<1x4x32xf32>
    %55 = vector.shape_cast %54 : vector<1x4x32xf32> to vector<4x32xf32>
    %56 = vector.shape_cast %52 : vector<4x32xf32> to vector<1x4x32xf32>
    tpu.vector_store %arg18[%53, %c0_42, %c0_43], %56 {strides = array<i32>} : memref<2x4x32xf32, #tpu.memory_space<vmem>>, vector<1x4x32xf32>,
    %57 = vector.extract_strided_slice %44 {offsets = [0, 64], sizes = [4, 32], strides = [1, 1]} : vector<4x96xf32> to vector<4x32xf32>
    %58 = arith.index_cast %c1_i32 : i32 to index
    %c0_44 = arith.constant 0 : index
    %c0_45 = arith.constant 0 : index
    %59 = vector.load %arg19[%58, %c0_44, %c0_45] : memref<2x4x32xf32, #tpu.memory_space<vmem>>, vector<1x4x32xf32>
    %60 = vector.shape_cast %59 : vector<1x4x32xf32> to vector<4x32xf32>
    %61 = vector.shape_cast %57 : vector<4x32xf32> to vector<1x4x32xf32>
    tpu.vector_store %arg19[%58, %c0_44, %c0_45], %61 {strides = array<i32>} : memref<2x4x32xf32, #tpu.memory_space<vmem>>, vector<1x4x32xf32>,
    %c2_i32 = arith.constant 2 : i32
    %c0_i32_46 = arith.constant 0 : i32
    %62 = arith.index_cast %c0_i32_46 : i32 to index
    %c0_47 = arith.constant 0 : index
    %c0_48 = arith.constant 0 : index
    %63 = vector.load %arg17[%62, %c0_47, %c0_48] : memref<2x4x32xf32, #tpu.memory_space<vmem>>, vector<1x4x32xf32>
    %64 = vector.shape_cast %63 : vector<1x4x32xf32> to vector<4x32xf32>
    %cst_49 = arith.constant 0xFF800000 : f32
    %65 = vector.broadcast %cst_49 : f32 to vector<4x4xf32>
    %cst_50 = arith.constant 0.000000e+00 : f32
    %66 = vector.broadcast %cst_50 : f32 to vector<4x4xf32>
    %cst_51 = arith.constant 0.000000e+00 : f32
    %67 = vector.broadcast %cst_51 : f32 to vector<4x32xf32>
    %c0_i32_52 = arith.constant 0 : i32
    %68 = arith.index_cast %c0_i32_52 : i32 to index
    %c0_53 = arith.constant 0 : index
    %c0_54 = arith.constant 0 : index
    %69 = vector.load %arg18[%68, %c0_53, %c0_54] : memref<2x4x32xf32, #tpu.memory_space<vmem>>, vector<1x4x32xf32>
    %70 = vector.shape_cast %69 : vector<1x4x32xf32> to vector<4x32xf32>
    %71 = arith.index_cast %c0_i32_52 : i32 to index
    %c0_55 = arith.constant 0 : index
    %c0_56 = arith.constant 0 : index
    %72 = vector.load %arg19[%71, %c0_55, %c0_56] : memref<2x4x32xf32, #tpu.memory_space<vmem>>, vector<1x4x32xf32>
    %73 = vector.shape_cast %72 : vector<1x4x32xf32> to vector<4x32xf32>
    %74 = arith.mulf %64, %70 : vector<4x32xf32>
    %75 = arith.truncf %74 : vector<4x32xf32> to vector<4x32xbf16>
    %cst_57 = arith.constant dense<0.000000e+00> : vector<4x4xf32>
    %76 = tpu.matmul %75, %4, %cst_57 {dimension_numbers = #tpu.dot_dimension_numbers<[1], [0], [0], [1], [0, 0, 1, 1], [], []>} : vector<4x32xbf16>, vector<32x4xbf16>, vector<4x4xf32> -> vector<4x4xf32>
    %77 = arith.maximumf %65, %76 : vector<4x4xf32>
    %78 = arith.subf %65, %77 : vector<4x4xf32>
    %79 = math.exp %78 : vector<4x4xf32>
    %80 = arith.subf %76, %77 : vector<4x4xf32>
    %81 = math.exp %80 : vector<4x4xf32>
    %82 = arith.mulf %79, %66 : vector<4x4xf32>
    %83 = arith.addf %82, %81 : vector<4x4xf32>
    %84 = arith.truncf %79 : vector<4x4xf32> to vector<4x4xbf16>
    %cst_58 = arith.constant dense<0.000000e+00> : vector<4x32xf32>
    %85 = tpu.matmul %84, %5, %cst_58 {dimension_numbers = #tpu.dot_dimension_numbers<[1], [0], [0], [1], [0, 0, 1, 1], [], []>} : vector<4x4xbf16>, vector<4x32xbf16>, vector<4x32xf32> -> vector<4x32xf32>
    %86 = arith.truncf %81 : vector<4x4xf32> to vector<4x4xbf16>
    %cst_59 = arith.constant dense<0.000000e+00> : vector<4x32xf32>
    %87 = tpu.matmul %86, %5, %cst_59 {dimension_numbers = #tpu.dot_dimension_numbers<[1], [0], [0], [1], [0, 0, 1, 1], [], []>} : vector<4x4xbf16>, vector<4x32xbf16>, vector<4x32xf32> -> vector<4x32xf32>
    %88 = arith.mulf %85, %67 : vector<4x32xf32>
    %89 = arith.mulf %87, %73 : vector<4x32xf32>
    %90 = arith.addf %88, %89 : vector<4x32xf32>
    %c1_i32_60 = arith.constant 1 : i32
    %91 = arith.index_cast %c1_i32_60 : i32 to index
    %c0_61 = arith.constant 0 : index
    %c0_62 = arith.constant 0 : index
    %92 = vector.load %arg18[%91, %c0_61, %c0_62] : memref<2x4x32xf32, #tpu.memory_space<vmem>>, vector<1x4x32xf32>
    %93 = vector.shape_cast %92 : vector<1x4x32xf32> to vector<4x32xf32>
    %94 = arith.index_cast %c1_i32_60 : i32 to index
    %c0_63 = arith.constant 0 : index
    %c0_64 = arith.constant 0 : index
    %95 = vector.load %arg19[%94, %c0_63, %c0_64] : memref<2x4x32xf32, #tpu.memory_space<vmem>>, vector<1x4x32xf32>
    %96 = vector.shape_cast %95 : vector<1x4x32xf32> to vector<4x32xf32>
    %97 = arith.mulf %64, %93 : vector<4x32xf32>
    %98 = arith.truncf %97 : vector<4x32xf32> to vector<4x32xbf16>
    %cst_65 = arith.constant dense<0.000000e+00> : vector<4x4xf32>
    %99 = tpu.matmul %98, %4, %cst_65 {dimension_numbers = #tpu.dot_dimension_numbers<[1], [0], [0], [1], [0, 0, 1, 1], [], []>} : vector<4x32xbf16>, vector<32x4xbf16>, vector<4x4xf32> -> vector<4x4xf32>
    %100 = arith.maximumf %77, %99 : vector<4x4xf32>
    %101 = arith.subf %77, %100 : vector<4x4xf32>
    %102 = math.exp %101 : vector<4x4xf32>
    %103 = arith.subf %99, %100 : vector<4x4xf32>
    %104 = math.exp %103 : vector<4x4xf32>
    %105 = arith.mulf %102, %83 : vector<4x4xf32>
    %106 = arith.addf %105, %104 : vector<4x4xf32>
    %107 = arith.truncf %102 : vector<4x4xf32> to vector<4x4xbf16>
    %cst_66 = arith.constant dense<0.000000e+00> : vector<4x32xf32>
    %108 = tpu.matmul %107, %5, %cst_66 {dimension_numbers = #tpu.dot_dimension_numbers<[1], [0], [0], [1], [0, 0, 1, 1], [], []>} : vector<4x4xbf16>, vector<4x32xbf16>, vector<4x32xf32> -> vector<4x32xf32>
    %109 = arith.truncf %104 : vector<4x4xf32> to vector<4x4xbf16>
    %cst_67 = arith.constant dense<0.000000e+00> : vector<4x32xf32>
    %110 = tpu.matmul %109, %5, %cst_67 {dimension_numbers = #tpu.dot_dimension_numbers<[1], [0], [0], [1], [0, 0, 1, 1], [], []>} : vector<4x4xbf16>, vector<4x32xbf16>, vector<4x32xf32> -> vector<4x32xf32>
    %111 = arith.mulf %108, %90 : vector<4x32xf32>
    %112 = arith.mulf %110, %96 : vector<4x32xf32>
    %113 = arith.addf %111, %112 : vector<4x32xf32>
    %c2_i32_68 = arith.constant 2 : i32
    %114 = tpu.reciprocal %106 {approx = true} : vector<4x4xf32> -> vector<4x4xf32>
    %115 = arith.truncf %114 : vector<4x4xf32> to vector<4x4xbf16>
    %cst_69 = arith.constant dense<0.000000e+00> : vector<4x32xf32>
    %116 = tpu.matmul %115, %5, %cst_69 {dimension_numbers = #tpu.dot_dimension_numbers<[1], [0], [0], [1], [0, 0, 1, 1], [], []>} : vector<4x4xbf16>, vector<4x32xbf16>, vector<4x32xf32> -> vector<4x32xf32>
    %117 = arith.mulf %113, %116 : vector<4x32xf32>
    %118 = arith.truncf %117 : vector<4x32xf32> to vector<4x32xbf16>
    %cst_70 = arith.constant dense<0.000000e+00> : vector<4x32xf32>
    %119 = tpu.matmul %118, %2, %cst_70 {dimension_numbers = #tpu.dot_dimension_numbers<[1], [0], [0], [1], [0, 0, 1, 1], [], []>} : vector<4x32xbf16>, vector<32x32xbf16>, vector<4x32xf32> -> vector<4x32xf32>
    %120 = vector.broadcast %3 : vector<1x32xf32> to vector<4x32xf32>
    %121 = arith.addf %119, %120 : vector<4x32xf32>
    %122 = arith.index_cast %c0_i32_46 : i32 to index
    %c0_71 = arith.constant 0 : index
    %c0_72 = arith.constant 0 : index
    %123 = vector.load %arg1[%122, %c0_71, %c0_72] : memref<2x4x32xf32, #tpu.memory_space<vmem>>, vector<1x4x32xf32>
    %124 = vector.shape_cast %123 : vector<1x4x32xf32> to vector<4x32xf32>
    %125 = arith.addf %121, %124 : vector<4x32xf32>
    %cst_73 = arith.constant dense<0.000000e+00> : vector<4xf32>
    %126 = vector.multi_reduction <add>, %125, %cst_73 [1] : vector<4x32xf32> to vector<4xf32>
    %127 = vector.shape_cast %126 : vector<4xf32> to vector<4x1xf32>
    %cst_74 = arith.constant 3.200000e+01 : f32
    %128 = vector.broadcast %cst_74 : f32 to vector<4x1xf32>
    %129 = arith.divf %127, %128 : vector<4x1xf32>
    %130 = vector.broadcast %129 : vector<4x1xf32> to vector<4x32xf32>
    %131 = arith.subf %125, %130 : vector<4x32xf32>
    %132 = arith.mulf %131, %131 : vector<4x32xf32>
    %cst_75 = arith.constant dense<0.000000e+00> : vector<4xf32>
    %133 = vector.multi_reduction <add>, %132, %cst_75 [1] : vector<4x32xf32> to vector<4xf32>
    %134 = vector.shape_cast %133 : vector<4xf32> to vector<4x1xf32>
    %cst_76 = arith.constant 3.200000e+01 : f32
    %135 = vector.broadcast %cst_76 : f32 to vector<4x1xf32>
    %136 = arith.divf %134, %135 : vector<4x1xf32>
    %137 = vector.broadcast %129 : vector<4x1xf32> to vector<4x32xf32>
    %138 = arith.subf %125, %137 : vector<4x32xf32>
    %cst_77 = arith.constant 9.99999974E-6 : f32
    %139 = vector.broadcast %cst_77 : f32 to vector<4x1xf32>
    %140 = arith.addf %136, %139 : vector<4x1xf32>
    %141 = math.rsqrt %140 : vector<4x1xf32>
    %142 = vector.broadcast %141 : vector<4x1xf32> to vector<4x32xf32>
    %143 = arith.mulf %138, %142 : vector<4x32xf32>
    %144 = vector.broadcast %6 : vector<1x32xf32> to vector<4x32xf32>
    %145 = arith.mulf %143, %144 : vector<4x32xf32>
    %146 = vector.broadcast %7 : vector<1x32xf32> to vector<4x32xf32>
    %147 = arith.addf %145, %146 : vector<4x32xf32>
    %148 = arith.truncf %147 : vector<4x32xf32> to vector<4x32xbf16>
    %cst_78 = arith.constant dense<0.000000e+00> : vector<4x64xf32>
    %149 = tpu.matmul %148, %8, %cst_78 {dimension_numbers = #tpu.dot_dimension_numbers<[1], [0], [0], [1], [0, 0, 1, 1], [], []>} : vector<4x32xbf16>, vector<32x64xbf16>, vector<4x64xf32> -> vector<4x64xf32>
    %150 = vector.broadcast %9 : vector<1x64xf32> to vector<4x64xf32>
    %151 = arith.addf %149, %150 : vector<4x64xf32>
    %cst_79 = arith.constant 0.000000e+00 : f32
    %152 = vector.broadcast %cst_79 : f32 to vector<4x64xf32>
    %153 = arith.maximumf %151, %152 : vector<4x64xf32>
    %154 = arith.truncf %153 : vector<4x64xf32> to vector<4x64xbf16>
    %cst_80 = arith.constant dense<0.000000e+00> : vector<4x32xf32>
    %155 = tpu.matmul %154, %10, %cst_80 {dimension_numbers = #tpu.dot_dimension_numbers<[1], [0], [0], [1], [0, 0, 1, 1], [], []>} : vector<4x64xbf16>, vector<64x32xbf16>, vector<4x32xf32> -> vector<4x32xf32>
    %156 = vector.broadcast %11 : vector<1x32xf32> to vector<4x32xf32>
    %157 = arith.addf %155, %156 : vector<4x32xf32>
    %158 = arith.addf %157, %147 : vector<4x32xf32>
    %cst_81 = arith.constant dense<0.000000e+00> : vector<4xf32>
    %159 = vector.multi_reduction <add>, %158, %cst_81 [1] : vector<4x32xf32> to vector<4xf32>
    %160 = vector.shape_cast %159 : vector<4xf32> to vector<4x1xf32>
    %cst_82 = arith.constant 3.200000e+01 : f32
    %161 = vector.broadcast %cst_82 : f32 to vector<4x1xf32>
    %162 = arith.divf %160, %161 : vector<4x1xf32>
    %163 = vector.broadcast %162 : vector<4x1xf32> to vector<4x32xf32>
    %164 = arith.subf %158, %163 : vector<4x32xf32>
    %165 = arith.mulf %164, %164 : vector<4x32xf32>
    %cst_83 = arith.constant dense<0.000000e+00> : vector<4xf32>
    %166 = vector.multi_reduction <add>, %165, %cst_83 [1] : vector<4x32xf32> to vector<4xf32>
    %167 = vector.shape_cast %166 : vector<4xf32> to vector<4x1xf32>
    %cst_84 = arith.constant 3.200000e+01 : f32
    %168 = vector.broadcast %cst_84 : f32 to vector<4x1xf32>
    %169 = arith.divf %167, %168 : vector<4x1xf32>
    %170 = vector.broadcast %162 : vector<4x1xf32> to vector<4x32xf32>
    %171 = arith.subf %158, %170 : vector<4x32xf32>
    %cst_85 = arith.constant 9.99999974E-6 : f32
    %172 = vector.broadcast %cst_85 : f32 to vector<4x1xf32>
    %173 = arith.addf %169, %172 : vector<4x1xf32>
    %174 = math.rsqrt %173 : vector<4x1xf32>
    %175 = vector.broadcast %174 : vector<4x1xf32> to vector<4x32xf32>
    %176 = arith.mulf %171, %175 : vector<4x32xf32>
    %177 = vector.broadcast %12 : vector<1x32xf32> to vector<4x32xf32>
    %178 = arith.mulf %176, %177 : vector<4x32xf32>
    %179 = vector.broadcast %13 : vector<1x32xf32> to vector<4x32xf32>
    %180 = arith.addf %178, %179 : vector<4x32xf32>
    %181 = arith.index_cast %c0_i32_46 : i32 to index
    %c0_86 = arith.constant 0 : index
    %c0_87 = arith.constant 0 : index
    %182 = vector.load %arg16[%181, %c0_86, %c0_87] : memref<2x4x32xf32, #tpu.memory_space<vmem>>, vector<1x4x32xf32>
    %183 = vector.shape_cast %182 : vector<1x4x32xf32> to vector<4x32xf32>
    %184 = vector.shape_cast %180 : vector<4x32xf32> to vector<1x4x32xf32>
    tpu.vector_store %arg16[%181, %c0_86, %c0_87], %184 {strides = array<i32>} : memref<2x4x32xf32, #tpu.memory_space<vmem>>, vector<1x4x32xf32>,
    %c1_i32_88 = arith.constant 1 : i32
    %185 = arith.index_cast %c1_i32_88 : i32 to index
    %c0_89 = arith.constant 0 : index
    %c0_90 = arith.constant 0 : index
    %186 = vector.load %arg17[%185, %c0_89, %c0_90] : memref<2x4x32xf32, #tpu.memory_space<vmem>>, vector<1x4x32xf32>
    %187 = vector.shape_cast %186 : vector<1x4x32xf32> to vector<4x32xf32>
    %cst_91 = arith.constant 0xFF800000 : f32
    %188 = vector.broadcast %cst_91 : f32 to vector<4x4xf32>
    %cst_92 = arith.constant 0.000000e+00 : f32
    %189 = vector.broadcast %cst_92 : f32 to vector<4x4xf32>
    %cst_93 = arith.constant 0.000000e+00 : f32
    %190 = vector.broadcast %cst_93 : f32 to vector<4x32xf32>
    %c0_i32_94 = arith.constant 0 : i32
    %191 = arith.index_cast %c0_i32_94 : i32 to index
    %c0_95 = arith.constant 0 : index
    %c0_96 = arith.constant 0 : index
    %192 = vector.load %arg18[%191, %c0_95, %c0_96] : memref<2x4x32xf32, #tpu.memory_space<vmem>>, vector<1x4x32xf32>
    %193 = vector.shape_cast %192 : vector<1x4x32xf32> to vector<4x32xf32>
    %194 = arith.index_cast %c0_i32_94 : i32 to index
    %c0_97 = arith.constant 0 : index
    %c0_98 = arith.constant 0 : index
    %195 = vector.load %arg19[%194, %c0_97, %c0_98] : memref<2x4x32xf32, #tpu.memory_space<vmem>>, vector<1x4x32xf32>
    %196 = vector.shape_cast %195 : vector<1x4x32xf32> to vector<4x32xf32>
    %197 = arith.mulf %187, %193 : vector<4x32xf32>
    %198 = arith.truncf %197 : vector<4x32xf32> to vector<4x32xbf16>
    %cst_99 = arith.constant dense<0.000000e+00> : vector<4x4xf32>
    %199 = tpu.matmul %198, %4, %cst_99 {dimension_numbers = #tpu.dot_dimension_numbers<[1], [0], [0], [1], [0, 0, 1, 1], [], []>} : vector<4x32xbf16>, vector<32x4xbf16>, vector<4x4xf32> -> vector<4x4xf32>
    %200 = arith.maximumf %188, %199 : vector<4x4xf32>
    %201 = arith.subf %188, %200 : vector<4x4xf32>
    %202 = math.exp %201 : vector<4x4xf32>
    %203 = arith.subf %199, %200 : vector<4x4xf32>
    %204 = math.exp %203 : vector<4x4xf32>
    %205 = arith.mulf %202, %189 : vector<4x4xf32>
    %206 = arith.addf %205, %204 : vector<4x4xf32>
    %207 = arith.truncf %202 : vector<4x4xf32> to vector<4x4xbf16>
    %cst_100 = arith.constant dense<0.000000e+00> : vector<4x32xf32>
    %208 = tpu.matmul %207, %5, %cst_100 {dimension_numbers = #tpu.dot_dimension_numbers<[1], [0], [0], [1], [0, 0, 1, 1], [], []>} : vector<4x4xbf16>, vector<4x32xbf16>, vector<4x32xf32> -> vector<4x32xf32>
    %209 = arith.truncf %204 : vector<4x4xf32> to vector<4x4xbf16>
    %cst_101 = arith.constant dense<0.000000e+00> : vector<4x32xf32>
    %210 = tpu.matmul %209, %5, %cst_101 {dimension_numbers = #tpu.dot_dimension_numbers<[1], [0], [0], [1], [0, 0, 1, 1], [], []>} : vector<4x4xbf16>, vector<4x32xbf16>, vector<4x32xf32> -> vector<4x32xf32>
    %211 = arith.mulf %208, %190 : vector<4x32xf32>
    %212 = arith.mulf %210, %196 : vector<4x32xf32>
    %213 = arith.addf %211, %212 : vector<4x32xf32>
    %c1_i32_102 = arith.constant 1 : i32
    %214 = arith.index_cast %c1_i32_102 : i32 to index
    %c0_103 = arith.constant 0 : index
    %c0_104 = arith.constant 0 : index
    %215 = vector.load %arg18[%214, %c0_103, %c0_104] : memref<2x4x32xf32, #tpu.memory_space<vmem>>, vector<1x4x32xf32>
    %216 = vector.shape_cast %215 : vector<1x4x32xf32> to vector<4x32xf32>
    %217 = arith.index_cast %c1_i32_102 : i32 to index
    %c0_105 = arith.constant 0 : index
    %c0_106 = arith.constant 0 : index
    %218 = vector.load %arg19[%217, %c0_105, %c0_106] : memref<2x4x32xf32, #tpu.memory_space<vmem>>, vector<1x4x32xf32>
    %219 = vector.shape_cast %218 : vector<1x4x32xf32> to vector<4x32xf32>
    %220 = arith.mulf %187, %216 : vector<4x32xf32>
    %221 = arith.truncf %220 : vector<4x32xf32> to vector<4x32xbf16>
    %cst_107 = arith.constant dense<0.000000e+00> : vector<4x4xf32>
    %222 = tpu.matmul %221, %4, %cst_107 {dimension_numbers = #tpu.dot_dimension_numbers<[1], [0], [0], [1], [0, 0, 1, 1], [], []>} : vector<4x32xbf16>, vector<32x4xbf16>, vector<4x4xf32> -> vector<4x4xf32>
    %223 = arith.maximumf %200, %222 : vector<4x4xf32>
    %224 = arith.subf %200, %223 : vector<4x4xf32>
    %225 = math.exp %224 : vector<4x4xf32>
    %226 = arith.subf %222, %223 : vector<4x4xf32>
    %227 = math.exp %226 : vector<4x4xf32>
    %228 = arith.mulf %225, %206 : vector<4x4xf32>
    %229 = arith.addf %228, %227 : vector<4x4xf32>
    %230 = arith.truncf %225 : vector<4x4xf32> to vector<4x4xbf16>
    %cst_108 = arith.constant dense<0.000000e+00> : vector<4x32xf32>
    %231 = tpu.matmul %230, %5, %cst_108 {dimension_numbers = #tpu.dot_dimension_numbers<[1], [0], [0], [1], [0, 0, 1, 1], [], []>} : vector<4x4xbf16>, vector<4x32xbf16>, vector<4x32xf32> -> vector<4x32xf32>
    %232 = arith.truncf %227 : vector<4x4xf32> to vector<4x4xbf16>
    %cst_109 = arith.constant dense<0.000000e+00> : vector<4x32xf32>
    %233 = tpu.matmul %232, %5, %cst_109 {dimension_numbers = #tpu.dot_dimension_numbers<[1], [0], [0], [1], [0, 0, 1, 1], [], []>} : vector<4x4xbf16>, vector<4x32xbf16>, vector<4x32xf32> -> vector<4x32xf32>
    %234 = arith.mulf %231, %213 : vector<4x32xf32>
    %235 = arith.mulf %233, %219 : vector<4x32xf32>
    %236 = arith.addf %234, %235 : vector<4x32xf32>
    %c2_i32_110 = arith.constant 2 : i32
    %237 = tpu.reciprocal %229 {approx = true} : vector<4x4xf32> -> vector<4x4xf32>
    %238 = arith.truncf %237 : vector<4x4xf32> to vector<4x4xbf16>
    %cst_111 = arith.constant dense<0.000000e+00> : vector<4x32xf32>
    %239 = tpu.matmul %238, %5, %cst_111 {dimension_numbers = #tpu.dot_dimension_numbers<[1], [0], [0], [1], [0, 0, 1, 1], [], []>} : vector<4x4xbf16>, vector<4x32xbf16>, vector<4x32xf32> -> vector<4x32xf32>
    %240 = arith.mulf %236, %239 : vector<4x32xf32>
    %241 = arith.truncf %240 : vector<4x32xf32> to vector<4x32xbf16>
    %cst_112 = arith.constant dense<0.000000e+00> : vector<4x32xf32>
    %242 = tpu.matmul %241, %2, %cst_112 {dimension_numbers = #tpu.dot_dimension_numbers<[1], [0], [0], [1], [0, 0, 1, 1], [], []>} : vector<4x32xbf16>, vector<32x32xbf16>, vector<4x32xf32> -> vector<4x32xf32>
    %243 = vector.broadcast %3 : vector<1x32xf32> to vector<4x32xf32>
    %244 = arith.addf %242, %243 : vector<4x32xf32>
    %245 = arith.index_cast %c1_i32_88 : i32 to index
    %c0_113 = arith.constant 0 : index
    %c0_114 = arith.constant 0 : index
    %246 = vector.load %arg1[%245, %c0_113, %c0_114] : memref<2x4x32xf32, #tpu.memory_space<vmem>>, vector<1x4x32xf32>
    %247 = vector.shape_cast %246 : vector<1x4x32xf32> to vector<4x32xf32>
    %248 = arith.addf %244, %247 : vector<4x32xf32>
    %cst_115 = arith.constant dense<0.000000e+00> : vector<4xf32>
    %249 = vector.multi_reduction <add>, %248, %cst_115 [1] : vector<4x32xf32> to vector<4xf32>
    %250 = vector.shape_cast %249 : vector<4xf32> to vector<4x1xf32>
    %cst_116 = arith.constant 3.200000e+01 : f32
    %251 = vector.broadcast %cst_116 : f32 to vector<4x1xf32>
    %252 = arith.divf %250, %251 : vector<4x1xf32>
    %253 = vector.broadcast %252 : vector<4x1xf32> to vector<4x32xf32>
    %254 = arith.subf %248, %253 : vector<4x32xf32>
    %255 = arith.mulf %254, %254 : vector<4x32xf32>
    %cst_117 = arith.constant dense<0.000000e+00> : vector<4xf32>
    %256 = vector.multi_reduction <add>, %255, %cst_117 [1] : vector<4x32xf32> to vector<4xf32>
    %257 = vector.shape_cast %256 : vector<4xf32> to vector<4x1xf32>
    %cst_118 = arith.constant 3.200000e+01 : f32
    %258 = vector.broadcast %cst_118 : f32 to vector<4x1xf32>
    %259 = arith.divf %257, %258 : vector<4x1xf32>
    %260 = vector.broadcast %252 : vector<4x1xf32> to vector<4x32xf32>
    %261 = arith.subf %248, %260 : vector<4x32xf32>
    %cst_119 = arith.constant 9.99999974E-6 : f32
    %262 = vector.broadcast %cst_119 : f32 to vector<4x1xf32>
    %263 = arith.addf %259, %262 : vector<4x1xf32>
    %264 = math.rsqrt %263 : vector<4x1xf32>
    %265 = vector.broadcast %264 : vector<4x1xf32> to vector<4x32xf32>
    %266 = arith.mulf %261, %265 : vector<4x32xf32>
    %267 = vector.broadcast %6 : vector<1x32xf32> to vector<4x32xf32>
    %268 = arith.mulf %266, %267 : vector<4x32xf32>
    %269 = vector.broadcast %7 : vector<1x32xf32> to vector<4x32xf32>
    %270 = arith.addf %268, %269 : vector<4x32xf32>
    %271 = arith.truncf %270 : vector<4x32xf32> to vector<4x32xbf16>
    %cst_120 = arith.constant dense<0.000000e+00> : vector<4x64xf32>
    %272 = tpu.matmul %271, %8, %cst_120 {dimension_numbers = #tpu.dot_dimension_numbers<[1], [0], [0], [1], [0, 0, 1, 1], [], []>} : vector<4x32xbf16>, vector<32x64xbf16>, vector<4x64xf32> -> vector<4x64xf32>
    %273 = vector.broadcast %9 : vector<1x64xf32> to vector<4x64xf32>
    %274 = arith.addf %272, %273 : vector<4x64xf32>
    %cst_121 = arith.constant 0.000000e+00 : f32
    %275 = vector.broadcast %cst_121 : f32 to vector<4x64xf32>
    %276 = arith.maximumf %274, %275 : vector<4x64xf32>
    %277 = arith.truncf %276 : vector<4x64xf32> to vector<4x64xbf16>
    %cst_122 = arith.constant dense<0.000000e+00> : vector<4x32xf32>
    %278 = tpu.matmul %277, %10, %cst_122 {dimension_numbers = #tpu.dot_dimension_numbers<[1], [0], [0], [1], [0, 0, 1, 1], [], []>} : vector<4x64xbf16>, vector<64x32xbf16>, vector<4x32xf32> -> vector<4x32xf32>
    %279 = vector.broadcast %11 : vector<1x32xf32> to vector<4x32xf32>
    %280 = arith.addf %278, %279 : vector<4x32xf32>
    %281 = arith.addf %280, %270 : vector<4x32xf32>
    %cst_123 = arith.constant dense<0.000000e+00> : vector<4xf32>
    %282 = vector.multi_reduction <add>, %281, %cst_123 [1] : vector<4x32xf32> to vector<4xf32>
    %283 = vector.shape_cast %282 : vector<4xf32> to vector<4x1xf32>
    %cst_124 = arith.constant 3.200000e+01 : f32
    %284 = vector.broadcast %cst_124 : f32 to vector<4x1xf32>
    %285 = arith.divf %283, %284 : vector<4x1xf32>
    %286 = vector.broadcast %285 : vector<4x1xf32> to vector<4x32xf32>
    %287 = arith.subf %281, %286 : vector<4x32xf32>
    %288 = arith.mulf %287, %287 : vector<4x32xf32>
    %cst_125 = arith.constant dense<0.000000e+00> : vector<4xf32>
    %289 = vector.multi_reduction <add>, %288, %cst_125 [1] : vector<4x32xf32> to vector<4xf32>
    %290 = vector.shape_cast %289 : vector<4xf32> to vector<4x1xf32>
    %cst_126 = arith.constant 3.200000e+01 : f32
    %291 = vector.broadcast %cst_126 : f32 to vector<4x1xf32>
    %292 = arith.divf %290, %291 : vector<4x1xf32>
    %293 = vector.broadcast %285 : vector<4x1xf32> to vector<4x32xf32>
    %294 = arith.subf %281, %293 : vector<4x32xf32>
    %cst_127 = arith.constant 9.99999974E-6 : f32
    %295 = vector.broadcast %cst_127 : f32 to vector<4x1xf32>
    %296 = arith.addf %292, %295 : vector<4x1xf32>
    %297 = math.rsqrt %296 : vector<4x1xf32>
    %298 = vector.broadcast %297 : vector<4x1xf32> to vector<4x32xf32>
    %299 = arith.mulf %294, %298 : vector<4x32xf32>
    %300 = vector.broadcast %12 : vector<1x32xf32> to vector<4x32xf32>
    %301 = arith.mulf %299, %300 : vector<4x32xf32>
    %302 = vector.broadcast %13 : vector<1x32xf32> to vector<4x32xf32>
    %303 = arith.addf %301, %302 : vector<4x32xf32>
    %304 = arith.index_cast %c1_i32_88 : i32 to index
    %c0_128 = arith.constant 0 : index
    %c0_129 = arith.constant 0 : index
    %305 = vector.load %arg16[%304, %c0_128, %c0_129] : memref<2x4x32xf32, #tpu.memory_space<vmem>>, vector<1x4x32xf32>
    %306 = vector.shape_cast %305 : vector<1x4x32xf32> to vector<4x32xf32>
    %307 = vector.shape_cast %303 : vector<4x32xf32> to vector<1x4x32xf32>
    tpu.vector_store %arg16[%304, %c0_128, %c0_129], %307 {strides = array<i32>} : memref<2x4x32xf32, #tpu.memory_space<vmem>>, vector<1x4x32xf32>,
    %c2_i32_130 = arith.constant 2 : i32
    return
  }
  func.func @transform_0(%arg0: i32) -> (i32, i32, i32) {
    %c0_i32 = arith.constant 0 : i32
    %c0_i32_0 = arith.constant 0 : i32
    %c0_i32_1 = arith.constant 0 : i32
    return %c0_i32, %arg0, %c0_i32_0 : i32, i32, i32
  }
  func.func @transform_1(%arg0: i32) -> (i32, i32) {
    %c0_i32 = arith.constant 0 : i32
    %c0_i32_0 = arith.constant 0 : i32
    %c0_i32_1 = arith.constant 0 : i32
    return %c0_i32, %c0_i32_0 : i32, i32
  }
  func.func @transform_2(%arg0: i32) -> (i32, i32) {
    %c0_i32 = arith.constant 0 : i32
    %c0_i32_0 = arith.constant 0 : i32
    %c0_i32_1 = arith.constant 0 : i32
    return %c0_i32, %c0_i32_0 : i32, i32
  }
  func.func @transform_3(%arg0: i32) -> (i32, i32) {
    %c0_i32 = arith.constant 0 : i32
    %c0_i32_0 = arith.constant 0 : i32
    %c0_i32_1 = arith.constant 0 : i32
    return %c0_i32, %c0_i32_0 : i32, i32
  }
  func.func @transform_4(%arg0: i32) -> (i32, i32) {
    %c0_i32 = arith.constant 0 : i32
    %c0_i32_0 = arith.constant 0 : i32
    %c0_i32_1 = arith.constant 0 : i32
    return %c0_i32, %c0_i32_0 : i32, i32
  }
  func.func @transform_5(%arg0: i32) -> (i32, i32) {
    %c0_i32 = arith.constant 0 : i32
    %c0_i32_0 = arith.constant 0 : i32
    %c0_i32_1 = arith.constant 0 : i32
    return %c0_i32, %c0_i32_0 : i32, i32
  }
  func.func @transform_6(%arg0: i32) -> (i32, i32) {
    %c0_i32 = arith.constant 0 : i32
    %c0_i32_0 = arith.constant 0 : i32
    %c0_i32_1 = arith.constant 0 : i32
    return %c0_i32, %c0_i32_0 : i32, i32
  }
  func.func @transform_7(%arg0: i32) -> (i32, i32) {
    %c0_i32 = arith.constant 0 : i32
    %c0_i32_0 = arith.constant 0 : i32
    %c0_i32_1 = arith.constant 0 : i32
    return %c0_i32, %c0_i32_0 : i32, i32
  }
  func.func @transform_8(%arg0: i32) -> (i32, i32) {
    %c0_i32 = arith.constant 0 : i32
    %c0_i32_0 = arith.constant 0 : i32
    %c0_i32_1 = arith.constant 0 : i32
    return %c0_i32, %c0_i32_0 : i32, i32
  }
  func.func @transform_9(%arg0: i32) -> (i32, i32) {
    %c0_i32 = arith.constant 0 : i32
    %c0_i32_0 = arith.constant 0 : i32
    %c0_i32_1 = arith.constant 0 : i32
    return %c0_i32, %c0_i32_0 : i32, i32
  }
  func.func @transform_10(%arg0: i32) -> (i32, i32) {
    %c0_i32 = arith.constant 0 : i32
    %c0_i32_0 = arith.constant 0 : i32
    %c0_i32_1 = arith.constant 0 : i32
    return %c0_i32, %c0_i32_0 : i32, i32
  }
  func.func @transform_11(%arg0: i32) -> (i32, i32) {
    %c0_i32 = arith.constant 0 : i32
    %c0_i32_0 = arith.constant 0 : i32
    %c0_i32_1 = arith.constant 0 : i32
    return %c0_i32, %c0_i32_0 : i32, i32
  }
  func.func @transform_12(%arg0: i32) -> (i32, i32) {
    %c0_i32 = arith.constant 0 : i32
    %c0_i32_0 = arith.constant 0 : i32
    %c0_i32_1 = arith.constant 0 : i32
    return %c0_i32, %c0_i32_0 : i32, i32
  }
  func.func @transform_13(%arg0: i32) -> (i32, i32) {
    %c0_i32 = arith.constant 0 : i32
    %c0_i32_0 = arith.constant 0 : i32
    %c0_i32_1 = arith.constant 0 : i32
    return %c0_i32, %c0_i32_0 : i32, i32
  }
  func.func @transform_14(%arg0: i32) -> (i32, i32) {
    %c0_i32 = arith.constant 0 : i32
    %c0_i32_0 = arith.constant 0 : i32
    %c0_i32_1 = arith.constant 0 : i32
    return %c0_i32, %c0_i32_0 : i32, i32
  }
  func.func @transform_15(%arg0: i32) -> (i32, i32, i32) {
    %c0_i32 = arith.constant 0 : i32
    %c0_i32_0 = arith.constant 0 : i32
    %c0_i32_1 = arith.constant 0 : i32
    return %c0_i32, %arg0, %c0_i32_0 : i32, i32, i32
  }
}

</mosaic_0001>

<bundles_post_ra>
// kernel: vision_transformer_forward.3
= control target key start
LH: loop header
LB: loop body
LE: loop exit
PB: predicated region body
PF: predicated region fallthrough
CT: control target
= control target key end

     0   :  { %s634_s15 = smov 0   ;;  %s636_s16 = smov 0   ;;  %s713_s0 = inlined_call_operand.vmem [shape: f32[2,4,192], index: 0, kind: input, shape index: {}]   ;;  %s714_s1 = inlined_call_operand.vmem [shape: bf16[192,32], index: 1, kind: input, shape index: {}]   ;;  %s715_s2 = inlined_call_operand.vmem [shape: f32[1,32], index: 2, kind: input, shape index: {}]   ;;  %s716_s3 = inlined_call_operand.vmem [shape: f32[4,32], index: 3, kind: input, shape index: {}]   ;;  %s717_s4 = inlined_call_operand.vmem [shape: f32[2,4,32], index: 4, kind: output, shape index: {}]  }
   0x1   :  { %s638_s17 = smov 0  }
   0x2 LB: > { %s26_s18 = sadd.s32 1, %s603_s16  ;;  %p492_p0 = scmp.ge.s32.totalorder %s607_s17, 1  ;;  %s607_s17 = sphi %s638_s17, %s14_s17   ;;  %s603_s16 = sphi %s636_s16, %s719_s16   ;;  %s599_s15 = sphi %s634_s15, %s718_s15  }
   0x3   : > { %p28_p1 = scmp.ge.s32.totalorder %s26_s18, 2  ;;  %p191_p2 = scmp.lt.s32.totalorder %s607_s17, 3 }
   0x5   : > { %s721_s18 = smov (%p28_p1, %s26_s18), 0  ;;  %p192_p3 = pnand %p492_p0, %p191_p2 }
   0x6   : > { %p227_p4 = scmp.lt.s32.totalorder (!%p192_p3), %s599_s15, 1 }
   0x7   : > { %195 = sbr.rel (%p192_p3) target bundleno = 178 (0xb2), region = 36 }
   0xc   : > { %v555_v0 = vld [vmem:[%s714_s1 + $0x38] sm:$0xff]  ;;  %v554_v2 = vld [vmem:[%s714_s1 + $0x30] sm:$0xff]  ;;  %s723_s15 = smov (!%p227_p4, %s599_s15), 1  ;;  %v553_v4 = vld [vmem:[%s714_s1 + $0x28] sm:$0xff]  ;;  %vm357_vm0 = vcmask 523264   ;;  %vm389_vm1 = vcmask 257024  }
   0xd   : > { %v559_v1 = vld [vmem:[%s714_s1 + $0x58] sm:$0xff]  ;;  %361 = vmatpush.bf16.msra.mxu0 %v555_v0  ;;  %v558_v3 = vld [vmem:[%s714_s1 + $0x50] sm:$0xff]  ;;  %s547_s27 = sshll.u32 %s723_s15, 3  ;;  %v557_v6 = vld [vmem:[%s714_s1 + $0x48] sm:$0xff] }
   0xe   : > { %378 = vmatpush.bf16.msra.mxu1 %v559_v1  ;;  %s235_s30 = scalar_lea.vmem %s713_s0, %s547_s27  ;;  %v552_v7 = vld [vmem:[%s714_s1 + $0x20] sm:$0xff]  ;;  %v551_v9 = vld [vmem:[%s714_s1 + $0x18] sm:$0xff]  ;;  %v550_v12 = vld [vmem:[%s714_s1 + $0x10] sm:$0xff]  ;;  %s495_s27 = sshll.u32 %s723_s15, 2 }
   0xf   : > { %v248_v5 = vld [vmem:[%s235_s30] sm:$0xff]  ;;  %v549_v13 = vld [vmem:[%s714_s1 + $0x8] sm:$0xff]  ;;  %s246_s6 = scalar_lea.vmem %s717_s4, %s495_s27 }
  0x10   : > { %250 = vst [vmem:[#allocation1] ss:$2 sm:$0xff] %v248_v5  ;;  %v556_v8 = vld [vmem:[%s714_s1 + $0x40] sm:$0xff] }
  0x11   : > { %362 = vmatpush.bf16.msra.mxu0 %v554_v2  ;;  %v548_v14 = vld [vmem:[%s714_s1] sm:$0xff] }
  0x12   : > { %379 = vmatpush.bf16.msra.mxu1 %v558_v3  ;;  %v584_v19 = vld [vmem:[%s715_s2] ss:$0 sm:$0xff] }
  0x13   : > { %v387_v22 = vld [vmem:[%s716_s3] sm:$0xf] }
  0x15   : > { %363 = vmatpush.bf16.msra.mxu0 %v553_v4 }
  0x16   : > { %380 = vmatpush.bf16.msra.mxu1 %v557_v6 }
  0x17   : > { %v252_v10 = vld.sshfl [vmem:[#allocation1 + $0x8] sm:$0xff pattern:$0x75316420]  ;;  %v251_v15 = vld.sshfl [vmem:[#allocation1] sm:$0xff pattern:$0x75316420] }
  0x18   : > { %v256_v11 = vpack.c.bf16 %v252_v10, %v252_v10  ;;  %v255_v16 = vpack.c.bf16 %v251_v15, %v251_v15 }
  0x19   : > { %364 = vmatpush.bf16.msra.mxu0 %v552_v7 }
  0x1a   : > { %381 = vmatpush.bf16.msra.mxu1 %v556_v8 }
  0x1d   : > { %365 = vmatpush.bf16.msra.mxu0 %v551_v9  ;;  %544 = vmatmul.msk.bf16.vlgmr.msra.gmra.mxu1 %vm357_vm0, %v256_v11 }
  0x21   : > { %366 = vmatpush.bf16.msra.mxu0 %v550_v12 }
  0x25   : > { %367 = vmatpush.bf16.msra.mxu0 %v549_v13 }
  0x29   : > { %368 = vmatpush.bf16.msra.mxu0 %v548_v14 }
  0x2c   : > { %369 = vmatmul.bf16.vlgmr.msra.gmra.mxu0 %v255_v16 }
  0x9a   : > { %v383_v17 = vpop.f32.mrf.mxu1 }
  0xa2   : > { %v385_v18 = vpop.f32.mrf.mxu1 }
  0xa9   : > { %v370_v20 = vpop.f32.mrf.mxu0 }
  0xaa   : > { %v371_v21 = vadd.f32 %v584_v19, %v370_v20 }
  0xac   : > { %v384_v23 = vadd.f32 %v383_v17, %v371_v21 }
  0xae   : > { %v388_v24 = vadd.f32 %v387_v22, %v384_v23 }
  0xb0   : > { %390 = vst.msk [vmem:[%s246_s6] sm:$0xf] %vm389_vm1, %v388_v24 }
  0xb1   : > { %v372_v25 = vpop.f32.mrf.mxu0 }
  0xb2 PF: > { %s14_s17 = sadd.s32 1, %s607_s17   ;;  %s718_s15 = smov %s603_s16 }
  0xb3   : > { %p11_p5 = scmp.ge.s32.totalorder %s14_s17, 4   ;;  %s719_s16 = smov %s721_s18 }
  0xb5   :  { %13 = sbr.rel (!%p11_p5) target bundleno = 2 (0x2), region = 69 }

// kernel: vision_transformer_forward.5
= control target key start
LH: loop header
LB: loop body
LE: loop exit
PB: predicated region body
PF: predicated region fallthrough
CT: control target
= control target key end

     0   :  { %s1233_s0 = inlined_call_operand.vmem [shape: f32[2,4,32], index: 0, kind: input, shape index: {}]   ;;  %s1234_s1 = inlined_call_operand.vmem [shape: bf16[32,96], index: 1, kind: input, shape index: {}]   ;;  %s1235_s2 = inlined_call_operand.vmem [shape: f32[1,96], index: 2, kind: input, shape index: {}]   ;;  %s1236_s3 = inlined_call_operand.vmem [shape: bf16[32,32], index: 3, kind: input, shape index: {}]   ;;  %s1237_s4 = inlined_call_operand.vmem [shape: f32[1,32], index: 4, kind: input, shape index: {}]   ;;  %s1238_s5 = inlined_call_operand.vmem [shape: bf16[32,4], index: 5, kind: input, shape index: {}]   ;;  %s1239_s6 = inlined_call_operand.vmem [shape: bf16[4,32], index: 6, kind: input, shape index: {}]   ;;  %s1240_s7 = inlined_call_operand.vmem [shape: f32[1,32], index: 7, kind: input, shape index: {}]   ;;  %s1241_s8 = inlined_call_operand.vmem [shape: f32[1,32], index: 8, kind: input, shape index: {}]   ;;  %s1242_s9 = inlined_call_operand.vmem [shape: bf16[32,64], index: 9, kind: input, shape index: {}]   ;;  %s1243_s10 = inlined_call_operand.vmem [shape: f32[1,64], index: 10, kind: input, shape index: {}]   ;;  %s1244_s11 = inlined_call_operand.vmem [shape: bf16[64,32], index: 11, kind: input, shape index: {}]   ;;  %s1245_s12 = inlined_call_operand.vmem [shape: f32[1,32], index: 12, kind: input, shape index: {}]   ;;  %s1246_s13 = inlined_call_operand.vmem [shape: f32[1,32], index: 13, kind: input, shape index: {}]   ;;  %s1247_s14 = inlined_call_operand.vmem [shape: f32[1,32], index: 14, kind: input, shape index: {}]   ;;  %s1248_s15 = inlined_call_operand.hbm [shape: f32[2,4,32], index: 15, kind: output, shape index: {}]  }
   0x1   :  { %v860_v0 = vld [vmem:[%s1234_s1 + $0x8] sm:$0xff]  ;;  %v859_v1 = vld [vmem:[%s1234_s1] sm:$0xff] }
   0x2   :  { %v85_v2 = vld [vmem:[%s1233_s0] sm:$0xf]  ;;  %v796_v3 = vld [vmem:[%s1233_s0 + $0x4] sm:$0xf]  ;;  %112 = vmatpush.bf16.msra.mxu0 %v860_v0  ;;  %143 = vmatpush.bf16.msra.mxu1 %v860_v0 }
   0x3   :  { %20 = vsyncpa [#allocation6], 0  ;;  %v86_v4 = vpack.c.bf16 %v85_v2, %v85_v2  ;;  %v133_v5 = vpack.c.bf16 %v796_v3, %v796_v3  ;;  %vm102_vm0 = vcmask 261120   ;;  %v876_v6 = vld [vmem:[%s1235_s2] ss:$0 sm:$0xff]  ;;  %vm120_vm1 = vcmask 257024  }
   0x4   :  { %s940_s27 = smov 64   ;;  %s941_s28 = smov 96   ;;  %v1049_v15 = vld [vmem:[%s1238_s5 + $0x8] sm:$0xff]  ;;  %v1056_v16 = vld [vmem:[%s1238_s5] sm:$0xff]  ;;  %vm210_vm2 = vcmask 1041408   ;;  %vm206_vm3 = vcmask 31744  }
   0x5   :  { %190 = vmatpush.bf16.msra.mxu2 %v1049_v15  ;;  %v66_v28 = vld [vmem:[%s1239_s6] sm:$0x3]  ;;  %v1091_v61 = vld [vmem:[%s1236_s3 + $0x8] sm:$0xff]  ;;  %vm464_vm8 = vcmask 523264   ;;  %s775_s24 = sshll.u32 %s1248_s15, 4  ;;  %s944_s25 = smov 4   ;;  %s776_s24 = int_to_ptr.hbm [resolvable:$true] %s775_s24 }
   0x6   :  { %113 = vmatpush.bf16.msra.mxu0 %v859_v1  ;;  %144 = vmatpush.bf16.msra.mxu1 %v859_v1  ;;  %v1069_v29 = vsel %vm210_vm2, %v66_v28, 0  ;;  %v1097_v62 = vld [vmem:[%s1236_s3] sm:$0xff] }
   0x7   :  { %221 = vmatpush.bf16.msra.mxu3 %v1069_v29 }
   0x9   :  { %795 = vmatmul.msk.bf16.vlgmr.msra.gmra.mxu0 %vm102_vm0, %v86_v4  ;;  %797 = vmatmul.msk.bf16.vlgmr.msra.gmra.mxu1 %vm102_vm0, %v133_v5 }
   0xa   :  { %260 = vmatpush.bf16.msrb.mxu0 %v1049_v15  ;;  %191 = vmatpush.bf16.msra.mxu2 %v1056_v16 }
   0xb   :  { %287 = vmatpush.bf16.msrb.mxu1 %v1069_v29  ;;  %238 = vmatpush.bf16.msrb.mxu3 %v1069_v29 }
   0xe   :  { %261 = vmatpush.bf16.msrb.mxu0 %v1056_v16  ;;  %304 = vmatpush.bf16.msrb.mxu2 %v1069_v29 }
  0x12   :  { %357 = vmatpush.bf16.msra.mxu0 %v1091_v61 }
  0x16   :  { %358 = vmatpush.bf16.msra.mxu0 %v1097_v62 }
  0x86   :  { %v115_v7 = vpop.f32.mrf.mxu0  ;;  %v146_v8 = vpop.f32.mrf.mxu1 }
  0x87   :  { %v116_v9 = vadd.f32 %v876_v6, %v115_v7  ;;  %v147_v10 = vadd.f32 %v876_v6, %v146_v8 }
  0x89   :  { %v119_v11 = vmul.f32 0.35355338, %v116_v9  ;;  %127 = vrot.lane.b32.xlu1 %v116_v9, %s940_s27  ;;  %123 = vrot.lane.b32.xlu0 %v116_v9, %s941_s28  ;;  %v150_v12 = vmul.f32 0.35355338, %v147_v10 }
  0x8b   :  { %121 = vst.msk [vmem:[#allocation2] sm:$0xf] %vm120_vm1, %v119_v11 }
  0x8c   :  { %152 = vst.msk [vmem:[#allocation2 + $0x4] sm:$0xf] %vm120_vm1, %v150_v12 }
  0x8e   :  { %v117_v13 = vpop.f32.mrf.mxu0  ;;  %v148_v14 = vpop.f32.mrf.mxu1 }
  0x91   :  { %154 = vrot.lane.b32.xlu0 %v147_v10, %s941_s28  ;;  %159 = vrot.lane.b32.xlu1 %v147_v10, %s940_s27 }
  0x92   :  { %v164_v21 = vld [vmem:[#allocation2] sm:$0xf] }
  0x93   :  { %v1084_v58 = vld [vmem:[#allocation2 + $0x4] sm:$0xf] }
  0xfb   :  { %v128_v17 = vpop.permute.xlu1 %127  ;;  %v124_v18 = vpop.permute.xlu0 %123 }
  0xfc   :  { %130 = vst.msk [vmem:[#allocation4] sm:$0xf] %vm120_vm1, %v128_v17 }
  0xfd   :  { %126 = vst.msk [vmem:[#allocation3] sm:$0xf] %vm120_vm1, %v124_v18 }
 0x103   :  { %v155_v19 = vpop.permute.xlu0 %154  ;;  %v160_v20 = vpop.permute.xlu1 %159  ;;  %v166_v6 = vld [vmem:[#allocation4] sm:$0xf] }
 0x104   :  { %158 = vst.msk [vmem:[#allocation3 + $0x4] sm:$0xf] %vm120_vm1, %v155_v19  ;;  %v165_v22 = vld [vmem:[#allocation3] sm:$0xf] }
 0x105   :  { %v167_v23 = vmul.f32 %v165_v22, %v164_v21  ;;  %163 = vst.msk [vmem:[#allocation4 + $0x4] sm:$0xf] %vm120_vm1, %v160_v20  ;;  %v514_v57 = vld [vmem:[#allocation3] sm:$0xf] }
 0x106   :  { %v516_v59 = vmul.f32 %v514_v57, %v1084_v58 }
 0x107   :  { %v168_v24 = vpack.c.bf16 %v167_v23, %v167_v23 }
 0x108   :  { %v517_v60 = vpack.c.bf16 %v516_v59, %v516_v59 }
 0x109   :  { %806 = vmatmul.msk.bf16.vlgmr.msra.gmra.mxu2 %vm102_vm0, %v168_v24 }
 0x10b   :  { %v247_v25 = vld [vmem:[#allocation3 + $0x4] sm:$0xf] }
 0x10c   :  { %v249_v26 = vmul.f32 %v247_v25, %v164_v21  ;;  %v248_v12 = vld [vmem:[#allocation4 + $0x4] sm:$0xf] }
 0x10e   :  { %v250_v27 = vpack.c.bf16 %v249_v26, %v249_v26 }
 0x110   :  { %809 = vmatmul.msk.bf16.vlgmr.msrb.gmra.mxu0 %vm102_vm0, %v250_v27 }
 0x111   :  { %553 = vmatpush.bf16.msrb.mxu0 %v1069_v29 }
 0x18c   :  { %v193_v30 = vpop.f32.mrf.mxu2 }
 0x18d   :  { %v197_v31 = vsub.f32 -inf, %v193_v30  ;;  %v263_v32 = vpop.f32.mrf.mxu0  ;;  %v200_v39 = vsub.f32 %v193_v30, %v193_v30 }
 0x18e   :  { %v267_v33 = vmax.f32 %v193_v30, %v263_v32 }
 0x18f   :  { %v198_v34 = vmul.f32 1.442695, %v197_v31  ;;  %v201_v43 = vmul.f32 1.442695, %v200_v39 }
 0x190   :  { %v268_v35 = vsub.f32 %v193_v30, %v267_v33  ;;  %v271_v36 = vsub.f32 %v263_v32, %v267_v33  ;;  %v1117_v33 = vld [vmem:[%s1237_s4] ss:$0 sm:$0xff] }
 0x191   :  { %884 = vpow2.f32 %v198_v34 }
 0x192   :  { %v269_v37 = vmul.f32 1.442695, %v268_v35  ;;  %v272_v38 = vmul.f32 1.442695, %v271_v36  ;;  %v364_v35 = vld [vmem:[%s1233_s0] sm:$0xf] }
 0x194   :  { %886 = vpow2.f32 %v269_v37  ;;  %v195_v40 = vpop.f32.mrf.mxu2 }
 0x195   :  { %888 = vpow2.f32 %v272_v38  ;;  %v265_v41 = vpop.f32.mrf.mxu0 }
 0x196   :  { %890 = vpow2.f32 %v201_v43 }
 0x197   :  { %v885_v42 = vpop.eup %884 }
 0x198   :  { %v205_v44 = vpack.c.bf16 %v885_v42, %v885_v42  ;;  %v203_v49 = vmul.f32 0.0, %v885_v42  ;;  %v942_v42 = vmov 32.0  }
 0x19a   :  { %v887_v45 = vpop.eup %886  ;;  %807 = vmatmul.msk.bf16.vlgmr.msra.gmra.mxu3 %vm206_vm3, %v205_v44 }
 0x19b   :  { %v889_v46 = vpop.eup %888  ;;  %v276_v47 = vpack.c.bf16 %v887_v45, %v887_v45  ;;  %325 = vmatpush.bf16.msra.mxu3 %v1069_v29 }
 0x19c   :  { %v293_v48 = vpack.c.bf16 %v889_v46, %v889_v46  ;;  %v891_v50 = vpop.eup %890 }
 0x19d   :  { %810 = vmatmul.msk.bf16.vlgmr.msrb.gmra.mxu1 %vm206_vm3, %v276_v47  ;;  %v204_v51 = vadd.f32 %v891_v50, %v203_v49  ;;  %v227_v53 = vpack.c.bf16 %v891_v50, %v891_v50 }
 0x19e   :  { %811 = vmatmul.msk.bf16.vlgmr.msrb.gmra.mxu2 %vm206_vm3, %v293_v48 }
 0x19f   :  { %v274_v52 = vmul.f32 %v887_v45, %v204_v51 }
 0x1a1   :  { %v275_v54 = vadd.f32 %v889_v46, %v274_v52 }
 0x1a3   :  { %892 = vrcp.f32 %v275_v54  ;;  %v866_v54 = vld [vmem:[%s1242_s9 + $0x8] sm:$0xff] }
 0x1a4   :  { %428 = vmatpush.bf16.msra.mxu1 %v866_v54 }
 0x1a9   :  { %v893_v55 = vpop.eup %892 }
 0x1aa   :  { %808 = vmatmul.msk.bf16.vlgmr.msrb.gmra.mxu3 %vm206_vm3, %v227_v53  ;;  %v314_v56 = vpack.c.bf16 %v893_v55, %v893_v55  ;;  %v865_v55 = vld [vmem:[%s1242_s9] sm:$0xff] }
 0x1ab   :  { %527 = vmatpush.bf16.msrb.mxu3 %v1049_v15  ;;  %429 = vmatpush.bf16.msra.mxu1 %v865_v55 }
 0x1af   :  { %528 = vmatpush.bf16.msrb.mxu3 %v1056_v16  ;;  %570 = vmatpush.bf16.msrb.mxu1 %v1069_v29 }
 0x1ba   :  { %812 = vmatmul.msk.bf16.vlgmr.msra.gmra.mxu3 %vm206_vm3, %v314_v56 }
 0x1bb   :  { %619 = vmatpush.bf16.msra.mxu3 %v1069_v29 }
 0x1ca   :  { %848 = vmatmul.msk.bf16.vlgmr.msrb.gmra.mxu3 %vm102_vm0, %v517_v60 }
 0x1cb   :  { %717 = vmatpush.bf16.msrb.mxu3 %v866_v54 }
 0x1cf   :  { %718 = vmatpush.bf16.msrb.mxu3 %v865_v55 }
 0x21a   :  { %v289_v63 = vpop.f32.mrf.mxu1 }
 0x21d   :  { %v223_v0 = vpop.f32.mrf.mxu3 }
 0x21e   :  { %v244_v8 = vmul.f32 0.0, %v223_v0 }
 0x221   :  { %v306_v1 = vpop.f32.mrf.mxu2 }
 0x222   :  { %v291_v2 = vpop.f32.mrf.mxu1  ;;  %v311_v13 = vmul.f32 %v306_v1, %v248_v12  ;;  %v870_v1 = vld [vmem:[%s1244_s11 + $0x18] sm:$0xff] }
 0x223   :  { %472 = vmatpush.bf16.msra.mxu2 %v870_v1 }
 0x225   :  { %v225_v3 = vpop.f32.mrf.mxu3 }
 0x226   :  { %v869_v3 = vld [vmem:[%s1244_s11 + $0x10] sm:$0xff] }
 0x227   :  { %473 = vmatpush.bf16.msra.mxu2 %v869_v3 }
 0x229   :  { %v308_v4 = vpop.f32.mrf.mxu2 }
 0x22d   :  { %v240_v5 = vpop.f32.mrf.mxu3 }
 0x22e   :  { %v245_v7 = vmul.f32 %v240_v5, %v166_v6  ;;  %v1147_v6 = vld [vmem:[%s1240_s7] ss:$0 sm:$0xff] }
 0x230   :  { %v246_v9 = vadd.f32 %v245_v7, %v244_v8  ;;  %v868_v7 = vld [vmem:[%s1244_s11 + $0x8] sm:$0xff] }
 0x231   :  { %474 = vmatpush.bf16.msra.mxu2 %v868_v7 }
 0x232   :  { %v310_v11 = vmul.f32 %v289_v63, %v246_v9  ;;  %v1155_v9 = vld [vmem:[%s1241_s8] ss:$0 sm:$0xff] }
 0x234   :  { %v312_v14 = vadd.f32 %v311_v13, %v310_v11 }
 0x235   :  { %v242_v10 = vpop.f32.mrf.mxu3 }
 0x23d   :  { %v327_v17 = vpop.f32.mrf.mxu3 }
 0x23e   :  { %v331_v18 = vmul.f32 %v327_v17, %v312_v14  ;;  %v867_v17 = vld [vmem:[%s1244_s11] sm:$0xff] }
 0x23f   :  { %475 = vmatpush.bf16.msra.mxu2 %v867_v17 }
 0x240   :  { %v332_v19 = vpack.c.bf16 %v331_v18, %v331_v18  ;;  %v1172_v18 = vld [vmem:[%s1243_s10] ss:$0 sm:$0xff] }
 0x242   :  { %821 = vmatmul.msk.bf16.vlgmr.msra.gmra.mxu0 %vm102_vm0, %v332_v19 }
 0x243   :  { %636 = vmatpush.bf16.msra.mxu0 %v1069_v29  ;;  %592 = vmatpush.bf16.msrb.mxu2 %v1049_v15  ;;  %v579_v15 = vld [vmem:[#allocation3 + $0x4] sm:$0xf] }
 0x245   :  { %v329_v20 = vpop.f32.mrf.mxu3 }
 0x247   :  { %593 = vmatpush.bf16.msrb.mxu2 %v1056_v16  ;;  %v515_v16 = vld [vmem:[#allocation4] sm:$0xf] }
 0x24d   :  { %v1103_v21 = vpop.f32.mrf.mxu3 }
 0x24e   :  { %v534_v22 = vsub.f32 -inf, %v1103_v21  ;;  %v537_v23 = vsub.f32 %v1103_v21, %v1103_v21 }
 0x250   :  { %v535_v24 = vmul.f32 1.442695, %v534_v22  ;;  %v538_v25 = vmul.f32 1.442695, %v537_v23 }
 0x252   :  { %894 = vpow2.f32 %v535_v24 }
 0x253   :  { %896 = vpow2.f32 %v538_v25 }
 0x254   :  { %898 = vrcp.f32 %v942_v42 }
 0x255   :  { %v532_v26 = vpop.f32.mrf.mxu3 }
 0x258   :  { %v895_v27 = vpop.eup %894 }
 0x259   :  { %v540_v28 = vmul.f32 0.0, %v895_v27  ;;  %v542_v30 = vpack.c.bf16 %v895_v27, %v895_v27  ;;  %v1108_v31 = vpop.eup %896  ;;  %v581_v27 = vmul.f32 %v579_v15, %v1084_v58 }
 0x25a   :  { %v899_v43 = vpop.eup %898  ;;  %v559_v14 = vpack.c.bf16 %v1108_v31, %v1108_v31 }
 0x25b   :  { %849 = vmatmul.msk.bf16.vlgmr.msrb.gmra.mxu0 %vm206_vm3, %v542_v30  ;;  %v1112_v32 = vadd.f32 %v1108_v31, %v540_v28  ;;  %v370_v44 = vmul.f32 32.0, %v899_v43  ;;  %vm374_vm4 = vweird.f32 %v899_v43  ;;  %v582_v30 = vpack.c.bf16 %v581_v27, %v581_v27 }
 0x25c   :  { %733 = vmatpush.bf16.msrb.mxu0 %v870_v1 }
 0x25d   :  { %v371_v45 = vsub.f32 1.0, %v370_v44 }
 0x25f   :  { %v372_v46 = vmul.f32 %v899_v43, %v371_v45 }
 0x260   :  { %734 = vmatpush.bf16.msrb.mxu0 %v869_v3  ;;  %v856_v3 = vld [vmem:[%s1233_s0 + $0x4] sm:$0xf] }
 0x261   :  { %v373_v47 = vadd.f32 %v899_v43, %v372_v46 }
 0x263   :  { %v1126_v48 = vsel %vm374_vm4, %v899_v43, %v373_v47 }
 0x264   :  { %735 = vmatpush.bf16.msrb.mxu0 %v868_v7 }
 0x268   :  { %736 = vmatpush.bf16.msrb.mxu0 %v867_v17 }
 0x2bf   :  { %v360_v34 = vpop.f32.mrf.mxu0 }
 0x2c0   :  { %v361_v36 = vadd.f32 %v1117_v33, %v360_v34  ;;  %v1184_v34 = vld [vmem:[%s1245_s12] ss:$0 sm:$0xff] }
 0x2c2   :  { %v365_v37 = vadd.f32 %v364_v35, %v361_v36 }
 0x2c4   :  { %v366_v38 = vsel %vm120_vm1, %v365_v37, 0.0 }
 0x2c5   :  { %367 = vadd.xlane.f32.xlu2 %v366_v38 }
 0x2c7   :  { %v362_v39 = vpop.f32.mrf.mxu0 }
 0x2d8   :  { %v1124_v40 = vpop.f32.mrf.mxu0 }
 0x2d9   :  { %v576_v25 = vmul.f32 0.0, %v1124_v40 }
 0x2e0   :  { %v557_v41 = vpop.f32.mrf.mxu0 }
 0x338   :  { %v368_v49 = vpop.xlane.xlu2 %367 }
 0x339   :  { %v376_v50 = vmul.f32 %v1126_v48, %v368_v49 }
 0x33b   :  { %v377_v51 = vsub.f32 %v365_v37, %v376_v50 }
 0x33d   :  { %v378_v52 = vmul.f32 %v377_v51, %v377_v51 }
 0x33f   :  { %v379_v53 = vsel %vm120_vm1, %v378_v52, 0.0 }
 0x340   :  { %380 = vadd.xlane.f32.xlu2 %v379_v53  ;;  %v580_v53 = vld [vmem:[#allocation4 + $0x4] sm:$0xf] }
 0x3b3   :  { %v381_v56 = vpop.xlane.xlu2 %380 }
 0x3b4   :  { %v382_v57 = vmul.f32 %v381_v56, %v1126_v48 }
 0x3b6   :  { %v383_v59 = vadd.f32 1e-05, %v382_v57 }
 0x3b8   :  { %900 = vrsqrt.f32 %v383_v59  ;;  %vm390_vm6 = vweird.f32 %v383_v59 }
 0x3be   :  { %v901_v60 = vpop.eup %900 }
 0x3bf   :  { %v385_v63 = vmul.f32 %v901_v60, %v383_v59  ;;  %vm391_vm5 = vweird.f32 %v901_v60 }
 0x3c0   :  { %vm392_vm7 = vmor %vm390_vm6, %vm391_vm5 }
 0x3c1   :  { %v386_v0 = vmul.f32 %v901_v60, %v385_v63 }
 0x3c3   :  { %v387_v2 = vmul.f32 0.5, %v386_v0 }
 0x3c5   :  { %v388_v4 = vsub.f32 1.5, %v387_v2 }
 0x3c7   :  { %v389_v5 = vmul.f32 %v901_v60, %v388_v4 }
 0x3c9   :  { %v393_v8 = vsel %vm392_vm7, %v901_v60, %v389_v5 }
 0x3ca   :  { %v394_v10 = vmul.f32 %v393_v8, %v377_v51 }
 0x3cc   :  { %v398_v11 = vmul.f32 %v1147_v6, %v394_v10 }
 0x3ce   :  { %v402_v12 = vadd.f32 %v1155_v9, %v398_v11 }
 0x3d0   :  { %v403_v13 = vpack.c.bf16 %v402_v12, %v402_v12 }
 0x3d2   :  { %830 = vmatmul.msk.bf16.vlgmr.msra.gmra.mxu1 %vm102_vm0, %v403_v13 }
 0x3d3   :  { %657 = vmatpush.bf16.msra.mxu1 %v1069_v29 }
 0x3e2   :  { %850 = vmatmul.msk.bf16.vlgmr.msrb.gmra.mxu1 %vm206_vm3, %v559_v14 }
 0x44f   :  { %v431_v29 = vpop.f32.mrf.mxu1 }
 0x450   :  { %v432_v19 = vadd.f32 %v1172_v18, %v431_v29 }
 0x452   :  { %v435_v20 = vmax.f32 %v432_v19, 0.0 }
 0x454   :  { %v436_v22 = vpack.c.bf16 %v435_v20, %v435_v20 }
 0x456   :  { %847 = vmatmul.msk.bf16.vlgmr.msra.gmra.mxu2 %vm464_vm8, %v436_v22 }
 0x457   :  { %v433_v23 = vpop.f32.mrf.mxu1  ;;  %674 = vmatpush.bf16.msra.mxu2 %v1091_v61 }
 0x45b   :  { %675 = vmatpush.bf16.msra.mxu2 %v1097_v62 }
 0x45f   :  { %v572_v24 = vpop.f32.mrf.mxu1 }
 0x460   :  { %v577_v26 = vmul.f32 %v572_v24, %v515_v16 }
 0x462   :  { %v578_v28 = vadd.f32 %v577_v26, %v576_v25 }
 0x466   :  { %851 = vmatmul.msk.bf16.vlgmr.msrb.gmra.mxu2 %vm102_vm0, %v582_v30 }
 0x467   :  { %v574_v31 = vpop.f32.mrf.mxu1 }
 0x4d9   :  { %v477_v61 = vpop.f32.mrf.mxu2 }
 0x4da   :  { %v478_v62 = vadd.f32 %v1184_v34, %v477_v61 }
 0x4dc   :  { %v1187_v35 = vadd.f32 %v478_v62, %v402_v12 }
 0x4de   :  { %v482_v36 = vsel %vm120_vm1, %v1187_v35, 0.0 }
 0x4df   :  { %483 = vadd.xlane.f32.xlu2 %v482_v36 }
 0x4e1   :  { %v479_v58 = vpop.f32.mrf.mxu2 }
 0x4e9   :  { %v595_v37 = vpop.f32.mrf.mxu2 }
 0x4ea   :  { %v599_v38 = vmax.f32 %v1103_v21, %v595_v37 }
 0x4ec   :  { %v600_v39 = vsub.f32 %v1103_v21, %v599_v38  ;;  %v603_v40 = vsub.f32 %v595_v37, %v599_v38 }
 0x4ee   :  { %v601_v41 = vmul.f32 1.442695, %v600_v39  ;;  %v604_v42 = vmul.f32 1.442695, %v603_v40 }
 0x4f0   :  { %902 = vpow2.f32 %v601_v41 }
 0x4f1   :  { %904 = vpow2.f32 %v604_v42  ;;  %v597_v43 = vpop.f32.mrf.mxu2 }
 0x4f6   :  { %v903_v44 = vpop.eup %902 }
 0x4f7   :  { %v905_v45 = vpop.eup %904  ;;  %v606_v46 = vmul.f32 %v903_v44, %v1112_v32  ;;  %v608_v47 = vpack.c.bf16 %v903_v44, %v903_v44 }
 0x4f8   :  { %v625_v49 = vpack.c.bf16 %v905_v45, %v905_v45 }
 0x4f9   :  { %v607_v50 = vadd.f32 %v905_v45, %v606_v46  ;;  %852 = vmatmul.msk.bf16.vlgmr.msra.gmra.mxu3 %vm206_vm3, %v608_v47 }
 0x4fa   :  { %853 = vmatmul.msk.bf16.vlgmr.msra.gmra.mxu0 %vm206_vm3, %v625_v49 }
 0x4fb   :  { %906 = vrcp.f32 %v607_v50 }
 0x501   :  { %v907_v51 = vpop.eup %906 }
 0x502   :  { %v646_v21 = vpack.c.bf16 %v907_v51, %v907_v51 }
 0x504   :  { %854 = vmatmul.msk.bf16.vlgmr.msra.gmra.mxu1 %vm206_vm3, %v646_v21 }
 0x552   :  { %v484_v58 = vpop.xlane.xlu2 %483 }
 0x553   :  { %v485_v38 = vmul.f32 %v484_v58, %v1126_v48 }
 0x577   :  { %v638_v52 = vpop.f32.mrf.mxu0 }
 0x578   :  { %v643_v55 = vmul.f32 %v638_v52, %v580_v53 }
 0x57c   :  { %v621_v54 = vpop.f32.mrf.mxu3 }
 0x57d   :  { %v642_v56 = vmul.f32 %v621_v54, %v578_v28 }
 0x57f   :  { %v640_v57 = vpop.f32.mrf.mxu0  ;;  %v644_v59 = vadd.f32 %v643_v55, %v642_v56  ;;  %v882_v55 = vld [vmem:[%s1246_s13] ss:$0 sm:$0xff]  ;;  %s943_s13 = smov [#allocation5]  }
 0x581   :  { %v659_v32 = vpop.f32.mrf.mxu1 }
 0x582   :  { %v663_v60 = vmul.f32 %v659_v32, %v644_v59  ;;  %v883_v59 = vld [vmem:[%s1247_s14] ss:$0 sm:$0xff]  ;;  %s773_s14 = sshll.u32 %s943_s13, 4  ;;  %s774_s14 = int_to_ptr.vmem [resolvable:$true] %s773_s14 }
 0x584   :  { %v664_v63 = vpack.c.bf16 %v663_v60, %v663_v60  ;;  %v623_v0 = vpop.f32.mrf.mxu3 }
 0x586   :  { %855 = vmatmul.msk.bf16.vlgmr.msra.gmra.mxu2 %vm102_vm0, %v664_v63 }
 0x589   :  { %v661_v1 = vpop.f32.mrf.mxu1 }
 0x609   :  { %v677_v2 = vpop.f32.mrf.mxu2 }
 0x60a   :  { %v678_v4 = vadd.f32 %v1117_v33, %v677_v2 }
 0x60c   :  { %v682_v5 = vadd.f32 %v856_v3, %v678_v4 }
 0x60e   :  { %v683_v7 = vsel %vm120_vm1, %v682_v5, 0.0 }
 0x60f   :  { %684 = vadd.xlane.f32.xlu0 %v683_v7 }
 0x611   :  { %v679_v8 = vpop.f32.mrf.mxu2 }
 0x682   :  { %v685_v10 = vpop.xlane.xlu0 %684 }
 0x683   :  { %v686_v11 = vmul.f32 %v685_v10, %v1126_v48 }
 0x685   :  { %v687_v12 = vsub.f32 %v682_v5, %v686_v11 }
 0x687   :  { %v688_v13 = vmul.f32 %v687_v12, %v687_v12 }
 0x689   :  { %v689_v14 = vsel %vm120_vm1, %v688_v13, 0.0 }
 0x68a   :  { %690 = vadd.xlane.f32.xlu1 %v689_v14 }
 0x6fd   :  { %v691_v17 = vpop.xlane.xlu1 %690 }
 0x6fe   :  { %v692_v29 = vmul.f32 %v691_v17, %v1126_v48 }
 0x700   :  { %v693_v19 = vadd.f32 1e-05, %v692_v29 }
 0x702   :  { %908 = vrsqrt.f32 %v693_v19  ;;  %vm700_vm10 = vweird.f32 %v693_v19 }
 0x708   :  { %v909_v20 = vpop.eup %908 }
 0x709   :  { %v695_v33 = vmul.f32 %v909_v20, %v693_v19  ;;  %vm701_vm9 = vweird.f32 %v909_v20 }
 0x70a   :  { %vm702_vm11 = vmor %vm700_vm10, %vm701_vm9 }
 0x70b   :  { %v696_v22 = vmul.f32 %v909_v20, %v695_v33 }
 0x70d   :  { %v697_v23 = vmul.f32 0.5, %v696_v22 }
 0x70f   :  { %v698_v15 = vsub.f32 1.5, %v697_v23 }
 0x711   :  { %v699_v16 = vmul.f32 %v909_v20, %v698_v15 }
 0x713   :  { %v703_v24 = vsel %vm702_vm11, %v909_v20, %v699_v16 }
 0x714   :  { %v704_v25 = vmul.f32 %v703_v24, %v687_v12 }
 0x716   :  { %v705_v26 = vmul.f32 %v1147_v6, %v704_v25 }
 0x718   :  { %v706_v27 = vadd.f32 %v1155_v9, %v705_v26  ;;  %v486_v9 = vsub.f32 %v1187_v35, %v485_v38 }
 0x71a   :  { %v707_v28 = vpack.c.bf16 %v706_v27, %v706_v27  ;;  %v487_v42 = vmul.f32 %v486_v9, %v486_v9 }
 0x71c   :  { %857 = vmatmul.msk.bf16.vlgmr.msrb.gmra.mxu3 %vm102_vm0, %v707_v28 }
 0x79f   :  { %v720_v30 = vpop.f32.mrf.mxu3 }
 0x7a0   :  { %v721_v31 = vadd.f32 %v1172_v18, %v720_v30  ;;  %v488_v18 = vsel %vm120_vm1, %v487_v42, 0.0 }
 0x7a2   :  { %v724_v61 = vmax.f32 %v721_v31, 0.0 }
 0x7a4   :  { %v725_v62 = vpack.c.bf16 %v724_v61, %v724_v61 }
 0x7a6   :  { %858 = vmatmul.msk.bf16.vlgmr.msrb.gmra.mxu0 %vm464_vm8, %v725_v62 }
 0x7a7   :  { %v722_v36 = vpop.f32.mrf.mxu3 }
 0x823   :  { %v738_v37 = vpop.f32.mrf.mxu0 }
 0x824   :  { %v739_v39 = vadd.f32 %v1184_v34, %v738_v37 }
 0x826   :  { %v742_v6 = vadd.f32 %v739_v39, %v706_v27 }
 0x828   :  { %v743_v40 = vsel %vm120_vm1, %v742_v6, 0.0 }
 0x829   :  { %744 = vadd.xlane.f32.xlu2 %v743_v40 }
 0x82b   :  { %v740_v41 = vpop.f32.mrf.mxu0 }
 0x831   :  { %489 = vadd.xlane.f32.xlu2 %v488_v18 }
 0x89c   :  { %v745_v43 = vpop.xlane.xlu2 %744 }
 0x89d   :  { %v746_v44 = vmul.f32 %v745_v43, %v1126_v48 }
 0x89f   :  { %v747_v45 = vsub.f32 %v742_v6, %v746_v44 }
 0x8a1   :  { %v748_v46 = vmul.f32 %v747_v45, %v747_v45 }
 0x8a3   :  { %v749_v47 = vsel %vm120_vm1, %v748_v46, 0.0 }
 0x8a4   :  { %750 = vadd.xlane.f32.xlu2 %v749_v47  ;;  %v490_v34 = vpop.xlane.xlu2 %489 }
 0x8a5   :  { %v491_v49 = vmul.f32 %v490_v34, %v1126_v48 }
 0x8a7   :  { %v492_v35 = vadd.f32 1e-05, %v491_v49 }
 0x8a9   :  { %910 = vrsqrt.f32 %v492_v35  ;;  %vm499_vm13 = vweird.f32 %v492_v35 }
 0x8af   :  { %v911_v50 = vpop.eup %910 }
 0x8b0   :  { %v494_v51 = vmul.f32 %v911_v50, %v492_v35  ;;  %vm500_vm12 = vweird.f32 %v911_v50 }
 0x8b1   :  { %vm501_vm14 = vmor %vm499_vm13, %vm500_vm12 }
 0x8b2   :  { %v495_v21 = vmul.f32 %v911_v50, %v494_v51 }
 0x8b4   :  { %v496_v52 = vmul.f32 0.5, %v495_v21 }
 0x8b6   :  { %v497_v53 = vsub.f32 1.5, %v496_v52 }
 0x8b8   :  { %v498_v54 = vmul.f32 %v911_v50, %v497_v53 }
 0x8ba   :  { %v502_v56 = vsel %vm501_vm14, %v911_v50, %v498_v54 }
 0x8bb   :  { %v503_v57 = vmul.f32 %v502_v56, %v486_v9 }
 0x8bd   :  { %v507_v32 = vmul.f32 %v882_v55, %v503_v57 }
 0x8bf   :  { %v511_v60 = vadd.f32 %v883_v59, %v507_v32 }
 0x8c1   :  { %512 = vst.msk [vmem:[#allocation5] sm:$0xf] %vm120_vm1, %v511_v60 }
 0x917   :  { %v751_v63 = vpop.xlane.xlu2 %750 }
 0x918   :  { %v752_v0 = vmul.f32 %v751_v63, %v1126_v48 }
 0x91a   :  { %v753_v1 = vadd.f32 1e-05, %v752_v0 }
 0x91c   :  { %912 = vrsqrt.f32 %v753_v1  ;;  %vm760_vm0 = vweird.f32 %v753_v1 }
 0x922   :  { %v913_v2 = vpop.eup %912 }
 0x923   :  { %v755_v3 = vmul.f32 %v913_v2, %v753_v1  ;;  %vm761_vm15 = vweird.f32 %v913_v2 }
 0x924   :  { %vm762_vm2 = vmor %vm760_vm0, %vm761_vm15 }
 0x925   :  { %v756_v4 = vmul.f32 %v913_v2, %v755_v3 }
 0x927   :  { %v757_v5 = vmul.f32 0.5, %v756_v4 }
 0x929   :  { %v758_v7 = vsub.f32 1.5, %v757_v5 }
 0x92b   :  { %v759_v8 = vmul.f32 %v913_v2, %v758_v7 }
 0x92d   :  { %v763_v10 = vsel %vm762_vm2, %v913_v2, %v759_v8 }
 0x92e   :  { %v764_v11 = vmul.f32 %v763_v10, %v747_v45 }
 0x930   :  { %v765_v48 = vmul.f32 %v882_v55, %v764_v11 }
 0x932   :  { %v766_v12 = vadd.f32 %v883_v59, %v765_v48 }
 0x934   :  { %768 = vst.msk [vmem:[#allocation5 + $0x4] sm:$0xf] %vm120_vm1, %v766_v12 }
 0x935   :  { %781 = dma.vmem_to_hbm [thread:$0]  %s774_s14, 128, %s776_s24, [#allocation6], %s940_s27, %s940_s27, %s944_s25  }
 0x936   :  { %938 = dma.done.wait [#allocation6], 128  }
 0x937   :  { %939 = vsyncadd [#allocation6], 4294967168 }
 0x938   :  { %786 = vsyncpa [#allocation6], 1 }

// kernel: vision_transformer_forward.4
= control target key start
LH: loop header
LB: loop body
LE: loop exit
PB: predicated region body
PF: predicated region fallthrough
CT: control target
= control target key end

     0   :  { %vm101_vm0 = vcmask 261120   ;;  %vm119_vm1 = vcmask 257024   ;;  %s898_s27 = smov 64   ;;  %s899_s28 = smov 96   ;;  %vm209_vm2 = vcmask 1041408   ;;  %vm205_vm3 = vcmask 31744   ;;  %s1188_s1 = inlined_call_operand.vmem [shape: bf16[32,96], index: 1, kind: input, shape index: {}]   ;;  %s1189_s0 = inlined_call_operand.vmem [shape: f32[2,4,32], index: 0, kind: input, shape index: {}]   ;;  %s1190_s2 = inlined_call_operand.vmem [shape: f32[1,96], index: 2, kind: input, shape index: {}]   ;;  %s1191_s5 = inlined_call_operand.vmem [shape: bf16[32,4], index: 5, kind: input, shape index: {}]   ;;  %s1192_s6 = inlined_call_operand.vmem [shape: bf16[4,32], index: 6, kind: input, shape index: {}]   ;;  %s1193_s4 = inlined_call_operand.vmem [shape: f32[1,32], index: 4, kind: input, shape index: {}]   ;;  %s1194_s3 = inlined_call_operand.vmem [shape: bf16[32,32], index: 3, kind: input, shape index: {}]   ;;  %s1195_s7 = inlined_call_operand.vmem [shape: f32[1,32], index: 7, kind: input, shape index: {}]   ;;  %s1196_s8 = inlined_call_operand.vmem [shape: f32[1,32], index: 8, kind: input, shape index: {}]   ;;  %s1197_s10 = inlined_call_operand.vmem [shape: f32[1,64], index: 10, kind: input, shape index: {}]   ;;  %s1198_s9 = inlined_call_operand.vmem [shape: bf16[32,64], index: 9, kind: input, shape index: {}]   ;;  %s1199_s11 = inlined_call_operand.vmem [shape: bf16[64,32], index: 11, kind: input, shape index: {}]   ;;  %s1200_s12 = inlined_call_operand.vmem [shape: f32[1,32], index: 12, kind: input, shape index: {}]   ;;  %s1201_s13 = inlined_call_operand.vmem [shape: f32[1,32], index: 13, kind: input, shape index: {}]   ;;  %s1202_s14 = inlined_call_operand.vmem [shape: f32[1,32], index: 14, kind: input, shape index: {}]   ;;  %s1203_s15 = inlined_call_operand.vmem [shape: f32[2,4,32], index: 15, kind: output, shape index: {}]  }
   0x1   :  { %v846_v0 = vld [vmem:[%s1188_s1 + $0x8] sm:$0xff]  ;;  %v845_v1 = vld [vmem:[%s1188_s1] sm:$0xff]  ;;  %vm463_vm8 = vcmask 523264  }
   0x2   :  { %111 = vmatpush.bf16.msra.mxu0 %v846_v0  ;;  %v84_v2 = vld [vmem:[%s1189_s0] sm:$0xf]  ;;  %142 = vmatpush.bf16.msra.mxu1 %v846_v0  ;;  %v781_v3 = vld [vmem:[%s1189_s0 + $0x4] sm:$0xf]  ;;  %v1003_v15 = vld [vmem:[%s1191_s5 + $0x8] sm:$0xff] }
   0x3   :  { %v85_v4 = vpack.c.bf16 %v84_v2, %v84_v2  ;;  %v132_v5 = vpack.c.bf16 %v781_v3, %v781_v3  ;;  %v860_v6 = vld [vmem:[%s1190_s2] ss:$0 sm:$0xff]  ;;  %189 = vmatpush.bf16.msra.mxu2 %v1003_v15  ;;  %v1045_v61 = vld [vmem:[%s1194_s3 + $0x8] sm:$0xff] }
   0x4   :  { %v1010_v16 = vld [vmem:[%s1191_s5] sm:$0xff] }
   0x5   :  { %v65_v28 = vld [vmem:[%s1192_s6] sm:$0x3] }
   0x6   :  { %112 = vmatpush.bf16.msra.mxu0 %v845_v1  ;;  %143 = vmatpush.bf16.msra.mxu1 %v845_v1  ;;  %v1023_v29 = vsel %vm209_vm2, %v65_v28, 0  ;;  %v1051_v62 = vld [vmem:[%s1194_s3] sm:$0xff] }
   0x7   :  { %190 = vmatpush.bf16.msra.mxu2 %v1010_v16  ;;  %220 = vmatpush.bf16.msra.mxu3 %v1023_v29 }
   0x9   :  { %780 = vmatmul.msk.bf16.vlgmr.msra.gmra.mxu0 %vm101_vm0, %v85_v4  ;;  %782 = vmatmul.msk.bf16.vlgmr.msra.gmra.mxu1 %vm101_vm0, %v132_v5 }
   0xa   :  { %259 = vmatpush.bf16.msrb.mxu0 %v1003_v15  ;;  %286 = vmatpush.bf16.msrb.mxu1 %v1023_v29 }
   0xb   :  { %237 = vmatpush.bf16.msrb.mxu3 %v1023_v29  ;;  %303 = vmatpush.bf16.msrb.mxu2 %v1023_v29 }
   0xe   :  { %260 = vmatpush.bf16.msrb.mxu0 %v1010_v16 }
  0x12   :  { %356 = vmatpush.bf16.msra.mxu0 %v1045_v61 }
  0x16   :  { %357 = vmatpush.bf16.msra.mxu0 %v1051_v62 }
  0x86   :  { %v114_v7 = vpop.f32.mrf.mxu0  ;;  %v145_v8 = vpop.f32.mrf.mxu1 }
  0x87   :  { %v115_v9 = vadd.f32 %v860_v6, %v114_v7  ;;  %v146_v10 = vadd.f32 %v860_v6, %v145_v8 }
  0x89   :  { %v118_v11 = vmul.f32 0.35355338, %v115_v9  ;;  %126 = vrot.lane.b32.xlu1 %v115_v9, %s898_s27  ;;  %122 = vrot.lane.b32.xlu0 %v115_v9, %s899_s28  ;;  %v149_v12 = vmul.f32 0.35355338, %v146_v10 }
  0x8b   :  { %120 = vst.msk [vmem:[#allocation2] sm:$0xf] %vm119_vm1, %v118_v11 }
  0x8c   :  { %151 = vst.msk [vmem:[#allocation2 + $0x4] sm:$0xf] %vm119_vm1, %v149_v12 }
  0x8e   :  { %v116_v13 = vpop.f32.mrf.mxu0  ;;  %v147_v14 = vpop.f32.mrf.mxu1 }
  0x91   :  { %153 = vrot.lane.b32.xlu0 %v146_v10, %s899_s28  ;;  %158 = vrot.lane.b32.xlu1 %v146_v10, %s898_s27 }
  0x92   :  { %v163_v21 = vld [vmem:[#allocation2] sm:$0xf] }
  0x93   :  { %v1038_v58 = vld [vmem:[#allocation2 + $0x4] sm:$0xf] }
  0xfb   :  { %v127_v17 = vpop.permute.xlu1 %126  ;;  %v123_v18 = vpop.permute.xlu0 %122 }
  0xfc   :  { %129 = vst.msk [vmem:[#allocation4] sm:$0xf] %vm119_vm1, %v127_v17 }
  0xfd   :  { %125 = vst.msk [vmem:[#allocation3] sm:$0xf] %vm119_vm1, %v123_v18 }
 0x103   :  { %v154_v19 = vpop.permute.xlu0 %153  ;;  %v159_v20 = vpop.permute.xlu1 %158  ;;  %v165_v6 = vld [vmem:[#allocation4] sm:$0xf] }
 0x104   :  { %157 = vst.msk [vmem:[#allocation3 + $0x4] sm:$0xf] %vm119_vm1, %v154_v19  ;;  %v164_v22 = vld [vmem:[#allocation3] sm:$0xf] }
 0x105   :  { %v166_v23 = vmul.f32 %v164_v22, %v163_v21  ;;  %162 = vst.msk [vmem:[#allocation4 + $0x4] sm:$0xf] %vm119_vm1, %v159_v20  ;;  %v513_v57 = vld [vmem:[#allocation3] sm:$0xf] }
 0x106   :  { %v515_v59 = vmul.f32 %v513_v57, %v1038_v58 }
 0x107   :  { %v167_v24 = vpack.c.bf16 %v166_v23, %v166_v23 }
 0x108   :  { %v516_v60 = vpack.c.bf16 %v515_v59, %v515_v59 }
 0x109   :  { %791 = vmatmul.msk.bf16.vlgmr.msra.gmra.mxu2 %vm101_vm0, %v167_v24 }
 0x10b   :  { %v246_v25 = vld [vmem:[#allocation3 + $0x4] sm:$0xf] }
 0x10c   :  { %v248_v26 = vmul.f32 %v246_v25, %v163_v21  ;;  %v247_v12 = vld [vmem:[#allocation4 + $0x4] sm:$0xf] }
 0x10e   :  { %v249_v27 = vpack.c.bf16 %v248_v26, %v248_v26 }
 0x110   :  { %794 = vmatmul.msk.bf16.vlgmr.msrb.gmra.mxu0 %vm101_vm0, %v249_v27 }
 0x111   :  { %552 = vmatpush.bf16.msrb.mxu0 %v1023_v29 }
 0x18c   :  { %v192_v30 = vpop.f32.mrf.mxu2 }
 0x18d   :  { %v196_v31 = vsub.f32 -inf, %v192_v30  ;;  %v262_v32 = vpop.f32.mrf.mxu0  ;;  %v199_v39 = vsub.f32 %v192_v30, %v192_v30 }
 0x18e   :  { %v266_v33 = vmax.f32 %v192_v30, %v262_v32 }
 0x18f   :  { %v197_v34 = vmul.f32 1.442695, %v196_v31  ;;  %v200_v43 = vmul.f32 1.442695, %v199_v39 }
 0x190   :  { %v267_v35 = vsub.f32 %v192_v30, %v266_v33  ;;  %v270_v36 = vsub.f32 %v262_v32, %v266_v33  ;;  %v1071_v33 = vld [vmem:[%s1193_s4] ss:$0 sm:$0xff] }
 0x191   :  { %868 = vpow2.f32 %v197_v34 }
 0x192   :  { %v268_v37 = vmul.f32 1.442695, %v267_v35  ;;  %v271_v38 = vmul.f32 1.442695, %v270_v36  ;;  %v363_v35 = vld [vmem:[%s1189_s0] sm:$0xf] }
 0x194   :  { %870 = vpow2.f32 %v268_v37  ;;  %v194_v40 = vpop.f32.mrf.mxu2 }
 0x195   :  { %872 = vpow2.f32 %v271_v38  ;;  %v264_v41 = vpop.f32.mrf.mxu0 }
 0x196   :  { %874 = vpow2.f32 %v200_v43 }
 0x197   :  { %v869_v42 = vpop.eup %868 }
 0x198   :  { %v204_v44 = vpack.c.bf16 %v869_v42, %v869_v42  ;;  %v202_v49 = vmul.f32 0.0, %v869_v42  ;;  %v900_v42 = vmov 32.0  }
 0x19a   :  { %v871_v45 = vpop.eup %870  ;;  %792 = vmatmul.msk.bf16.vlgmr.msra.gmra.mxu3 %vm205_vm3, %v204_v44 }
 0x19b   :  { %v873_v46 = vpop.eup %872  ;;  %v275_v47 = vpack.c.bf16 %v871_v45, %v871_v45  ;;  %324 = vmatpush.bf16.msra.mxu3 %v1023_v29 }
 0x19c   :  { %v292_v48 = vpack.c.bf16 %v873_v46, %v873_v46  ;;  %v875_v50 = vpop.eup %874 }
 0x19d   :  { %795 = vmatmul.msk.bf16.vlgmr.msrb.gmra.mxu1 %vm205_vm3, %v275_v47  ;;  %v203_v51 = vadd.f32 %v875_v50, %v202_v49  ;;  %v226_v53 = vpack.c.bf16 %v875_v50, %v875_v50 }
 0x19e   :  { %796 = vmatmul.msk.bf16.vlgmr.msrb.gmra.mxu2 %vm205_vm3, %v292_v48 }
 0x19f   :  { %v273_v52 = vmul.f32 %v871_v45, %v203_v51 }
 0x1a1   :  { %v274_v54 = vadd.f32 %v873_v46, %v273_v52 }
 0x1a3   :  { %876 = vrcp.f32 %v274_v54  ;;  %v852_v54 = vld [vmem:[%s1198_s9 + $0x8] sm:$0xff] }
 0x1a4   :  { %427 = vmatpush.bf16.msra.mxu1 %v852_v54 }
 0x1a9   :  { %v877_v55 = vpop.eup %876 }
 0x1aa   :  { %793 = vmatmul.msk.bf16.vlgmr.msrb.gmra.mxu3 %vm205_vm3, %v226_v53  ;;  %v313_v56 = vpack.c.bf16 %v877_v55, %v877_v55  ;;  %v851_v55 = vld [vmem:[%s1198_s9] sm:$0xff] }
 0x1ab   :  { %526 = vmatpush.bf16.msrb.mxu3 %v1003_v15  ;;  %428 = vmatpush.bf16.msra.mxu1 %v851_v55 }
 0x1af   :  { %527 = vmatpush.bf16.msrb.mxu3 %v1010_v16  ;;  %569 = vmatpush.bf16.msrb.mxu1 %v1023_v29 }
 0x1ba   :  { %797 = vmatmul.msk.bf16.vlgmr.msra.gmra.mxu3 %vm205_vm3, %v313_v56 }
 0x1bb   :  { %618 = vmatpush.bf16.msra.mxu3 %v1023_v29 }
 0x1ca   :  { %833 = vmatmul.msk.bf16.vlgmr.msrb.gmra.mxu3 %vm101_vm0, %v516_v60 }
 0x1cb   :  { %716 = vmatpush.bf16.msrb.mxu3 %v852_v54 }
 0x1cf   :  { %717 = vmatpush.bf16.msrb.mxu3 %v851_v55 }
 0x21a   :  { %v288_v63 = vpop.f32.mrf.mxu1 }
 0x21d   :  { %v222_v0 = vpop.f32.mrf.mxu3 }
 0x21e   :  { %v243_v8 = vmul.f32 0.0, %v222_v0 }
 0x221   :  { %v305_v1 = vpop.f32.mrf.mxu2 }
 0x222   :  { %v290_v2 = vpop.f32.mrf.mxu1  ;;  %v310_v13 = vmul.f32 %v305_v1, %v247_v12  ;;  %v856_v1 = vld [vmem:[%s1199_s11 + $0x18] sm:$0xff] }
 0x223   :  { %471 = vmatpush.bf16.msra.mxu2 %v856_v1 }
 0x225   :  { %v224_v3 = vpop.f32.mrf.mxu3 }
 0x226   :  { %v855_v3 = vld [vmem:[%s1199_s11 + $0x10] sm:$0xff] }
 0x227   :  { %472 = vmatpush.bf16.msra.mxu2 %v855_v3 }
 0x229   :  { %v307_v4 = vpop.f32.mrf.mxu2 }
 0x22d   :  { %v239_v5 = vpop.f32.mrf.mxu3 }
 0x22e   :  { %v244_v7 = vmul.f32 %v239_v5, %v165_v6  ;;  %v1101_v6 = vld [vmem:[%s1195_s7] ss:$0 sm:$0xff] }
 0x230   :  { %v245_v9 = vadd.f32 %v244_v7, %v243_v8  ;;  %v854_v7 = vld [vmem:[%s1199_s11 + $0x8] sm:$0xff] }
 0x231   :  { %473 = vmatpush.bf16.msra.mxu2 %v854_v7 }
 0x232   :  { %v309_v11 = vmul.f32 %v288_v63, %v245_v9  ;;  %v1109_v9 = vld [vmem:[%s1196_s8] ss:$0 sm:$0xff] }
 0x234   :  { %v311_v14 = vadd.f32 %v310_v13, %v309_v11 }
 0x235   :  { %v241_v10 = vpop.f32.mrf.mxu3 }
 0x23d   :  { %v326_v17 = vpop.f32.mrf.mxu3 }
 0x23e   :  { %v330_v18 = vmul.f32 %v326_v17, %v311_v14  ;;  %v853_v17 = vld [vmem:[%s1199_s11] sm:$0xff] }
 0x23f   :  { %474 = vmatpush.bf16.msra.mxu2 %v853_v17 }
 0x240   :  { %v331_v19 = vpack.c.bf16 %v330_v18, %v330_v18  ;;  %v1126_v18 = vld [vmem:[%s1197_s10] ss:$0 sm:$0xff] }
 0x242   :  { %806 = vmatmul.msk.bf16.vlgmr.msra.gmra.mxu0 %vm101_vm0, %v331_v19 }
 0x243   :  { %635 = vmatpush.bf16.msra.mxu0 %v1023_v29  ;;  %591 = vmatpush.bf16.msrb.mxu2 %v1003_v15  ;;  %v578_v15 = vld [vmem:[#allocation3 + $0x4] sm:$0xf] }
 0x245   :  { %v328_v20 = vpop.f32.mrf.mxu3 }
 0x247   :  { %592 = vmatpush.bf16.msrb.mxu2 %v1010_v16  ;;  %v514_v16 = vld [vmem:[#allocation4] sm:$0xf] }
 0x24d   :  { %v1057_v21 = vpop.f32.mrf.mxu3 }
 0x24e   :  { %v533_v22 = vsub.f32 -inf, %v1057_v21  ;;  %v536_v23 = vsub.f32 %v1057_v21, %v1057_v21 }
 0x250   :  { %v534_v24 = vmul.f32 1.442695, %v533_v22  ;;  %v537_v25 = vmul.f32 1.442695, %v536_v23 }
 0x252   :  { %878 = vpow2.f32 %v534_v24 }
 0x253   :  { %880 = vpow2.f32 %v537_v25 }
 0x254   :  { %882 = vrcp.f32 %v900_v42 }
 0x255   :  { %v531_v26 = vpop.f32.mrf.mxu3 }
 0x258   :  { %v879_v27 = vpop.eup %878 }
 0x259   :  { %v539_v28 = vmul.f32 0.0, %v879_v27  ;;  %v541_v30 = vpack.c.bf16 %v879_v27, %v879_v27  ;;  %v1062_v31 = vpop.eup %880  ;;  %v580_v27 = vmul.f32 %v578_v15, %v1038_v58 }
 0x25a   :  { %v883_v43 = vpop.eup %882  ;;  %v558_v14 = vpack.c.bf16 %v1062_v31, %v1062_v31 }
 0x25b   :  { %834 = vmatmul.msk.bf16.vlgmr.msrb.gmra.mxu0 %vm205_vm3, %v541_v30  ;;  %v1066_v32 = vadd.f32 %v1062_v31, %v539_v28  ;;  %v369_v44 = vmul.f32 32.0, %v883_v43  ;;  %vm373_vm4 = vweird.f32 %v883_v43  ;;  %v581_v30 = vpack.c.bf16 %v580_v27, %v580_v27 }
 0x25c   :  { %732 = vmatpush.bf16.msrb.mxu0 %v856_v1 }
 0x25d   :  { %v370_v45 = vsub.f32 1.0, %v369_v44 }
 0x25f   :  { %v371_v46 = vmul.f32 %v883_v43, %v370_v45 }
 0x260   :  { %733 = vmatpush.bf16.msrb.mxu0 %v855_v3  ;;  %v841_v3 = vld [vmem:[%s1189_s0 + $0x4] sm:$0xf] }
 0x261   :  { %v372_v47 = vadd.f32 %v883_v43, %v371_v46 }
 0x263   :  { %v1080_v48 = vsel %vm373_vm4, %v883_v43, %v372_v47 }
 0x264   :  { %734 = vmatpush.bf16.msrb.mxu0 %v854_v7 }
 0x268   :  { %735 = vmatpush.bf16.msrb.mxu0 %v853_v17 }
 0x2bf   :  { %v359_v34 = vpop.f32.mrf.mxu0 }
 0x2c0   :  { %v360_v36 = vadd.f32 %v1071_v33, %v359_v34  ;;  %v1138_v34 = vld [vmem:[%s1200_s12] ss:$0 sm:$0xff] }
 0x2c2   :  { %v364_v37 = vadd.f32 %v363_v35, %v360_v36 }
 0x2c4   :  { %v365_v38 = vsel %vm119_vm1, %v364_v37, 0.0 }
 0x2c5   :  { %366 = vadd.xlane.f32.xlu2 %v365_v38 }
 0x2c7   :  { %v361_v39 = vpop.f32.mrf.mxu0 }
 0x2d8   :  { %v1078_v40 = vpop.f32.mrf.mxu0 }
 0x2d9   :  { %v575_v25 = vmul.f32 0.0, %v1078_v40 }
 0x2e0   :  { %v556_v41 = vpop.f32.mrf.mxu0 }
 0x338   :  { %v367_v49 = vpop.xlane.xlu2 %366 }
 0x339   :  { %v375_v50 = vmul.f32 %v1080_v48, %v367_v49 }
 0x33b   :  { %v376_v51 = vsub.f32 %v364_v37, %v375_v50 }
 0x33d   :  { %v377_v52 = vmul.f32 %v376_v51, %v376_v51 }
 0x33f   :  { %v378_v53 = vsel %vm119_vm1, %v377_v52, 0.0 }
 0x340   :  { %379 = vadd.xlane.f32.xlu2 %v378_v53  ;;  %v579_v53 = vld [vmem:[#allocation4 + $0x4] sm:$0xf] }
 0x3b3   :  { %v380_v56 = vpop.xlane.xlu2 %379 }
 0x3b4   :  { %v381_v57 = vmul.f32 %v380_v56, %v1080_v48 }
 0x3b6   :  { %v382_v59 = vadd.f32 1e-05, %v381_v57 }
 0x3b8   :  { %884 = vrsqrt.f32 %v382_v59  ;;  %vm389_vm6 = vweird.f32 %v382_v59 }
 0x3be   :  { %v885_v60 = vpop.eup %884 }
 0x3bf   :  { %v384_v63 = vmul.f32 %v885_v60, %v382_v59  ;;  %vm390_vm5 = vweird.f32 %v885_v60 }
 0x3c0   :  { %vm391_vm7 = vmor %vm389_vm6, %vm390_vm5 }
 0x3c1   :  { %v385_v0 = vmul.f32 %v885_v60, %v384_v63 }
 0x3c3   :  { %v386_v2 = vmul.f32 0.5, %v385_v0 }
 0x3c5   :  { %v387_v4 = vsub.f32 1.5, %v386_v2 }
 0x3c7   :  { %v388_v5 = vmul.f32 %v885_v60, %v387_v4 }
 0x3c9   :  { %v392_v8 = vsel %vm391_vm7, %v885_v60, %v388_v5 }
 0x3ca   :  { %v393_v10 = vmul.f32 %v392_v8, %v376_v51 }
 0x3cc   :  { %v397_v11 = vmul.f32 %v1101_v6, %v393_v10 }
 0x3ce   :  { %v401_v12 = vadd.f32 %v1109_v9, %v397_v11 }
 0x3d0   :  { %v402_v13 = vpack.c.bf16 %v401_v12, %v401_v12 }
 0x3d2   :  { %815 = vmatmul.msk.bf16.vlgmr.msra.gmra.mxu1 %vm101_vm0, %v402_v13 }
 0x3d3   :  { %656 = vmatpush.bf16.msra.mxu1 %v1023_v29 }
 0x3e2   :  { %835 = vmatmul.msk.bf16.vlgmr.msrb.gmra.mxu1 %vm205_vm3, %v558_v14 }
 0x44f   :  { %v430_v29 = vpop.f32.mrf.mxu1 }
 0x450   :  { %v431_v19 = vadd.f32 %v1126_v18, %v430_v29 }
 0x452   :  { %v434_v20 = vmax.f32 %v431_v19, 0.0 }
 0x454   :  { %v435_v22 = vpack.c.bf16 %v434_v20, %v434_v20 }
 0x456   :  { %832 = vmatmul.msk.bf16.vlgmr.msra.gmra.mxu2 %vm463_vm8, %v435_v22 }
 0x457   :  { %v432_v23 = vpop.f32.mrf.mxu1  ;;  %673 = vmatpush.bf16.msra.mxu2 %v1045_v61 }
 0x45b   :  { %674 = vmatpush.bf16.msra.mxu2 %v1051_v62 }
 0x45f   :  { %v571_v24 = vpop.f32.mrf.mxu1 }
 0x460   :  { %v576_v26 = vmul.f32 %v571_v24, %v514_v16 }
 0x462   :  { %v577_v28 = vadd.f32 %v576_v26, %v575_v25 }
 0x466   :  { %836 = vmatmul.msk.bf16.vlgmr.msrb.gmra.mxu2 %vm101_vm0, %v581_v30 }
 0x467   :  { %v573_v31 = vpop.f32.mrf.mxu1 }
 0x4d9   :  { %v476_v61 = vpop.f32.mrf.mxu2 }
 0x4da   :  { %v477_v62 = vadd.f32 %v1138_v34, %v476_v61 }
 0x4dc   :  { %v1141_v35 = vadd.f32 %v477_v62, %v401_v12 }
 0x4de   :  { %v481_v36 = vsel %vm119_vm1, %v1141_v35, 0.0 }
 0x4df   :  { %482 = vadd.xlane.f32.xlu2 %v481_v36 }
 0x4e1   :  { %v478_v58 = vpop.f32.mrf.mxu2 }
 0x4e9   :  { %v594_v37 = vpop.f32.mrf.mxu2 }
 0x4ea   :  { %v598_v38 = vmax.f32 %v1057_v21, %v594_v37 }
 0x4ec   :  { %v599_v39 = vsub.f32 %v1057_v21, %v598_v38  ;;  %v602_v40 = vsub.f32 %v594_v37, %v598_v38 }
 0x4ee   :  { %v600_v41 = vmul.f32 1.442695, %v599_v39  ;;  %v603_v42 = vmul.f32 1.442695, %v602_v40 }
 0x4f0   :  { %886 = vpow2.f32 %v600_v41 }
 0x4f1   :  { %888 = vpow2.f32 %v603_v42  ;;  %v596_v43 = vpop.f32.mrf.mxu2 }
 0x4f6   :  { %v887_v44 = vpop.eup %886 }
 0x4f7   :  { %v889_v45 = vpop.eup %888  ;;  %v605_v46 = vmul.f32 %v887_v44, %v1066_v32  ;;  %v607_v47 = vpack.c.bf16 %v887_v44, %v887_v44 }
 0x4f8   :  { %v624_v49 = vpack.c.bf16 %v889_v45, %v889_v45 }
 0x4f9   :  { %v606_v50 = vadd.f32 %v889_v45, %v605_v46  ;;  %837 = vmatmul.msk.bf16.vlgmr.msra.gmra.mxu3 %vm205_vm3, %v607_v47 }
 0x4fa   :  { %838 = vmatmul.msk.bf16.vlgmr.msra.gmra.mxu0 %vm205_vm3, %v624_v49 }
 0x4fb   :  { %890 = vrcp.f32 %v606_v50 }
 0x501   :  { %v891_v51 = vpop.eup %890 }
 0x502   :  { %v645_v21 = vpack.c.bf16 %v891_v51, %v891_v51 }
 0x504   :  { %839 = vmatmul.msk.bf16.vlgmr.msra.gmra.mxu1 %vm205_vm3, %v645_v21 }
 0x552   :  { %v483_v58 = vpop.xlane.xlu2 %482 }
 0x553   :  { %v484_v38 = vmul.f32 %v483_v58, %v1080_v48 }
 0x577   :  { %v637_v52 = vpop.f32.mrf.mxu0 }
 0x578   :  { %v642_v55 = vmul.f32 %v637_v52, %v579_v53 }
 0x57c   :  { %v620_v54 = vpop.f32.mrf.mxu3 }
 0x57d   :  { %v641_v56 = vmul.f32 %v620_v54, %v577_v28 }
 0x57f   :  { %v639_v57 = vpop.f32.mrf.mxu0  ;;  %v643_v59 = vadd.f32 %v642_v55, %v641_v56  ;;  %v866_v55 = vld [vmem:[%s1201_s13] ss:$0 sm:$0xff] }
 0x580   :  { %v867_v57 = vld [vmem:[%s1202_s14] ss:$0 sm:$0xff] }
 0x581   :  { %v658_v32 = vpop.f32.mrf.mxu1 }
 0x582   :  { %v662_v60 = vmul.f32 %v658_v32, %v643_v59 }
 0x584   :  { %v663_v63 = vpack.c.bf16 %v662_v60, %v662_v60  ;;  %v622_v0 = vpop.f32.mrf.mxu3 }
 0x586   :  { %840 = vmatmul.msk.bf16.vlgmr.msra.gmra.mxu2 %vm101_vm0, %v663_v63 }
 0x589   :  { %v660_v1 = vpop.f32.mrf.mxu1 }
 0x609   :  { %v676_v2 = vpop.f32.mrf.mxu2 }
 0x60a   :  { %v677_v4 = vadd.f32 %v1071_v33, %v676_v2 }
 0x60c   :  { %v681_v5 = vadd.f32 %v841_v3, %v677_v4 }
 0x60e   :  { %v682_v7 = vsel %vm119_vm1, %v681_v5, 0.0 }
 0x60f   :  { %683 = vadd.xlane.f32.xlu0 %v682_v7 }
 0x611   :  { %v678_v8 = vpop.f32.mrf.mxu2 }
 0x682   :  { %v684_v10 = vpop.xlane.xlu0 %683 }
 0x683   :  { %v685_v11 = vmul.f32 %v684_v10, %v1080_v48 }
 0x685   :  { %v686_v12 = vsub.f32 %v681_v5, %v685_v11 }
 0x687   :  { %v687_v13 = vmul.f32 %v686_v12, %v686_v12 }
 0x689   :  { %v688_v14 = vsel %vm119_vm1, %v687_v13, 0.0 }
 0x68a   :  { %689 = vadd.xlane.f32.xlu1 %v688_v14 }
 0x6fd   :  { %v690_v17 = vpop.xlane.xlu1 %689 }
 0x6fe   :  { %v691_v29 = vmul.f32 %v690_v17, %v1080_v48 }
 0x700   :  { %v692_v19 = vadd.f32 1e-05, %v691_v29 }
 0x702   :  { %892 = vrsqrt.f32 %v692_v19  ;;  %vm699_vm10 = vweird.f32 %v692_v19 }
 0x708   :  { %v893_v20 = vpop.eup %892 }
 0x709   :  { %v694_v33 = vmul.f32 %v893_v20, %v692_v19  ;;  %vm700_vm9 = vweird.f32 %v893_v20 }
 0x70a   :  { %vm701_vm11 = vmor %vm699_vm10, %vm700_vm9 }
 0x70b   :  { %v695_v22 = vmul.f32 %v893_v20, %v694_v33 }
 0x70d   :  { %v696_v23 = vmul.f32 0.5, %v695_v22 }
 0x70f   :  { %v697_v15 = vsub.f32 1.5, %v696_v23 }
 0x711   :  { %v698_v16 = vmul.f32 %v893_v20, %v697_v15 }
 0x713   :  { %v702_v24 = vsel %vm701_vm11, %v893_v20, %v698_v16 }
 0x714   :  { %v703_v25 = vmul.f32 %v702_v24, %v686_v12 }
 0x716   :  { %v704_v26 = vmul.f32 %v1101_v6, %v703_v25 }
 0x718   :  { %v705_v27 = vadd.f32 %v1109_v9, %v704_v26  ;;  %v485_v9 = vsub.f32 %v1141_v35, %v484_v38 }
 0x71a   :  { %v706_v28 = vpack.c.bf16 %v705_v27, %v705_v27  ;;  %v486_v42 = vmul.f32 %v485_v9, %v485_v9 }
 0x71c   :  { %842 = vmatmul.msk.bf16.vlgmr.msrb.gmra.mxu3 %vm101_vm0, %v706_v28 }
 0x79f   :  { %v719_v30 = vpop.f32.mrf.mxu3 }
 0x7a0   :  { %v720_v31 = vadd.f32 %v1126_v18, %v719_v30  ;;  %v487_v18 = vsel %vm119_vm1, %v486_v42, 0.0 }
 0x7a2   :  { %v723_v61 = vmax.f32 %v720_v31, 0.0 }
 0x7a4   :  { %v724_v62 = vpack.c.bf16 %v723_v61, %v723_v61 }
 0x7a6   :  { %843 = vmatmul.msk.bf16.vlgmr.msrb.gmra.mxu0 %vm463_vm8, %v724_v62 }
 0x7a7   :  { %v721_v36 = vpop.f32.mrf.mxu3 }
 0x823   :  { %v737_v37 = vpop.f32.mrf.mxu0 }
 0x824   :  { %v738_v39 = vadd.f32 %v1138_v34, %v737_v37 }
 0x826   :  { %v741_v6 = vadd.f32 %v738_v39, %v705_v27 }
 0x828   :  { %v742_v40 = vsel %vm119_vm1, %v741_v6, 0.0 }
 0x829   :  { %743 = vadd.xlane.f32.xlu2 %v742_v40 }
 0x82b   :  { %v739_v41 = vpop.f32.mrf.mxu0 }
 0x831   :  { %488 = vadd.xlane.f32.xlu2 %v487_v18 }
 0x89c   :  { %v744_v43 = vpop.xlane.xlu2 %743 }
 0x89d   :  { %v745_v44 = vmul.f32 %v744_v43, %v1080_v48 }
 0x89f   :  { %v746_v45 = vsub.f32 %v741_v6, %v745_v44 }
 0x8a1   :  { %v747_v46 = vmul.f32 %v746_v45, %v746_v45 }
 0x8a3   :  { %v748_v47 = vsel %vm119_vm1, %v747_v46, 0.0 }
 0x8a4   :  { %749 = vadd.xlane.f32.xlu2 %v748_v47  ;;  %v489_v34 = vpop.xlane.xlu2 %488 }
 0x8a5   :  { %v490_v49 = vmul.f32 %v489_v34, %v1080_v48 }
 0x8a7   :  { %v491_v35 = vadd.f32 1e-05, %v490_v49 }
 0x8a9   :  { %894 = vrsqrt.f32 %v491_v35  ;;  %vm498_vm13 = vweird.f32 %v491_v35 }
 0x8af   :  { %v895_v50 = vpop.eup %894 }
 0x8b0   :  { %v493_v51 = vmul.f32 %v895_v50, %v491_v35  ;;  %vm499_vm12 = vweird.f32 %v895_v50 }
 0x8b1   :  { %vm500_vm14 = vmor %vm498_vm13, %vm499_vm12 }
 0x8b2   :  { %v494_v21 = vmul.f32 %v895_v50, %v493_v51 }
 0x8b4   :  { %v495_v52 = vmul.f32 0.5, %v494_v21 }
 0x8b6   :  { %v496_v53 = vsub.f32 1.5, %v495_v52 }
 0x8b8   :  { %v497_v54 = vmul.f32 %v895_v50, %v496_v53 }
 0x8ba   :  { %v501_v56 = vsel %vm500_vm14, %v895_v50, %v497_v54 }
 0x8bb   :  { %v502_v59 = vmul.f32 %v501_v56, %v485_v9 }
 0x8bd   :  { %v506_v32 = vmul.f32 %v866_v55, %v502_v59 }
 0x8bf   :  { %v510_v60 = vadd.f32 %v867_v57, %v506_v32 }
 0x8c1   :  { %511 = vst.msk [vmem:[%s1203_s15] sm:$0xf] %vm119_vm1, %v510_v60 }
 0x917   :  { %v750_v63 = vpop.xlane.xlu2 %749 }
 0x918   :  { %v751_v0 = vmul.f32 %v750_v63, %v1080_v48 }
 0x91a   :  { %v752_v1 = vadd.f32 1e-05, %v751_v0 }
 0x91c   :  { %896 = vrsqrt.f32 %v752_v1  ;;  %vm759_vm0 = vweird.f32 %v752_v1 }
 0x922   :  { %v897_v2 = vpop.eup %896 }
 0x923   :  { %v754_v3 = vmul.f32 %v897_v2, %v752_v1  ;;  %vm760_vm15 = vweird.f32 %v897_v2 }
 0x924   :  { %vm761_vm2 = vmor %vm759_vm0, %vm760_vm15 }
 0x925   :  { %v755_v4 = vmul.f32 %v897_v2, %v754_v3 }
 0x927   :  { %v756_v5 = vmul.f32 0.5, %v755_v4 }
 0x929   :  { %v757_v7 = vsub.f32 1.5, %v756_v5 }
 0x92b   :  { %v758_v8 = vmul.f32 %v897_v2, %v757_v7 }
 0x92d   :  { %v762_v10 = vsel %vm761_vm2, %v897_v2, %v758_v8 }
 0x92e   :  { %v763_v11 = vmul.f32 %v762_v10, %v746_v45 }
 0x930   :  { %v764_v12 = vmul.f32 %v866_v55, %v763_v11 }
 0x932   :  { %v765_v13 = vadd.f32 %v867_v57, %v764_v12 }
 0x934   :  { %844 = vst.msk [vmem:[%s1203_s15 + $0x4] sm:$0xf] %vm119_vm1, %v765_v13 }

</bundles_post_ra>
